<compile_context>
chip_gen: v7x
topology: tpu7x:2x2x1
jax: 0.10.0
libtpu: 0.0.40
codegen_flags: <defaults>
</compile_context>

<pallas_src>
import functools

import jax
import jax.numpy as jnp
from jax.experimental import pallas as pl
from jax.experimental.pallas import tpu as pltpu


def _attention_kernel(x_ref, wqkv_ref, wo_ref, bo_ref, o_ref, *,
                      num_patches, num_head, dim_head, scale, mxu_dtype):
    rows, dim = x_ref.shape            # rows = P * nP
    nP = num_patches
    P = rows // nP
    d_model = num_head * dim_head

    x = x_ref[...]

    # QKV projection for the whole slab: one (P*nP, dim) @ (dim, 3*d_model) matmul.
    qkv = jnp.dot(x.astype(mxu_dtype), wqkv_ref[...].astype(mxu_dtype),
                  preferred_element_type=jnp.float32)            # (rows, 3*d_model) f32

    # Exact torch precedence: q @ (k^T ** scale). One full-width f32 EUP pass
    # over k (negative k -> NaN, same as torch.pow).
    k_pow = jnp.power(qkv[:, d_model:2 * d_model], jnp.float32(scale))

    q = qkv[:, :d_model].reshape(P, nP, d_model)
    kp = k_pow.reshape(P, nP, d_model)
    v = qkv[:, 2 * d_model:].reshape(P, nP, d_model)

    wo = wo_ref[...].astype(mxu_dtype)
    # Exact reciprocal when validating f32 parity; approx EUP recip is fine
    # once MXU operands are bf16 anyway.
    approx_recip = jnp.dtype(mxu_dtype) != jnp.dtype(jnp.float32)

    acc = jnp.zeros((rows, dim), jnp.float32)
    for h in range(num_head):                       # static unroll; num_head is small
        lo = h * dim_head
        q_h = q[:, :, lo:lo + dim_head]             # (P, nP, dh)
        kp_h = kp[:, :, lo:lo + dim_head]           # (P, nP, dh)
        v_h = v[:, :, lo:lo + dim_head]             # (P, nP, dh)

        # Batched over P, contract dim_head on both operands (no transpose).
        score = jnp.einsum('pqd,pkd->pqk',
                           q_h.astype(mxu_dtype), kp_h.astype(mxu_dtype),
                           preferred_element_type=jnp.float32)   # (P, nP, nP) f32

        # Softmax math stays in f32 (v5e has no bf16 VPU/EUP); normalization
        # is deferred to the (nP, dh) context below.
        m = jnp.max(score, axis=-1, keepdims=True)
        e = jnp.exp(score - m)
        l = jnp.sum(e, axis=-1, keepdims=True)

        ctx = jnp.einsum('pqk,pkd->pqd',
                         e.astype(mxu_dtype), v_h.astype(mxu_dtype),
                         preferred_element_type=jnp.float32)     # (P, nP, dh)
        ctx = ctx * pl.reciprocal(l, approx=approx_recip)

        # Fold the head into the output projection: accumulate through the
        # matching (dim_head, dim) sublane slice of w_out (no lane concat).
        acc = acc + jnp.dot(ctx.reshape(rows, dim_head).astype(mxu_dtype),
                            wo[lo:lo + dim_head, :],
                            preferred_element_type=jnp.float32)  # (rows, dim)

    o_ref[...] = (acc + bo_ref[...]).astype(o_ref.dtype)


def mobilevit_attention(x, w_qkv, w_out, b_out, *, num_head, dim_head,
                        mxu_dtype=jnp.float32):
    B, P, nP, dim = x.shape
    d_model = num_head * dim_head
    scale = float(dim_head) ** -0.5
    rows = P * nP

    # Fold (P, nP) into a single row axis: one big, lane/sublane-dense slab per
    # batch element. Attention is still computed per P-slab inside the kernel.
    x2 = x.reshape(B, rows, dim)

    kernel = functools.partial(
        _attention_kernel, num_patches=nP, num_head=num_head,
        dim_head=dim_head, scale=scale, mxu_dtype=mxu_dtype)

    out2 = pl.pallas_call(
        kernel,
        out_shape=jax.ShapeDtypeStruct((B, rows, dim), x.dtype),
        grid_spec=pltpu.PrefetchScalarGridSpec(
            num_scalar_prefetch=0,
            grid=(B,),                              # coarse grid: one batch element/step
            in_specs=[
                pl.BlockSpec((None, rows, dim), lambda b: (b, 0, 0)),
                # weights / bias: constant blocks (same block index every step)
                pl.BlockSpec((dim, 3 * d_model), lambda b: (0, 0)),
                pl.BlockSpec((d_model, dim), lambda b: (0, 0)),
                pl.BlockSpec((1, dim), lambda b: (0, 0)),
            ],
            out_specs=pl.BlockSpec((None, rows, dim), lambda b: (b, 0, 0)),
        ),
        compiler_params=pltpu.CompilerParams(
            dimension_semantics=("parallel",)),     # B >= 2 keeps both v7x cores busy
    )(x2, w_qkv, w_out, b_out.reshape(1, dim))

    return out2.reshape(B, P, nP, dim)


def attention_ref(x, w_qkv, w_out, b_out, *, num_head, dim_head):
    """Pure-JAX mirror of the PyTorch forward (same operator precedence)."""
    B, P, nP, dim = x.shape
    d_model = num_head * dim_head
    scale = float(dim_head) ** -0.5

    qkv = x @ w_qkv
    q, k, v = jnp.split(qkv, 3, axis=-1)

    def to_mh(t):
        return t.reshape(B, P, nP, num_head, dim_head).transpose(0, 1, 3, 2, 4)

    q, k, v = to_mh(q), to_mh(k), to_mh(v)
    kT = jnp.swapaxes(k, -1, -2)
    score = q @ jnp.power(kT, jnp.float32(scale))
    probs = jax.nn.softmax(score, axis=-1)
    attn = probs @ v
    attn = attn.transpose(0, 1, 3, 2, 4).reshape(B, P, nP, d_model)
    return attn @ w_out + b_out


if __name__ == "__main__":
    # Small, deterministic configuration.
    B, P, nP = 2, 2, 64
    dim, num_head, dim_head = 32, 4, 16
    d_model = num_head * dim_head

    key = jax.random.PRNGKey(0)
    kx, kw, kwo, kbo = jax.random.split(key, 4)

    # Non-negative x and QKV weights keep k > 0, so the elementwise fractional
    # power (the module's real semantics) produces no NaN and the numeric
    # comparison below is a genuine check rather than NaN == NaN. Modest weight
    # scale keeps attention scores O(few) so the comparison is well-conditioned
    # regardless of the backend's default f32-matmul precision.
    x = jnp.abs(jax.random.normal(kx, (B, P, nP, dim), dtype=jnp.float32))
    w_qkv = 0.02 * jnp.abs(jax.random.normal(kw, (dim, 3 * d_model), dtype=jnp.float32))
    w_out = 0.1 * jax.random.normal(kwo, (d_model, dim), dtype=jnp.float32)
    b_out = 0.1 * jax.random.normal(kbo, (dim,), dtype=jnp.float32)

    ref = attention_ref(x, w_qkv, w_out, b_out,
                        num_head=num_head, dim_head=dim_head)
    assert not bool(jnp.isnan(ref).any())           # comparison is non-vacuous

    # f32 MXU-operand path: numerical parity with the fp32 PyTorch module.
    out = mobilevit_attention(x, w_qkv, w_out, b_out,
                              num_head=num_head, dim_head=dim_head)
    out = jax.block_until_ready(out)
    assert out.shape == (B, P, nP, dim)
    assert bool(jnp.allclose(out, ref, rtol=3e-2, atol=3e-2))

    # bf16 MXU-operand path (recommended on v6e/v7x): only matmul operands are
    # down-cast; accumulation and softmax/power stay in f32. Loose sanity bound
    # only — bf16 operands are intentionally not bit-parity with fp32.
    out_bf16 = mobilevit_attention(x, w_qkv, w_out, b_out,
                                   num_head=num_head, dim_head=dim_head,
                                   mxu_dtype=jnp.bfloat16)
    out_bf16 = jax.block_until_ready(out_bf16)
    assert out_bf16.shape == (B, P, nP, dim)
    assert bool(jnp.isfinite(out_bf16).all())
    assert bool(jnp.allclose(out_bf16, ref, rtol=1e-1, atol=1e-1))

    print("KERNEL_OK")
</pallas_src>

<mosaic_0001>
module attributes {stable_mosaic.version = 11 : i64} {
  func.func @_attention_kernel(%arg0: i32, %arg1: memref<1x128x32xf32, #tpu.memory_space<vmem>>, %arg2: memref<32x192xf32, #tpu.memory_space<vmem>>, %arg3: memref<64x32xf32, #tpu.memory_space<vmem>>, %arg4: memref<1x32xf32, #tpu.memory_space<vmem>>, %arg5: memref<1x128x32xf32, #tpu.memory_space<vmem>>) attributes {dimension_semantics = [#tpu.dimension_semantics<parallel>], iteration_bounds = array<i64: 2>, scalar_prefetch = 0 : i64, scratch_operands = 0 : i64, tpu.core_type = #tpu.core_type<tc>, window_params = [{transform_indices = @transform_0, window_bounds = array<i64: 1, 128, 32>}, {pipeline_mode = #tpu.pipeline_mode<synchronous>, transform_indices = @transform_1, window_bounds = array<i64: 32, 192>}, {pipeline_mode = #tpu.pipeline_mode<synchronous>, transform_indices = @transform_2, window_bounds = array<i64: 64, 32>}, {pipeline_mode = #tpu.pipeline_mode<synchronous>, transform_indices = @transform_3, window_bounds = array<i64: 1, 32>}, {transform_indices = @transform_4, window_bounds = array<i64: 1, 128, 32>}]} {
    %c0 = arith.constant 0 : index
    %c0_0 = arith.constant 0 : index
    %c0_1 = arith.constant 0 : index
    %0 = vector.load %arg1[%c0, %c0_0, %c0_1] : memref<1x128x32xf32, #tpu.memory_space<vmem>>, vector<1x128x32xf32>
    %1 = vector.shape_cast %0 : vector<1x128x32xf32> to vector<128x32xf32>
    %c0_2 = arith.constant 0 : index
    %c0_3 = arith.constant 0 : index
    %2 = vector.load %arg2[%c0_2, %c0_3] : memref<32x192xf32, #tpu.memory_space<vmem>>, vector<32x192xf32>
    %cst = arith.constant dense<0.000000e+00> : vector<128x192xf32>
    %3 = tpu.matmul %1, %2, %cst {dimension_numbers = #tpu.dot_dimension_numbers<[1], [0], [0], [1], [0, 0, 1, 1], [], []>} : vector<128x32xf32>, vector<32x192xf32>, vector<128x192xf32> -> vector<128x192xf32>
    %4 = vector.extract_strided_slice %3 {offsets = [0, 64], sizes = [128, 64], strides = [1, 1]} : vector<128x192xf32> to vector<128x64xf32>
    %cst_4 = arith.constant 2.500000e-01 : f32
    %5 = vector.broadcast %cst_4 : f32 to vector<128x64xf32>
    %6 = math.powf %4, %5 : vector<128x64xf32>
    %7 = vector.extract_strided_slice %3 {offsets = [0, 0], sizes = [128, 64], strides = [1, 1]} : vector<128x192xf32> to vector<128x64xf32>
    %8 = vector.shape_cast %7 : vector<128x64xf32> to vector<2x64x64xf32>
    %9 = vector.shape_cast %6 : vector<128x64xf32> to vector<2x64x64xf32>
    %10 = vector.extract_strided_slice %3 {offsets = [0, 128], sizes = [128, 64], strides = [1, 1]} : vector<128x192xf32> to vector<128x64xf32>
    %11 = vector.shape_cast %10 : vector<128x64xf32> to vector<2x64x64xf32>
    %c0_5 = arith.constant 0 : index
    %c0_6 = arith.constant 0 : index
    %12 = vector.load %arg3[%c0_5, %c0_6] : memref<64x32xf32, #tpu.memory_space<vmem>>, vector<64x32xf32>
    %cst_7 = arith.constant 0.000000e+00 : f32
    %13 = vector.broadcast %cst_7 : f32 to vector<128x32xf32>
    %14 = vector.extract_strided_slice %8 {offsets = [0, 0, 0], sizes = [2, 64, 16], strides = [1, 1, 1]} : vector<2x64x64xf32> to vector<2x64x16xf32>
    %15 = vector.extract_strided_slice %9 {offsets = [0, 0, 0], sizes = [2, 64, 16], strides = [1, 1, 1]} : vector<2x64x64xf32> to vector<2x64x16xf32>
    %16 = vector.extract_strided_slice %11 {offsets = [0, 0, 0], sizes = [2, 64, 16], strides = [1, 1, 1]} : vector<2x64x64xf32> to vector<2x64x16xf32>
    "tpu.trace_start"() <{level = 10 : i32, message = "pqd,pkd->pqk"}> : () -> ()
    %cst_8 = arith.constant dense<0.000000e+00> : vector<2x64x64xf32>
    %17 = tpu.matmul %14, %15, %cst_8 {dimension_numbers = #tpu.dot_dimension_numbers<[2], [2], [1], [1], [0, 0, 0, 1, 1, 1], [0], [0]>} : vector<2x64x16xf32>, vector<2x64x16xf32>, vector<2x64x64xf32> -> vector<2x64x64xf32>
    "tpu.trace_stop"() : () -> ()
    %cst_9 = arith.constant dense<0xFF800000> : vector<2x64xf32>
    %18 = vector.multi_reduction <maximumf>, %17, %cst_9 [2] : vector<2x64x64xf32> to vector<2x64xf32>
    %19 = vector.shape_cast %18 : vector<2x64xf32> to vector<2x64x1xf32>
    %20 = vector.broadcast %19 : vector<2x64x1xf32> to vector<2x64x64xf32>
    %21 = arith.subf %17, %20 : vector<2x64x64xf32>
    %22 = math.exp %21 : vector<2x64x64xf32>
    %cst_10 = arith.constant dense<0.000000e+00> : vector<2x64xf32>
    %23 = vector.multi_reduction <add>, %22, %cst_10 [2] : vector<2x64x64xf32> to vector<2x64xf32>
    %24 = vector.shape_cast %23 : vector<2x64xf32> to vector<2x64x1xf32>
    "tpu.trace_start"() <{level = 10 : i32, message = "pqk,pkd->pqd"}> : () -> ()
    %cst_11 = arith.constant dense<0.000000e+00> : vector<2x64x16xf32>
    %25 = tpu.matmul %22, %16, %cst_11 {dimension_numbers = #tpu.dot_dimension_numbers<[2], [1], [1], [2], [0, 0, 0, 1, 1, 2], [0], [0]>} : vector<2x64x64xf32>, vector<2x64x16xf32>, vector<2x64x16xf32> -> vector<2x64x16xf32>
    "tpu.trace_stop"() : () -> ()
    %26 = tpu.reciprocal %24 : vector<2x64x1xf32> -> vector<2x64x1xf32>
    %27 = vector.broadcast %26 : vector<2x64x1xf32> to vector<2x64x16xf32>
    %28 = arith.mulf %25, %27 : vector<2x64x16xf32>
    %29 = vector.shape_cast %28 : vector<2x64x16xf32> to vector<128x16xf32>
    %30 = vector.extract_strided_slice %12 {offsets = [0, 0], sizes = [16, 32], strides = [1, 1]} : vector<64x32xf32> to vector<16x32xf32>
    %cst_12 = arith.constant dense<0.000000e+00> : vector<128x32xf32>
    %31 = tpu.matmul %29, %30, %cst_12 {dimension_numbers = #tpu.dot_dimension_numbers<[1], [0], [0], [1], [0, 0, 1, 1], [], []>} : vector<128x16xf32>, vector<16x32xf32>, vector<128x32xf32> -> vector<128x32xf32>
    %32 = arith.addf %13, %31 : vector<128x32xf32>
    %33 = vector.extract_strided_slice %8 {offsets = [0, 0, 16], sizes = [2, 64, 16], strides = [1, 1, 1]} : vector<2x64x64xf32> to vector<2x64x16xf32>
    %34 = vector.extract_strided_slice %9 {offsets = [0, 0, 16], sizes = [2, 64, 16], strides = [1, 1, 1]} : vector<2x64x64xf32> to vector<2x64x16xf32>
    %35 = vector.extract_strided_slice %11 {offsets = [0, 0, 16], sizes = [2, 64, 16], strides = [1, 1, 1]} : vector<2x64x64xf32> to vector<2x64x16xf32>
    "tpu.trace_start"() <{level = 10 : i32, message = "pqd,pkd->pqk"}> : () -> ()
    %cst_13 = arith.constant dense<0.000000e+00> : vector<2x64x64xf32>
    %36 = tpu.matmul %33, %34, %cst_13 {dimension_numbers = #tpu.dot_dimension_numbers<[2], [2], [1], [1], [0, 0, 0, 1, 1, 1], [0], [0]>} : vector<2x64x16xf32>, vector<2x64x16xf32>, vector<2x64x64xf32> -> vector<2x64x64xf32>
    "tpu.trace_stop"() : () -> ()
    %cst_14 = arith.constant dense<0xFF800000> : vector<2x64xf32>
    %37 = vector.multi_reduction <maximumf>, %36, %cst_14 [2] : vector<2x64x64xf32> to vector<2x64xf32>
    %38 = vector.shape_cast %37 : vector<2x64xf32> to vector<2x64x1xf32>
    %39 = vector.broadcast %38 : vector<2x64x1xf32> to vector<2x64x64xf32>
    %40 = arith.subf %36, %39 : vector<2x64x64xf32>
    %41 = math.exp %40 : vector<2x64x64xf32>
    %cst_15 = arith.constant dense<0.000000e+00> : vector<2x64xf32>
    %42 = vector.multi_reduction <add>, %41, %cst_15 [2] : vector<2x64x64xf32> to vector<2x64xf32>
    %43 = vector.shape_cast %42 : vector<2x64xf32> to vector<2x64x1xf32>
    "tpu.trace_start"() <{level = 10 : i32, message = "pqk,pkd->pqd"}> : () -> ()
    %cst_16 = arith.constant dense<0.000000e+00> : vector<2x64x16xf32>
    %44 = tpu.matmul %41, %35, %cst_16 {dimension_numbers = #tpu.dot_dimension_numbers<[2], [1], [1], [2], [0, 0, 0, 1, 1, 2], [0], [0]>} : vector<2x64x64xf32>, vector<2x64x16xf32>, vector<2x64x16xf32> -> vector<2x64x16xf32>
    "tpu.trace_stop"() : () -> ()
    %45 = tpu.reciprocal %43 : vector<2x64x1xf32> -> vector<2x64x1xf32>
    %46 = vector.broadcast %45 : vector<2x64x1xf32> to vector<2x64x16xf32>
    %47 = arith.mulf %44, %46 : vector<2x64x16xf32>
    %48 = vector.shape_cast %47 : vector<2x64x16xf32> to vector<128x16xf32>
    %49 = vector.extract_strided_slice %12 {offsets = [16, 0], sizes = [16, 32], strides = [1, 1]} : vector<64x32xf32> to vector<16x32xf32>
    %cst_17 = arith.constant dense<0.000000e+00> : vector<128x32xf32>
    %50 = tpu.matmul %48, %49, %cst_17 {dimension_numbers = #tpu.dot_dimension_numbers<[1], [0], [0], [1], [0, 0, 1, 1], [], []>} : vector<128x16xf32>, vector<16x32xf32>, vector<128x32xf32> -> vector<128x32xf32>
    %51 = arith.addf %32, %50 : vector<128x32xf32>
    %52 = vector.extract_strided_slice %8 {offsets = [0, 0, 32], sizes = [2, 64, 16], strides = [1, 1, 1]} : vector<2x64x64xf32> to vector<2x64x16xf32>
    %53 = vector.extract_strided_slice %9 {offsets = [0, 0, 32], sizes = [2, 64, 16], strides = [1, 1, 1]} : vector<2x64x64xf32> to vector<2x64x16xf32>
    %54 = vector.extract_strided_slice %11 {offsets = [0, 0, 32], sizes = [2, 64, 16], strides = [1, 1, 1]} : vector<2x64x64xf32> to vector<2x64x16xf32>
    "tpu.trace_start"() <{level = 10 : i32, message = "pqd,pkd->pqk"}> : () -> ()
    %cst_18 = arith.constant dense<0.000000e+00> : vector<2x64x64xf32>
    %55 = tpu.matmul %52, %53, %cst_18 {dimension_numbers = #tpu.dot_dimension_numbers<[2], [2], [1], [1], [0, 0, 0, 1, 1, 1], [0], [0]>} : vector<2x64x16xf32>, vector<2x64x16xf32>, vector<2x64x64xf32> -> vector<2x64x64xf32>
    "tpu.trace_stop"() : () -> ()
    %cst_19 = arith.constant dense<0xFF800000> : vector<2x64xf32>
    %56 = vector.multi_reduction <maximumf>, %55, %cst_19 [2] : vector<2x64x64xf32> to vector<2x64xf32>
    %57 = vector.shape_cast %56 : vector<2x64xf32> to vector<2x64x1xf32>
    %58 = vector.broadcast %57 : vector<2x64x1xf32> to vector<2x64x64xf32>
    %59 = arith.subf %55, %58 : vector<2x64x64xf32>
    %60 = math.exp %59 : vector<2x64x64xf32>
    %cst_20 = arith.constant dense<0.000000e+00> : vector<2x64xf32>
    %61 = vector.multi_reduction <add>, %60, %cst_20 [2] : vector<2x64x64xf32> to vector<2x64xf32>
    %62 = vector.shape_cast %61 : vector<2x64xf32> to vector<2x64x1xf32>
    "tpu.trace_start"() <{level = 10 : i32, message = "pqk,pkd->pqd"}> : () -> ()
    %cst_21 = arith.constant dense<0.000000e+00> : vector<2x64x16xf32>
    %63 = tpu.matmul %60, %54, %cst_21 {dimension_numbers = #tpu.dot_dimension_numbers<[2], [1], [1], [2], [0, 0, 0, 1, 1, 2], [0], [0]>} : vector<2x64x64xf32>, vector<2x64x16xf32>, vector<2x64x16xf32> -> vector<2x64x16xf32>
    "tpu.trace_stop"() : () -> ()
    %64 = tpu.reciprocal %62 : vector<2x64x1xf32> -> vector<2x64x1xf32>
    %65 = vector.broadcast %64 : vector<2x64x1xf32> to vector<2x64x16xf32>
    %66 = arith.mulf %63, %65 : vector<2x64x16xf32>
    %67 = vector.shape_cast %66 : vector<2x64x16xf32> to vector<128x16xf32>
    %68 = vector.extract_strided_slice %12 {offsets = [32, 0], sizes = [16, 32], strides = [1, 1]} : vector<64x32xf32> to vector<16x32xf32>
    %cst_22 = arith.constant dense<0.000000e+00> : vector<128x32xf32>
    %69 = tpu.matmul %67, %68, %cst_22 {dimension_numbers = #tpu.dot_dimension_numbers<[1], [0], [0], [1], [0, 0, 1, 1], [], []>} : vector<128x16xf32>, vector<16x32xf32>, vector<128x32xf32> -> vector<128x32xf32>
    %70 = arith.addf %51, %69 : vector<128x32xf32>
    %71 = vector.extract_strided_slice %8 {offsets = [0, 0, 48], sizes = [2, 64, 16], strides = [1, 1, 1]} : vector<2x64x64xf32> to vector<2x64x16xf32>
    %72 = vector.extract_strided_slice %9 {offsets = [0, 0, 48], sizes = [2, 64, 16], strides = [1, 1, 1]} : vector<2x64x64xf32> to vector<2x64x16xf32>
    %73 = vector.extract_strided_slice %11 {offsets = [0, 0, 48], sizes = [2, 64, 16], strides = [1, 1, 1]} : vector<2x64x64xf32> to vector<2x64x16xf32>
    "tpu.trace_start"() <{level = 10 : i32, message = "pqd,pkd->pqk"}> : () -> ()
    %cst_23 = arith.constant dense<0.000000e+00> : vector<2x64x64xf32>
    %74 = tpu.matmul %71, %72, %cst_23 {dimension_numbers = #tpu.dot_dimension_numbers<[2], [2], [1], [1], [0, 0, 0, 1, 1, 1], [0], [0]>} : vector<2x64x16xf32>, vector<2x64x16xf32>, vector<2x64x64xf32> -> vector<2x64x64xf32>
    "tpu.trace_stop"() : () -> ()
    %cst_24 = arith.constant dense<0xFF800000> : vector<2x64xf32>
    %75 = vector.multi_reduction <maximumf>, %74, %cst_24 [2] : vector<2x64x64xf32> to vector<2x64xf32>
    %76 = vector.shape_cast %75 : vector<2x64xf32> to vector<2x64x1xf32>
    %77 = vector.broadcast %76 : vector<2x64x1xf32> to vector<2x64x64xf32>
    %78 = arith.subf %74, %77 : vector<2x64x64xf32>
    %79 = math.exp %78 : vector<2x64x64xf32>
    %cst_25 = arith.constant dense<0.000000e+00> : vector<2x64xf32>
    %80 = vector.multi_reduction <add>, %79, %cst_25 [2] : vector<2x64x64xf32> to vector<2x64xf32>
    %81 = vector.shape_cast %80 : vector<2x64xf32> to vector<2x64x1xf32>
    "tpu.trace_start"() <{level = 10 : i32, message = "pqk,pkd->pqd"}> : () -> ()
    %cst_26 = arith.constant dense<0.000000e+00> : vector<2x64x16xf32>
    %82 = tpu.matmul %79, %73, %cst_26 {dimension_numbers = #tpu.dot_dimension_numbers<[2], [1], [1], [2], [0, 0, 0, 1, 1, 2], [0], [0]>} : vector<2x64x64xf32>, vector<2x64x16xf32>, vector<2x64x16xf32> -> vector<2x64x16xf32>
    "tpu.trace_stop"() : () -> ()
    %83 = tpu.reciprocal %81 : vector<2x64x1xf32> -> vector<2x64x1xf32>
    %84 = vector.broadcast %83 : vector<2x64x1xf32> to vector<2x64x16xf32>
    %85 = arith.mulf %82, %84 : vector<2x64x16xf32>
    %86 = vector.shape_cast %85 : vector<2x64x16xf32> to vector<128x16xf32>
    %87 = vector.extract_strided_slice %12 {offsets = [48, 0], sizes = [16, 32], strides = [1, 1]} : vector<64x32xf32> to vector<16x32xf32>
    %cst_27 = arith.constant dense<0.000000e+00> : vector<128x32xf32>
    %88 = tpu.matmul %86, %87, %cst_27 {dimension_numbers = #tpu.dot_dimension_numbers<[1], [0], [0], [1], [0, 0, 1, 1], [], []>} : vector<128x16xf32>, vector<16x32xf32>, vector<128x32xf32> -> vector<128x32xf32>
    %89 = arith.addf %70, %88 : vector<128x32xf32>
    %c0_28 = arith.constant 0 : index
    %c0_29 = arith.constant 0 : index
    %90 = vector.load %arg4[%c0_28, %c0_29] : memref<1x32xf32, #tpu.memory_space<vmem>>, vector<1x32xf32>
    %91 = vector.broadcast %90 : vector<1x32xf32> to vector<128x32xf32>
    %92 = arith.addf %89, %91 : vector<128x32xf32>
    %c0_30 = arith.constant 0 : index
    %c0_31 = arith.constant 0 : index
    %c0_32 = arith.constant 0 : index
    %93 = vector.load %arg5[%c0_30, %c0_31, %c0_32] : memref<1x128x32xf32, #tpu.memory_space<vmem>>, vector<1x128x32xf32>
    %94 = vector.shape_cast %93 : vector<1x128x32xf32> to vector<128x32xf32>
    %95 = vector.shape_cast %92 : vector<128x32xf32> to vector<1x128x32xf32>
    tpu.vector_store %arg5[%c0_30, %c0_31, %c0_32], %95 {strides = array<i32>} : memref<1x128x32xf32, #tpu.memory_space<vmem>>, vector<1x128x32xf32>,
    return
  }
  func.func @transform_0(%arg0: i32) -> (i32, i32, i32) {
    %c0_i32 = arith.constant 0 : i32
    %c0_i32_0 = arith.constant 0 : i32
    %c0_i32_1 = arith.constant 0 : i32
    return %arg0, %c0_i32, %c0_i32_0 : i32, i32, i32
  }
  func.func @transform_1(%arg0: i32) -> (i32, i32) {
    %c0_i32 = arith.constant 0 : i32
    %c0_i32_0 = arith.constant 0 : i32
    %c0_i32_1 = arith.constant 0 : i32
    return %c0_i32, %c0_i32_0 : i32, i32
  }
  func.func @transform_2(%arg0: i32) -> (i32, i32) {
    %c0_i32 = arith.constant 0 : i32
    %c0_i32_0 = arith.constant 0 : i32
    %c0_i32_1 = arith.constant 0 : i32
    return %c0_i32, %c0_i32_0 : i32, i32
  }
  func.func @transform_3(%arg0: i32) -> (i32, i32) {
    %c0_i32 = arith.constant 0 : i32
    %c0_i32_0 = arith.constant 0 : i32
    %c0_i32_1 = arith.constant 0 : i32
    return %c0_i32, %c0_i32_0 : i32, i32
  }
  func.func @transform_4(%arg0: i32) -> (i32, i32, i32) {
    %c0_i32 = arith.constant 0 : i32
    %c0_i32_0 = arith.constant 0 : i32
    %c0_i32_1 = arith.constant 0 : i32
    return %arg0, %c0_i32, %c0_i32_0 : i32, i32, i32
  }
}

</mosaic_0001>

<bundles_post_ra>
// kernel: tpu_custom_call.1
= control target key start
LH: loop header
LB: loop body
LE: loop exit
PB: predicated region body
PF: predicated region fallthrough
CT: control target
= control target key end

     0   :  { %s6975_s15 = smov 0   ;;  %s8728_s0 = inlined_call_operand.vmem [shape: f32[2,128,32], index: 0, kind: input, shape index: {}]   ;;  %s8729_s1 = inlined_call_operand.vmem [shape: f32[32,192], index: 1, kind: input, shape index: {}]   ;;  %s8730_s2 = inlined_call_operand.vmem [shape: f32[64,32], index: 2, kind: input, shape index: {}]   ;;  %s8731_s3 = inlined_call_operand.vmem [shape: f32[1,32], index: 3, kind: input, shape index: {}]   ;;  %s8732_s4 = inlined_call_operand.vmem [shape: f32[2,128,32], index: 4, kind: output, shape index: {}]  }
   0x1 LB: > { %s4604_s16 = sadd.s32 4294967295, %s6940_s15   ;;  %p4608_p0 = scmp.ge.s32.totalorder %s6940_s15, 1  ;;  %s6940_s15 = sphi %s6975_s15, %s14_s15  }
   0x2   : > { %p162_p1 = scmp.lt.s32.totalorder %s6940_s15, 3 }
   0x4   : > { %p163_p2 = pnand %p4608_p0, %p162_p1 }
   0x6   : > { %166 = sbr.rel (%p163_p2) target bundleno = 2930 (0xb72), region = 36 }
   0xd   : > { %v215_v0 = vld [vmem:[%s8729_s1 + $0x8] sm:$0xff]  ;;  %v217_v1 = vld [vmem:[%s8729_s1 + $0x18] sm:$0xff]  ;;  %v214_v2 = vld [vmem:[%s8729_s1] sm:$0xff]  ;;  %p188_p3 = scmp.lt.s32.totalorder %s4604_s16, 1  ;;  %v6942_v7 = vmov 0.0   ;;  %vm8733_vm0 = vcmask 261120  }
   0xe   : > { %v5778_v3 = vpack.c.bf16 %v217_v1, %v215_v0  ;;  %v216_v4 = vld [vmem:[%s8729_s1 + $0x10] sm:$0xff]  ;;  %v219_v5 = vld [vmem:[%s8729_s1 + $0x28] sm:$0xff]  ;;  %v221_v6 = vld [vmem:[%s8729_s1 + $0x38] sm:$0xff]  ;;  %335 = vmatprep.mubr.f32.mxu0 %v6942_v7  ;;  %383 = vmatprep.mubr.f32.mxu1 %v6942_v7  ;;  %vm8734_vm1 = vcmask 130048   ;;  %s6943_s11 = smov 64   ;;  %s6944_s12 = smov 48  }
   0xf   : > { %v5780_v8 = vpack.c.bf16 %v216_v4, %v214_v2  ;;  %v5782_v9 = vpack.c.bf16 %v221_v6, %v219_v5  ;;  %v218_v10 = vld [vmem:[%s8729_s1 + $0x20] sm:$0xff]  ;;  %v220_v11 = vld [vmem:[%s8729_s1 + $0x30] sm:$0xff]  ;;  %s9043_s16 = smov (!%p188_p3, %s4604_s16), 1  ;;  %s6945_s13 = smov 112  }
  0x10   : > { %5779 = vmatprep.subr.bf16.mxu0 %v5778_v3  ;;  %6122 = vmatprep.subr.bf16.mxu1 %v5778_v3  ;;  %v5784_v12 = vpack.c.bf16 %v220_v11, %v218_v10  ;;  %s4888_s7 = sshll.u32 %s9043_s16, 7  ;;  %s6946_s14 = smov 32  }
  0x11   : > { %5781 = vmatpush1.bf16.msra.mxu0 %v5780_v8  ;;  %6124 = vmatpush1.bf16.msra.mxu1 %v5780_v8  ;;  %s7015_s10 = scalar_lea.vmem %s8728_s0, %s4888_s7  ;;  %s6947_s17 = smov 96  }
  0x12   : > { %5783 = vmatprep.subr.bf16.mxu0 %v5782_v9  ;;  %6123 = vmatprep.subr.bf16.mxu1 %v5782_v9  ;;  %v198_v13 = vld [vmem:[%s7015_s10] sm:$0xff]  ;;  %v199_v15 = vld [vmem:[%s7015_s10 + $0x8] sm:$0xff]  ;;  %v200_v17 = vld [vmem:[%s7015_s10 + $0x10] sm:$0xff]  ;;  %s6948_s26 = smov 16   ;;  %s6949_s27 = smov 80  }
  0x13   : > { %v206_v14 = vld [vmem:[%s7015_s10 + $0x40] sm:$0xff]  ;;  %v207_v16 = vld [vmem:[%s7015_s10 + $0x48] sm:$0xff]  ;;  %v208_v18 = vld [vmem:[%s7015_s10 + $0x50] sm:$0xff] }
  0x14   : > { %v201_v19 = vld [vmem:[%s7015_s10 + $0x18] sm:$0xff]  ;;  %v202_v21 = vld [vmem:[%s7015_s10 + $0x20] sm:$0xff]  ;;  %v203_v23 = vld [vmem:[%s7015_s10 + $0x28] sm:$0xff] }
  0x15   : > { %5785 = vmatpush1.bf16.msra.mxu0 %v5784_v12  ;;  %6125 = vmatpush1.bf16.msra.mxu1 %v5784_v12  ;;  %v209_v20 = vld [vmem:[%s7015_s10 + $0x58] sm:$0xff]  ;;  %v210_v22 = vld [vmem:[%s7015_s10 + $0x60] sm:$0xff]  ;;  %v211_v24 = vld [vmem:[%s7015_s10 + $0x68] sm:$0xff] }
  0x16   : > { %v204_v25 = vld [vmem:[%s7015_s10 + $0x30] sm:$0xff]  ;;  %v205_v27 = vld [vmem:[%s7015_s10 + $0x38] sm:$0xff] }
  0x17   : > { %v212_v26 = vld [vmem:[%s7015_s10 + $0x70] sm:$0xff]  ;;  %v213_v28 = vld [vmem:[%s7015_s10 + $0x78] sm:$0xff] }
  0x18   : > { %4613 = vmatmul.mubr.msk.f32.vlgmr.msra.gmra.mrb[0].mxu0 %vm8733_vm0, %v198_v13  ;;  %4621 = vmatmul.mubr.msk.f32.vlgmr.msra.gmra.mrb[0].mxu1 %vm8733_vm0, %v206_v14 }
  0x19   : > { %341 = vmatprep.mubr.f32.mxu0 %v6942_v7  ;;  %389 = vmatprep.mubr.f32.mxu1 %v6942_v7 }
  0x1c   : > { %4614 = vmatmul.mubr.msk.f32.gmra.mrb[2].mxu0 %vm8733_vm0, %v199_v15  ;;  %4622 = vmatmul.mubr.msk.f32.gmra.mrb[2].mxu1 %vm8733_vm0, %v207_v16 }
  0x1d   : > { %347 = vmatprep.mubr.f32.mxu0 %v6942_v7  ;;  %395 = vmatprep.mubr.f32.mxu1 %v6942_v7 }
  0x20   : > { %4615 = vmatmul.mubr.msk.f32.gmra.mrb[4].mxu0 %vm8733_vm0, %v200_v17  ;;  %4623 = vmatmul.mubr.msk.f32.gmra.mrb[4].mxu1 %vm8733_vm0, %v208_v18 }
  0x21   : > { %353 = vmatprep.mubr.f32.mxu0 %v6942_v7  ;;  %401 = vmatprep.mubr.f32.mxu1 %v6942_v7 }
  0x24   : > { %4616 = vmatmul.mubr.msk.f32.gmra.mrb[6].mxu0 %vm8733_vm0, %v201_v19  ;;  %4624 = vmatmul.mubr.msk.f32.gmra.mrb[6].mxu1 %vm8733_vm0, %v209_v20 }
  0x25   : > { %359 = vmatprep.mubr.f32.mxu0 %v6942_v7  ;;  %407 = vmatprep.mubr.f32.mxu1 %v6942_v7 }
  0x28   : > { %4617 = vmatmul.mubr.msk.f32.gmra.mrb[8].mxu0 %vm8733_vm0, %v202_v21  ;;  %4625 = vmatmul.mubr.msk.f32.gmra.mrb[8].mxu1 %vm8733_vm0, %v210_v22 }
  0x29   : > { %365 = vmatprep.mubr.f32.mxu0 %v6942_v7  ;;  %413 = vmatprep.mubr.f32.mxu1 %v6942_v7 }
  0x2c   : > { %4618 = vmatmul.mubr.msk.f32.gmra.mrb[10].mxu0 %vm8733_vm0, %v203_v23  ;;  %4626 = vmatmul.mubr.msk.f32.gmra.mrb[10].mxu1 %vm8733_vm0, %v211_v24 }
  0x2d   : > { %371 = vmatprep.mubr.f32.mxu0 %v6942_v7  ;;  %419 = vmatprep.mubr.f32.mxu1 %v6942_v7 }
  0x30   : > { %4619 = vmatmul.mubr.msk.f32.gmra.mrb[12].mxu0 %vm8733_vm0, %v204_v25  ;;  %4627 = vmatmul.mubr.msk.f32.gmra.mrb[12].mxu1 %vm8733_vm0, %v212_v26 }
  0x31   : > { %377 = vmatprep.mubr.f32.mxu0 %v6942_v7  ;;  %425 = vmatprep.mubr.f32.mxu1 %v6942_v7 }
  0x34   : > { %4620 = vmatmul.mubr.msk.f32.gmra.mrb[14].mxu0 %vm8733_vm0, %v205_v27  ;;  %4628 = vmatmul.mubr.msk.f32.gmra.mrb[14].mxu1 %vm8733_vm0, %v213_v28 }
  0xeb   : > { %v7049_v29 = vpop.f32.mrb[0].mxu0  ;;  %v7051_v30 = vpop.f32.mrb[0].mxu1 }
  0xec   : > { %8769 = vst [vmem:[#allocation2_spill] sm:$0xff] %v7049_v29  ;;  %8770 = vst [vmem:[#allocation3_spill] sm:$0xff] %v7051_v30  ;;  %6614 = vrsqrt.f32 %v7049_v29  ;;  %v339_v31 = vpop.f32.mrb[1].mxu0  ;;  %5234 = vmatprep.mubr.msk.f32.mxu1 %vm8734_vm1, %v7049_v29  ;;  %v387_v32 = vpop.f32.mrb[1].mxu1  ;;  %v6248_v55 = vand.u32 2147483647, %v7051_v30 }
  0xed   : > { %6616 = vrsqrt.f32 %v7051_v30  ;;  %v6176_v59 = vand.u32 2147483647, %v7049_v29  ;;  %vm6174_vm2 = vcmp.eq.f32.partialorder %v7049_v29, 0.0  ;;  %vm6175_vm3 = vcmp.lt.f32.partialorder %v7049_v29, 0.0 }
  0xee   : > { %vm6246_vm4 = vcmp.eq.f32.partialorder %v7051_v30, 0.0  ;;  %vm6247_vm5 = vcmp.lt.f32.partialorder %v7051_v30, 0.0  ;;  %vm7101_vm7 = vcmp.eq.f32.partialorder %v6248_v55, inf }
  0xef   : > { %v7057_v33 = vpop.f32.mrb[2].mxu0  ;;  %v7059_v34 = vpop.f32.mrb[2].mxu1  ;;  %vm7111_vm8 = vcmp.eq.f32.partialorder %v6176_v59, inf }
  0xf0   : > { %8771 = vst [vmem:[#allocation4_spill] sm:$0xff] %v7057_v33  ;;  %8772 = vst [vmem:[#allocation5_spill] sm:$0xff] %v7059_v34  ;;  %6618 = vrsqrt.f32 %v7057_v33  ;;  %v345_v35 = vpop.f32.mrb[3].mxu0  ;;  %v393_v36 = vpop.f32.mrb[3].mxu1  ;;  %v6185_v62 = vand.u32 2147483647, %v7057_v33 }
  0xf1   : > { %v7062_v37 = vpack.i.bf16 %v345_v35, %v339_v31  ;;  %v5834_v38 = vpack.c.bf16 %v345_v35, %v339_v31  ;;  %6620 = vrsqrt.f32 %v7059_v34  ;;  %v7065_v39 = vpack.i.bf16 %v393_v36, %v387_v32 }
  0xf2   : > { %v7071_v42 = vpack.c.bf16 %v393_v36, %v387_v32  ;;  %vm6183_vm6 = vcmp.eq.f32.partialorder %v7057_v33, 0.0  ;;  %vm6184_vm9 = vcmp.lt.f32.partialorder %v7057_v33, 0.0  ;;  %vm7119_vm10 = vcmp.eq.f32.partialorder %v6185_v62, inf }
  0xf3   : > { %8773 = vst [vmem:[#allocation6_spill] sm:$0xff] %v7062_v37  ;;  %8774 = vst [vmem:[#allocation7_spill] sm:$0xff] %v7065_v39  ;;  %v7067_v40 = vpop.f32.mrb[4].mxu0  ;;  %5835 = vmatprep.subr.bf16.mxu0 %v5834_v38  ;;  %v7069_v41 = vpop.f32.mrb[4].mxu1  ;;  %vm6255_vm11 = vcmp.eq.f32.partialorder %v7059_v34, 0.0  ;;  %vm6256_vm12 = vcmp.lt.f32.partialorder %v7059_v34, 0.0 }
  0xf4   : > { %8775 = vst [vmem:[#allocation8_spill] sm:$0xff] %v7067_v40  ;;  %8776 = vst [vmem:[#allocation9_spill] sm:$0xff] %v7069_v41  ;;  %6622 = vrsqrt.f32 %v7067_v40  ;;  %v351_v43 = vpop.f32.mrb[5].mxu0  ;;  %5837 = vmatpush3.bf16.msra.mxu0 %v5834_v38  ;;  %v399_v44 = vpop.f32.mrb[5].mxu1  ;;  %v6257_v9 = vand.u32 2147483647, %v7059_v34 }
  0xf5   : > { %6624 = vrsqrt.f32 %v7069_v41  ;;  %v6194_v19 = vand.u32 2147483647, %v7067_v40  ;;  %vm6192_vm13 = vcmp.eq.f32.partialorder %v7067_v40, 0.0  ;;  %vm6193_vm14 = vcmp.lt.f32.partialorder %v7067_v40, 0.0 }
  0xf6   : > { %v6615_v45 = vpop.eup %6614  ;;  %vm7148_vm15 = vcmp.eq.f32.partialorder %v6257_v9, inf  ;;  %v6266_v25 = vand.u32 2147483647, %v7069_v41  ;;  %vm6265_vm1 = vcmp.lt.f32.partialorder %v7069_v41, 0.0 }
  0xf7   : > { %v6617_v46 = vpop.eup %6616  ;;  %v7075_v47 = vpop.f32.mrb[6].mxu0  ;;  %6626 = vrsqrt.f32 %v6615_v45 }
  0xf8   : > { %8777 = vst [vmem:[#allocation10_spill] sm:$0xff] %v7075_v47  ;;  %v7077_v48 = vpop.f32.mrb[6].mxu1  ;;  %6628 = vrsqrt.f32 %v7075_v47  ;;  %v357_v49 = vpop.f32.mrb[7].mxu0  ;;  %v6203_v20 = vand.u32 2147483647, %v7075_v47  ;;  %vm6201_vm0 = vcmp.eq.f32.partialorder %v7075_v47, 0.0 }
  0xf9   : > { %8778 = vst [vmem:[#allocation11_spill] sm:$0xff] %v7077_v48  ;;  %v405_v50 = vpop.f32.mrb[7].mxu1  ;;  %v7080_v51 = vpack.i.bf16 %v357_v49, %v351_v43  ;;  %6630 = vrsqrt.f32 %v7077_v48  ;;  %v5838_v52 = vpack.c.bf16 %v357_v49, %v351_v43 }
  0xfa   : > { %v6619_v53 = vpop.eup %6618  ;;  %v7083_v54 = vpack.i.bf16 %v405_v50, %v399_v44  ;;  %6632 = vrsqrt.f32 %v6617_v46  ;;  %v7105_v1 = vpack.c.bf16 %v405_v50, %v399_v44 }
  0xfb   : > { %8779 = vst [vmem:[#allocation12_spill] sm:$0xff] %v7080_v51  ;;  %v6621_v56 = vpop.eup %6620  ;;  %v7086_v57 = vpop.f32.mrb[8].mxu0  ;;  %5839 = vmatprep.subr.bf16.mxu0 %v5838_v52  ;;  %6634 = vrsqrt.f32 %v6619_v53 }
  0xfc   : > { %8780 = vst [vmem:[#allocation13_spill] sm:$0xff] %v7083_v54  ;;  %8781 = vst [vmem:[#allocation14_spill] sm:$0xff] %v7086_v57  ;;  %v7088_v58 = vpop.f32.mrb[8].mxu1  ;;  %6636 = vrsqrt.f32 %v7086_v57  ;;  %v363_v60 = vpop.f32.mrb[9].mxu0  ;;  %5841 = vmatpush3.bf16.msra.mxu0 %v5838_v52  ;;  %v6212_v50 = vand.u32 2147483647, %v7086_v57 }
  0xfd   : > { %8782 = vst [vmem:[#allocation15_spill] sm:$0xff] %v7088_v58  ;;  %v7092_v61 = vpop.f32.mrb[9].mxu1  ;;  %6638 = vrsqrt.f32 %v7088_v58  ;;  %v6284_v36 = vand.u32 2147483647, %v7088_v58 }
  0xfe   : > { %v6623_v63 = vpop.eup %6622  ;;  %6640 = vrsqrt.f32 %v6621_v56 }
  0xff   : > { %v7107_v2 = vpop.f32.mrb[10].mxu0  ;;  %v7109_v3 = vpop.f32.mrb[10].mxu1  ;;  %6642 = vrsqrt.f32 %v6623_v63 }
 0x100   : > { %8785 = vst [vmem:[#allocation16_spill] sm:$0xff] %v7107_v2  ;;  %8786 = vst [vmem:[#allocation17_spill] sm:$0xff] %v7109_v3  ;;  %v6625_v5 = vpop.eup %6624  ;;  %6644 = vrsqrt.f32 %v7107_v2  ;;  %v369_v6 = vpop.f32.mrb[11].mxu0 }
 0x101   : > { %v7117_v7 = vpop.f32.mrb[11].mxu1  ;;  %v6627_v10 = vpop.eup %6626  ;;  %6646 = vrsqrt.f32 %v7109_v3  ;;  %v7126_v11 = vpack.i.bf16 %v369_v6, %v363_v60  ;;  %v5842_v12 = vpack.c.bf16 %v369_v6, %v363_v60 }
 0x102   : > { %v6629_v13 = vpop.eup %6628  ;;  %v7130_v14 = vpack.i.bf16 %v7117_v7, %v7092_v61  ;;  %v6180_v15 = vsel %vm6175_vm3, nan, %v6627_v10  ;;  %vm6202_vm3 = vcmp.lt.f32.partialorder %v7075_v47, 0.0 }
 0x103   : > { %8791 = vst [vmem:[#allocation18_spill] sm:$0xff] %v7126_v11  ;;  %v7135_v16 = vpop.eup %6630  ;;  %v7137_v17 = vpop.f32.mrb[12].mxu0  ;;  %5843 = vmatprep.subr.bf16.mxu0 %v5842_v12  ;;  %6648 = vrsqrt.f32 %v6629_v13  ;;  %v6181_v27 = vsel %vm6174_vm2, 0.0, %v6180_v15  ;;  %vm7172_vm2 = vcmp.eq.f32.partialorder %v6194_v19, inf  ;;  %v6293_v15 = vand.u32 2147483647, %v7109_v3 }
 0x104   : > { %8792 = vst [vmem:[#allocation19_spill] sm:$0xff] %v7137_v17  ;;  %v7139_v18 = vpop.f32.mrb[12].mxu1  ;;  %v6633_v21 = vpop.eup %6632  ;;  %6650 = vrsqrt.f32 %v7137_v17  ;;  %5845 = vmatpush3.bf16.msra.mxu0 %v5842_v12  ;;  %v6182_v55 = vsel %vm7111_vm8, inf, %v6181_v27  ;;  %vm6283_vm8 = vcmp.lt.f32.partialorder %v7088_v58, 0.0 }
 0x105   : > { %8793 = vst [vmem:[#allocation20_spill] sm:$0xff] %v7139_v18  ;;  %v375_v22 = vpop.f32.mrb[13].mxu0  ;;  %v7144_v23 = vpop.f32.mrb[13].mxu1  ;;  %6652 = vrsqrt.f32 %v7139_v18  ;;  %v6252_v28 = vsel %vm6247_vm5, nan, %v6633_v21  ;;  %vm7176_vm5 = vcmp.eq.f32.partialorder %v6203_v20, inf }
 0x106   : > { %v6635_v26 = vpop.eup %6634  ;;  %v6253_v35 = vsel %vm6246_vm4, 0.0, %v6252_v28  ;;  %6654 = vrsqrt.f32 %v6625_v5  ;;  %vm6264_vm4 = vcmp.eq.f32.partialorder %v7069_v41, 0.0  ;;  %v6221_v20 = vand.u32 2147483647, %v7107_v2 }
 0x107   : > { %v6637_v31 = vpop.eup %6636  ;;  %v6189_v32 = vsel %vm6184_vm9, nan, %v6635_v26  ;;  %v7166_v43 = vpop.f32.mrb[14].mxu0  ;;  %v6254_v59 = vsel %vm7101_vm7, inf, %v6253_v35  ;;  %vm7196_vm9 = vcmp.eq.f32.partialorder %v6266_v25, inf  ;;  %vm6210_vm7 = vcmp.eq.f32.partialorder %v7086_v57, 0.0 }
 0x108   : > { %v6639_v38 = vpop.eup %6638  ;;  %8796 = vst [vmem:[#allocation21_spill] sm:$0xff] %v7166_v43  ;;  %v6190_v44 = vsel %vm6183_vm6, 0.0, %v6189_v32  ;;  %v7170_v45 = vpop.f32.mrb[14].mxu1  ;;  %6656 = vrsqrt.f32 %v6637_v31  ;;  %vm6211_vm6 = vcmp.lt.f32.partialorder %v7086_v57, 0.0  ;;  %v6275_v21 = vand.u32 2147483647, %v7077_v48 }
 0x109   : > { %8797 = vst [vmem:[#allocation22_spill] sm:$0xff] %v7170_v45  ;;  %v6641_v52 = vpop.eup %6640  ;;  %6658 = vrsqrt.f32 %v7166_v43  ;;  %v381_v53 = vpop.f32.mrb[15].mxu0  ;;  %v6191_v56 = vsel %vm7119_vm10, inf, %v6190_v44  ;;  %vm7255_vm10 = vcmp.eq.f32.partialorder %v6221_v20, inf  ;;  %v6239_v49 = vand.u32 2147483647, %v7166_v43 }
 0x10a   : > { %v7189_v60 = vpop.f32.mrb[15].mxu1  ;;  %v6643_v62 = vpop.eup %6642  ;;  %v7191_v63 = vpack.i.bf16 %v381_v53, %v375_v22  ;;  %v7193_v5 = vpack.i.bf16 %v6191_v56, %v6182_v55  ;;  %v5846_v6 = vpack.c.bf16 %v381_v53, %v375_v22  ;;  %6660 = vrsqrt.f32 %v7170_v45 }
 0x10b   : > { %v6645_v4 = vpop.eup %6644  ;;  %v6198_v0 = vsel %vm6193_vm14, nan, %v6643_v62  ;;  %v6261_v8 = vsel %vm6256_vm12, nan, %v6641_v52  ;;  %v7208_v10 = vpack.i.bf16 %v7189_v60, %v7144_v23  ;;  %6662 = vrsqrt.f32 %v6639_v38 }
 0x10c   : > { %8802 = vst [vmem:[#allocation23_spill] sm:$0xff] %v7191_v63  ;;  %8803 = vst [vmem:[#allocation24_spill] sm:$0xff] %v7193_v5  ;;  %v6647_v12 = vpop.eup %6646  ;;  %6335 = vrot.lane.b32.xlu0 %v7193_v5, %s6943_s11  ;;  %5847 = vmatprep.subr.bf16.mxu0 %v5846_v6  ;;  %v6262_v13 = vsel %vm6255_vm11, 0.0, %v6261_v8  ;;  %v6199_v25 = vsel %vm6192_vm13, 0.0, %v6198_v0  ;;  %vm7225_vm11 = vcmp.eq.f32.partialorder %v6284_v36, inf  ;;  %vm6291_vm12 = vcmp.eq.f32.partialorder %v7109_v3, 0.0 }
 0x10d   : > { %8806 = vst [vmem:[#allocation25_spill] sm:$0xff] %v7208_v10  ;;  %5849 = vmatpush3.bf16.msra.mxu0 %v5846_v6  ;;  %v6263_v19 = vsel %vm7148_vm15, inf, %v6262_v13  ;;  %6664 = vrsqrt.f32 %v6647_v12  ;;  %v6649_v22 = vpop.eup %6648  ;;  %vm6292_vm14 = vcmp.lt.f32.partialorder %v7109_v3, 0.0  ;;  %vm7237_vm13 = vcmp.eq.f32.partialorder %v6293_v15, inf }
 0x10e   : > { %v7223_v26 = vpack.i.bf16 %v6263_v19, %v6254_v59  ;;  %6666 = vrsqrt.f32 %v6645_v4  ;;  %v6651_v24 = vpop.eup %6650  ;;  %v6207_v28 = vsel %vm6202_vm3, nan, %v6649_v22  ;;  %v6200_v38 = vsel %vm7172_vm2, inf, %v6199_v25 }
 0x10f   : > { %6668 = vrsqrt.f32 %v7135_v16  ;;  %v6653_v31 = vpop.eup %6652  ;;  %v6208_v32 = vsel %vm6201_vm0, 0.0, %v6207_v28  ;;  %vm7246_vm3 = vcmp.eq.f32.partialorder %v6212_v50, inf  ;;  %vm6219_vm0 = vcmp.eq.f32.partialorder %v7107_v2, 0.0 }
 0x110   : > { %8807 = vst [vmem:[#allocation26_spill] sm:$0xff] %v7223_v26  ;;  %6670 = vrsqrt.f32 %v6651_v24  ;;  %v6655_v36 = vpop.eup %6654  ;;  %v6209_v44 = vsel %vm7176_vm5, inf, %v6208_v32  ;;  %v6230_v52 = vand.u32 2147483647, %v7137_v17  ;;  %vm6229_vm2 = vcmp.lt.f32.partialorder %v7137_v17, 0.0 }
 0x111   : > { %6672 = vrsqrt.f32 %v6653_v31  ;;  %v7253_v55 = vpack.i.bf16 %v6209_v44, %v6200_v38  ;;  %v6270_v50 = vsel %vm6265_vm1, nan, %v6655_v36  ;;  %vm7263_vm5 = vcmp.eq.f32.partialorder %v6275_v21, inf }
 0x112   : > { %v6657_v53 = vpop.eup %6656  ;;  %v6271_v6 = vsel %vm6264_vm4, 0.0, %v6270_v50  ;;  %v7274_v4 = vpack.c.bf16 %v7117_v7, %v7092_v61  ;;  %v7278_v0 = vpack.c.bf16 %v7189_v60, %v7144_v23  ;;  %vm6301_vm4 = vcmp.lt.f32.partialorder %v7139_v18, 0.0 }
 0x113   : > { %8814 = vst [vmem:[#allocation27_spill] sm:$0xff] %v7253_v55  ;;  %v6659_v59 = vpop.eup %6658  ;;  %v6216_v62 = vsel %vm6211_vm6, nan, %v6657_v53  ;;  %6340 = vrot.lane.b32.xlu0 %v7253_v55, %s6943_s11  ;;  %v6302_v12 = vand.u32 2147483647, %v7139_v18  ;;  %v6272_v61 = vsel %vm7196_vm9, inf, %v6271_v6  ;;  %vm6309_vm1 = vcmp.eq.f32.partialorder %v7170_v45, 0.0 }
 0x114   : > { %v6217_v8 = vsel %vm6210_vm7, 0.0, %v6216_v62  ;;  %6674 = vrsqrt.f32 %v6659_v59  ;;  %v6661_v13 = vpop.eup %6660  ;;  %vm6237_vm7 = vcmp.eq.f32.partialorder %v7166_v43, 0.0  ;;  %vm8819_vm9 = vcmp.eq.f32.partialorder %v7088_v58, 0.0 }
 0x115   : > { %v6663_v7 = vpop.eup %6662  ;;  %6676 = vrsqrt.f32 %v6661_v13  ;;  %vm7301_vm15 = vcmp.eq.f32.partialorder %v6230_v52, inf  ;;  %vm7305_vm6 = vcmp.eq.f32.partialorder %v6239_v49, inf  ;;  %v6218_v36 = vsel %vm7246_vm3, inf, %v6217_v8 }
 0x116   : > { %v6288_v60 = vsel %vm6283_vm8, nan, %v6663_v7  ;;  %vm8824_vm8 = vcmp.lt.f32.partialorder %v7107_v2, 0.0  ;;  %v6311_v59 = vand.u32 2147483647, %v7170_v45  ;;  %vm8834_vm3 = vcmp.lt.f32.partialorder %v7166_v43, 0.0 }
 0x117   : > { %v6665_v23 = vpop.eup %6664  ;;  %6355 = vrot.lane.b32.xlu0 %v7223_v26, %s6943_s11  ;;  %v6289_v9 = vsel %vm8819_vm9, 0.0, %v6288_v60 }
 0x118   : > { %v6667_v15 = vpop.eup %6666  ;;  %v6297_v19 = vsel %vm6292_vm14, nan, %v6665_v23  ;;  %v6290_v25 = vsel %vm7225_vm11, inf, %v6289_v9  ;;  %vm8825_vm14 = vcmp.lt.f32.partialorder %v7077_v48, 0.0  ;;  %vm8828_vm11 = vcmp.eq.f32.partialorder %v7077_v48, 0.0 }
 0x119   : > { %v6669_v22 = vpop.eup %6668  ;;  %v6298_v24 = vsel %vm6291_vm12, 0.0, %v6297_v19  ;;  %v6225_v28 = vsel %vm8824_vm8, nan, %v6667_v15  ;;  %vm8829_vm12 = vcmp.eq.f32.partialorder %v7137_v17, 0.0 }
 0x11a   : > { %v6671_v31 = vpop.eup %6670  ;;  %v6299_v32 = vsel %vm7237_vm13, inf, %v6298_v24  ;;  %v6226_v38 = vsel %vm6219_vm0, 0.0, %v6225_v28  ;;  %v6279_v27 = vsel %vm8825_vm14, nan, %v6669_v22  ;;  %vm8833_vm13 = vcmp.eq.f32.partialorder %v7139_v18, 0.0 }
 0x11b   : > { %v6673_v44 = vpop.eup %6672  ;;  %v7323_v52 = vpack.i.bf16 %v6299_v32, %v6290_v25  ;;  %v6227_v53 = vsel %vm7255_vm10, inf, %v6226_v38  ;;  %v6234_v49 = vsel %vm6229_vm2, nan, %v6671_v31  ;;  %v6280_v16 = vsel %vm8828_vm11, 0.0, %v6279_v27 }
 0x11c   : > { %v7329_v35 = vpack.i.bf16 %v6227_v53, %v6218_v36  ;;  %v6306_v50 = vsel %vm6301_vm4, nan, %v6673_v44  ;;  %v6235_v46 = vsel %vm8829_vm12, 0.0, %v6234_v49  ;;  %v6281_v62 = vsel %vm7263_vm5, inf, %v6280_v16 }
 0x11d   : > { %8826 = vst [vmem:[#allocation28_spill] sm:$0xff] %v7323_v52  ;;  %6365 = vrot.lane.b32.xlu0 %v7323_v52, %s6943_s11  ;;  %vm7342_vm10 = vcmp.eq.f32.partialorder %v6302_v12, inf  ;;  %v7348_v13 = vpack.i.bf16 %v6281_v62, %v6272_v61  ;;  %v6307_v7 = vsel %vm8833_vm13, 0.0, %v6306_v50  ;;  %vm6312_vm0 = vcmp.eq.f32.partialorder %v6311_v59, inf }
 0x11e   : > { %8827 = vst [vmem:[#allocation29_spill] sm:$0xff] %v7329_v35  ;;  %v6675_v8 = vpop.eup %6674  ;;  %6345 = vrot.lane.b32.xlu1 %v7329_v35, %s6943_s11  ;;  %v6236_v12 = vsel %vm7301_vm15, inf, %v6235_v46  ;;  %v6308_v15 = vsel %vm7342_vm10, inf, %v6307_v7  ;;  %vm8835_vm2 = vcmp.lt.f32.partialorder %v7170_v45, 0.0  ;;  %vm8838_vm15 = vcmask 130048  }
 0x11f   : > { %8832 = vst [vmem:[#allocation30_spill] sm:$0xff] %v7348_v13  ;;  %v6243_v23 = vsel %vm8834_vm3, nan, %v6675_v8  ;;  %v6677_v60 = vpop.eup %6676  ;;  %vm7394_vm5 = vmpackc.low %vm8838_vm15, %vm8838_vm15 }
 0x120   : > { %v6244_v56 = vsel %vm6237_vm7, 0.0, %v6243_v23  ;;  %v6315_v9 = vsel %vm8835_vm2, nan, %v6677_v60 }
 0x121   : > { %6375 = vrot.lane.b32.xlu0 %v7223_v26, %s6944_s12  ;;  %v6245_v61 = vsel %vm7305_vm6, inf, %v6244_v56  ;;  %v6316_v22 = vsel %vm6309_vm1, 0.0, %v6315_v9  ;;  %vm8841_vm1 = vmmov %vm8838_vm15 }
 0x122   : > { %v7366_v19 = vpack.i.bf16 %v6245_v61, %v6236_v12  ;;  %v6317_v25 = vsel %vm6312_vm0, inf, %v6316_v22  ;;  %vm8842_vm4 = vmmov %vm8841_vm1 }
 0x123   : > { %v7372_v20 = vpack.i.bf16 %v6317_v25, %v6308_v15  ;;  %vm8843_vm6 = vmmov %vm8841_vm1 }
 0x124   : > { %8836 = vst [vmem:[#allocation31_spill] sm:$0xff] %v7366_v19  ;;  %6350 = vrot.lane.b32.xlu1 %v7366_v19, %s6943_s11  ;;  %vm8844_vm7 = vmmov %vm8841_vm1 }
 0x125   : > { %8837 = vst [vmem:[#allocation32_spill] sm:$0xff] %v7372_v20  ;;  %6385 = vrot.lane.b32.xlu0 %v7323_v52, %s6944_s12  ;;  %vm8845_vm9 = vmmov %vm8841_vm1 }
 0x126   : > { %vm8846_vm8 = vmmov %vm8841_vm1 }
 0x127   : > { %vm8847_vm14 = vmmov %vm8841_vm1 }
 0x128   : > { %6360 = vrot.lane.b32.xlu1 %v7348_v13, %s6943_s11  ;;  %vm8848_vm11 = vmmov %vm8841_vm1 }
 0x129   : > { %1399 = vrot.lane.b32.xlu0 %v7051_v30, %s6945_s13  ;;  %vm8849_vm12 = vmmov %vm8841_vm1 }
 0x12a   : > { %vm8850_vm10 = vmmov %vm8841_vm1 }
 0x12b   : > { %vm8851_vm13 = vmmov %vm8841_vm1 }
 0x12c   : > { %6370 = vrot.lane.b32.xlu1 %v7372_v20, %s6943_s11  ;;  %vm8852_vm3 = vmmov %vm8841_vm1 }
 0x12d   : > { %1403 = vrot.lane.b32.xlu0 %v7069_v41, %s6945_s13  ;;  %vm8853_vm0 = vmmov %vm8841_vm1 }
 0x12e   : > { %vm8854_vm2 = vmmov %vm8853_vm0 }
 0x12f   : > { %vm8855_vm15 = vmmov %vm8853_vm0 }
 0x130   : > { %6380 = vrot.lane.b32.xlu1 %v7348_v13, %s6944_s12 }
 0x134   : > { %1401 = vrot.lane.b32.xlu1 %v7059_v34, %s6945_s13 }
 0x138   : > { %1405 = vrot.lane.b32.xlu1 %v7077_v48, %s6945_s13 }
 0x13c   : > { %6390 = vrot.lane.b32.xlu1 %v7372_v20, %s6944_s12 }
 0x17e   : > { %v6336_v21 = vpop.permute.xlu0 %6335 }
 0x17f   : > { %v6338_v24 = vunpack.i.h.bf16 %v6336_v21  ;;  %v6337_v28 = vunpack.i.l.bf16 %v6336_v21 }
 0x181   : > { %v5786_v32 = vpack.c.bf16 %v6338_v24, %v6337_v28 }
 0x183   : > { %5788 = vmatprep.subr.msk.bf16.mxu1 %vm7394_vm5, %v5786_v32 }
 0x184   : > { %5791 = vmatpush3.bf16.xpose.msk.msra.mxu1 %vm7394_vm5, %v5786_v32 }
 0x185   : > { %v6341_v36 = vpop.permute.xlu0 %6340 }
 0x186   : > { %v6343_v38 = vunpack.i.h.bf16 %v6341_v36  ;;  %v6342_v27 = vunpack.i.l.bf16 %v6341_v36 }
 0x188   : > { %v5792_v44 = vpack.c.bf16 %v6343_v38, %v6342_v27 }
 0x189   : > { %v6356_v59 = vpop.permute.xlu0 %6355 }
 0x18a   : > { %5794 = vmatprep.subr.msk.bf16.mxu1 %vm7394_vm5, %v5792_v44  ;;  %v6358_v8 = vunpack.i.h.bf16 %v6356_v59  ;;  %v6357_v7 = vunpack.i.l.bf16 %v6356_v59 }
 0x18c   : > { %5797 = vmatpush3.bf16.xpose.msk.msra.mxu1 %vm7394_vm5, %v5792_v44  ;;  %v5810_v60 = vpack.c.bf16 %v6358_v8, %v6357_v7 }
 0x18f   : > { %v6366_v9 = vpop.permute.xlu0 %6365 }
 0x190   : > { %v6346_v53 = vpop.permute.xlu1 %6345  ;;  %v6368_v22 = vunpack.i.h.bf16 %v6366_v9  ;;  %v6367_v25 = vunpack.i.l.bf16 %v6366_v9 }
 0x191   : > { %v6348_v49 = vunpack.i.h.bf16 %v6346_v53  ;;  %v6347_v16 = vunpack.i.l.bf16 %v6346_v53 }
 0x192   : > { %v5822_v21 = vpack.c.bf16 %v6368_v22, %v6367_v25 }
 0x193   : > { %v5798_v50 = vpack.c.bf16 %v6348_v49, %v6347_v16  ;;  %v6376_v38 = vpop.permute.xlu0 %6375 }
 0x194   : > { %v6378_v27 = vunpack.i.h.bf16 %v6376_v38  ;;  %v6377_v44 = vunpack.i.l.bf16 %v6376_v38 }
 0x195   : > { %5800 = vmatprep.subr.msk.bf16.mxu1 %vm7394_vm5, %v5798_v50 }
 0x196   : > { %5803 = vmatpush3.bf16.xpose.msk.msra.mxu1 %vm7394_vm5, %v5798_v50  ;;  %v6351_v46 = vpop.permute.xlu1 %6350 }
 0x197   : > { %v6353_v62 = vunpack.i.h.bf16 %v6351_v46  ;;  %v6352_v6 = vunpack.i.l.bf16 %v6351_v46 }
 0x199   : > { %v5804_v23 = vpack.c.bf16 %v6353_v62, %v6352_v6 }
 0x19a   : > { %v6361_v56 = vpop.permute.xlu1 %6360 }
 0x19b   : > { %5806 = vmatprep.subr.msk.bf16.mxu1 %vm7394_vm5, %v5804_v23  ;;  %v6363_v12 = vunpack.i.h.bf16 %v6361_v56  ;;  %v6362_v61 = vunpack.i.l.bf16 %v6361_v56 }
 0x19d   : > { %v5816_v15 = vpack.c.bf16 %v6363_v12, %v6362_v61 }
 0x19e   : > { %5809 = vmatpush3.bf16.xpose.msk.msra.mxu1 %vm7394_vm5, %v5804_v23  ;;  %v6371_v24 = vpop.permute.xlu1 %6370 }
 0x19f   : > { %5812 = vmatprep.subr.msk.bf16.mxu1 %vm7394_vm5, %v5810_v60  ;;  %v6373_v28 = vunpack.i.h.bf16 %v6371_v24  ;;  %v6372_v32 = vunpack.i.l.bf16 %v6371_v24 }
 0x1a1   : > { %v5828_v36 = vpack.c.bf16 %v6373_v28, %v6372_v32 }
 0x1a2   : > { %v6381_v38 = vpop.permute.xlu1 %6380 }
 0x1a5   : > { %5235 = vmatmul.mubr.msk.f32.vlgmr.msra.gmra.mrb[16].mxu1 %vm8841_vm1, %v7057_v33  ;;  %vm795_vm1 = vcmask 523264  }
 0x1a6   : > { %5237 = vmatprep.mubr.msk.f32.mxu1 %vm8842_vm4, %v7067_v40  ;;  %5815 = vmatpush3.bf16.xpose.msk.msra.mxu1 %vm7394_vm5, %v5810_v60  ;;  %vm8856_vm4 = vmmov %vm8853_vm0 }
 0x1a7   : > { %5818 = vmatprep.subr.msk.bf16.mxu1 %vm7394_vm5, %v5816_v15 }
 0x1a9   : > { %5238 = vmatmul.mubr.msk.f32.gmra.mrb[18].mxu1 %vm8843_vm6, %v7075_v47  ;;  %vm8857_vm6 = vmmov %vm8853_vm0 }
 0x1aa   : > { %5240 = vmatprep.mubr.msk.f32.mxu1 %vm8844_vm7, %v7086_v57  ;;  %vm8858_vm7 = vmmov %vm8853_vm0 }
 0x1ad   : > { %5241 = vmatmul.mubr.msk.f32.gmra.mrb[20].mxu1 %vm8845_vm9, %v7107_v2  ;;  %vm8859_vm9 = vmmov %vm8853_vm0 }
 0x1ae   : > { %5243 = vmatprep.mubr.msk.f32.mxu1 %vm8846_vm8, %v7137_v17  ;;  %5821 = vmatpush3.bf16.xpose.msk.msra.mxu1 %vm7394_vm5, %v5816_v15  ;;  %vm8860_vm8 = vmmov %vm8853_vm0 }
 0x1af   : > { %5824 = vmatprep.subr.msk.bf16.mxu1 %vm7394_vm5, %v5822_v21 }
 0x1b1   : > { %5244 = vmatmul.mubr.msk.f32.gmra.mrb[22].mxu1 %vm8847_vm14, %v7166_v43  ;;  %vm8861_vm14 = vmmov %vm8853_vm0 }
 0x1b2   : > { %5262 = vmatprep.mubr.msk.f32.mxu1 %vm8848_vm11, %v7051_v30  ;;  %vm8862_vm11 = vmmov %vm8853_vm0 }
 0x1b6   : > { %5827 = vmatpush3.bf16.xpose.msk.msra.mxu1 %vm7394_vm5, %v5822_v21 }
 0x1b7   : > { %5830 = vmatprep.subr.msk.bf16.mxu1 %vm7394_vm5, %v5828_v36 }
 0x1be   : > { %5833 = vmatpush3.bf16.xpose.msk.msra.mxu1 %vm7394_vm5, %v5828_v36 }
 0x1bf   : > { %5851 = vmatprep.subr.bf16.mxu1 %v7071_v42 }
 0x1c5   : > { %5263 = vmatmul.mubr.msk.f32.vlgmr.msra.gmra.mrb[24].mxu1 %vm8849_vm12, %v7059_v34  ;;  %vm8863_vm12 = vmmov %vm8853_vm0 }
 0x1c6   : > { %5265 = vmatprep.mubr.msk.f32.mxu1 %vm8850_vm10, %v7069_v41  ;;  %5853 = vmatpush3.bf16.msra.mxu1 %v7071_v42  ;;  %v7465_v42 = vpack.c.bf16 %v6378_v27, %v6377_v44  ;;  %v7529_v27 = vpop.permute.xlu1 %1401  ;;  %v7531_v44 = vpop.permute.xlu0 %6385  ;;  %vm8864_vm10 = vmmov %vm8853_vm0 }
 0x1c7   : > { %5855 = vmatprep.subr.bf16.mxu1 %v7105_v1 }
 0x1c9   : > { %5266 = vmatmul.mubr.msk.f32.gmra.mrb[26].mxu1 %vm8851_vm13, %v7077_v48  ;;  %vm8865_vm13 = vmmov %vm8853_vm0 }
 0x1ca   : > { %5268 = vmatprep.mubr.msk.f32.mxu1 %vm8852_vm3, %v7088_v58  ;;  %5857 = vmatpush3.bf16.msra.mxu1 %v7105_v1  ;;  %vm8866_vm3 = vmmov %vm8853_vm0 }
 0x1cb   : > { %5859 = vmatprep.subr.bf16.mxu1 %v7274_v4 }
 0x1cd   : > { %5269 = vmatmul.mubr.msk.f32.gmra.mrb[28].mxu1 %vm8853_vm0, %v7109_v3 }
 0x1ce   : > { %5271 = vmatprep.mubr.msk.f32.mxu1 %vm8854_vm2, %v7139_v18  ;;  %5861 = vmatpush3.bf16.msra.mxu1 %v7274_v4  ;;  %vm8867_vm2 = vmmov %vm8853_vm0 }
 0x1cf   : > { %5863 = vmatprep.subr.bf16.mxu1 %v7278_v0 }
 0x1d1   : > { %5272 = vmatmul.mubr.msk.f32.gmra.mrb[30].mxu1 %vm8855_vm15, %v7170_v45  ;;  %vm8868_vm15 = vmmov %vm8853_vm0 }
 0x1d2   : > { %5865 = vmatpush3.bf16.msra.mxu1 %v7278_v0 }
 0x1d3   : > { %5892 = vmatprep.subr.msk.bf16.mxu1 %vm7394_vm5, %v7465_v42 }
 0x278   : > { %v5236_v1 = vpop.f32.mrb[16].mxu1 }
 0x279   : > { %v587_v53 = vpop.f32.mrb[17].mxu1  ;;  %v799_v49 = vsel %vm795_vm1, %v5236_v1, -inf }
 0x27a   : > { %800 = vmax.xlane.f32.xlu1 %v799_v49  ;;  %v796_v4 = vsel %vm795_vm1, %v587_v53, -inf  ;;  %v7533_v49 = vpop.permute.xlu1 %1405 }
 0x27b   : > { %797 = vmax.xlane.f32.xlu0 %v796_v4  ;;  %v7535_v4 = vpop.permute.xlu0 %1399 }
 0x27c   : > { %v7475_v16 = vpop.f32.mrb[18].mxu1 }
 0x27d   : > { %v7477_v50 = vpop.f32.mrb[19].mxu1 }
 0x27e   : > { %v802_v36 = vsel %vm795_vm1, %v7477_v50, -inf }
 0x280   : > { %v7479_v59 = vpop.f32.mrb[20].mxu1 }
 0x281   : > { %v7481_v0 = vpop.f32.mrb[21].mxu1 }
 0x284   : > { %v7483_v46 = vpop.f32.mrb[22].mxu1 }
 0x285   : > { %v7485_v62 = vpop.f32.mrb[23].mxu1 }
 0x298   : > { %v7487_v6 = vpop.f32.mrb[24].mxu1 }
 0x299   : > { %v7489_v8 = vpop.f32.mrb[25].mxu1  ;;  %v823_v7 = vsel %vm795_vm1, %v7487_v6, -inf }
 0x29a   : > { %824 = vmax.xlane.f32.xlu1 %v823_v7  ;;  %v820_v23 = vsel %vm795_vm1, %v7489_v8, -inf  ;;  %v7537_v7 = vpop.permute.xlu1 %6390 }
 0x29b   : > { %821 = vmax.xlane.f32.xlu0 %v820_v23  ;;  %v7539_v23 = vpop.permute.xlu0 %1403 }
 0x29c   : > { %v7495_v60 = vpop.f32.mrb[26].mxu1 }
 0x29d   : > { %v7497_v56 = vpop.f32.mrb[27].mxu1  ;;  %v829_v12 = vsel %vm795_vm1, %v7495_v60, -inf }
 0x29e   : > { %v826_v9 = vsel %vm795_vm1, %v7497_v56, -inf }
 0x29f   : > { %830 = vmax.xlane.f32.xlu0 %v829_v12 }
 0x2a0   : > { %v7501_v61 = vpop.f32.mrb[28].mxu1 }
 0x2a1   : > { %v7503_v15 = vpop.f32.mrb[29].mxu1  ;;  %v835_v21 = vsel %vm795_vm1, %v7501_v61, -inf }
 0x2a2   : > { %v832_v24 = vsel %vm795_vm1, %v7503_v15, -inf }
 0x2a3   : > { %827 = vmax.xlane.f32.xlu0 %v826_v9 }
 0x2a4   : > { %v7507_v22 = vpop.f32.mrb[30].mxu1 }
 0x2a5   : > { %v7509_v25 = vpop.f32.mrb[31].mxu1  ;;  %v841_v28 = vsel %vm795_vm1, %v7507_v22, -inf }
 0x2a6   : > { %v838_v32 = vsel %vm795_vm1, %v7509_v25, -inf }
 0x2a7   : > { %836 = vmax.xlane.f32.xlu0 %v835_v21 }
 0x2ab   : > { %1409 = vrot.lane.b32.xlu1 %v7109_v3, %s6945_s13  ;;  %v817_v3 = vsel %vm795_vm1, %v7483_v46, -inf }
 0x2bd   : > { %1407 = vrot.lane.b32.xlu0 %v7088_v58, %s6945_s13 }
 0x2cf   : > { %833 = vmax.xlane.f32.xlu1 %v832_v24 }
 0x2d3   : > { %842 = vmax.xlane.f32.xlu1 %v841_v28 }
 0x2d7   : > { %839 = vmax.xlane.f32.xlu1 %v838_v32 }
 0x2dc   : > { %803 = vmax.xlane.f32.xlu0 %v802_v36  ;;  %v805_v36 = vsel %vm795_vm1, %v7475_v16, -inf }
 0x2e8   : > { %1411 = vrot.lane.b32.xlu1 %v7139_v18, %s6945_s13 }
 0x2f2   : > { %1413 = vrot.lane.b32.xlu0 %v7170_v45, %s6945_s13  ;;  %v808_v45 = vsel %vm795_vm1, %v7481_v0, -inf }
 0x307   : > { %v801_v12 = vpop.xlane.xlu1 %800 }
 0x308   : > { %v845_v9 = vsub.f32 %v5236_v1, %v801_v12  ;;  %v798_v21 = vpop.xlane.xlu0 %797  ;;  %v811_v1 = vsel %vm795_vm1, %v7479_v59, -inf  ;;  %v814_v12 = vsel %vm795_vm1, %v7485_v62, -inf }
 0x309   : > { %v844_v24 = vsub.f32 %v587_v53, %v798_v21 }
 0x30a   : > { %v862_v28 = vmul.f32 1.442695, %v845_v9 }
 0x30b   : > { %v860_v32 = vmul.f32 1.442695, %v844_v24 }
 0x30c   : > { %806 = vmax.xlane.f32.xlu1 %v805_v36 }
 0x30d   : > { %6678 = vpow2.f32 %v860_v32 }
 0x30e   : > { %6680 = vpow2.f32 %v862_v28 }
 0x310   : > { %809 = vmax.xlane.f32.xlu1 %v808_v45 }
 0x311   : > { %818 = vmax.xlane.f32.xlu0 %v817_v3 }
 0x314   : > { %812 = vmax.xlane.f32.xlu1 %v811_v1 }
 0x317   : > { %v7549_v53 = vpop.eup %6678 }
 0x318   : > { %v7553_v9 = vpop.eup %6680  ;;  %5290 = vmatprep.mubr.msk.f32.mxu0 %vm795_vm1, %v7549_v53  ;;  %815 = vmax.xlane.f32.xlu1 %v814_v12 }
 0x319   : > { %5291 = vmatmul.mubr.msk.f32.vlgmr.msra.gmra.mrb[16].mxu0 %vm795_vm1, %v7553_v9 }
 0x327   : > { %v825_v45 = vpop.xlane.xlu1 %824  ;;  %1232 = vrot.lane.b32.xlu0 %v7057_v33, %s6945_s13 }
 0x328   : > { %v853_v3 = vsub.f32 %v7487_v6, %v825_v45  ;;  %v822_v21 = vpop.xlane.xlu0 %821 }
 0x329   : > { %v852_v24 = vsub.f32 %v7489_v8, %v822_v21  ;;  %6395 = vrot.lane.b32.xlu1 %v7193_v5, %s6944_s12  ;;  %v6382_v21 = vunpack.i.l.bf16 %v6381_v38 }
 0x32a   : > { %v878_v28 = vmul.f32 1.442695, %v853_v3  ;;  %v6383_v3 = vunpack.i.h.bf16 %v6381_v38  ;;  %v6388_v38 = vunpack.i.h.bf16 %v7531_v44 }
 0x32b   : > { %v876_v32 = vmul.f32 1.442695, %v852_v24  ;;  %6415 = vrot.lane.b32.xlu0 %v7065_v39, %s6945_s13 }
 0x32c   : > { %v831_v36 = vpop.xlane.xlu0 %830  ;;  %v5896_v24 = vpack.c.bf16 %v6383_v3, %v6382_v21 }
 0x32d   : > { %6682 = vpow2.f32 %v876_v32  ;;  %6400 = vrot.lane.b32.xlu1 %v7253_v55, %s6944_s12  ;;  %v855_v1 = vsub.f32 %v7495_v60, %v831_v36 }
 0x32e   : > { %6684 = vpow2.f32 %v878_v28  ;;  %v6387_v28 = vunpack.i.l.bf16 %v7531_v44  ;;  %v6393_v44 = vunpack.i.h.bf16 %v7537_v7 }
 0x32f   : > { %6425 = vrot.lane.b32.xlu0 %v7130_v14, %s6945_s13  ;;  %v882_v12 = vmul.f32 1.442695, %v855_v1  ;;  %v6392_v1 = vunpack.i.l.bf16 %v7537_v7 }
 0x330   : > { %v828_v6 = vpop.xlane.xlu0 %827  ;;  %v5902_v36 = vpack.c.bf16 %v6388_v38, %v6387_v28 }
 0x331   : > { %v854_v8 = vsub.f32 %v7497_v56, %v828_v6  ;;  %6405 = vrot.lane.b32.xlu1 %v7329_v35, %s6944_s12  ;;  %v5908_v6 = vpack.c.bf16 %v6393_v44, %v6392_v1 }
 0x333   : > { %v880_v45 = vmul.f32 1.442695, %v854_v8  ;;  %6435 = vrot.lane.b32.xlu0 %v7193_v5, %s6946_s14  ;;  %v1410_v8 = vpop.permute.xlu1 %1409 }
 0x334   : > { %v837_v7 = vpop.xlane.xlu0 %836 }
 0x335   : > { %6686 = vpow2.f32 %v880_v45  ;;  %6410 = vrot.lane.b32.xlu1 %v7366_v19, %s6944_s12 }
 0x336   : > { %6688 = vpow2.f32 %v882_v12  ;;  %v857_v12 = vsub.f32 %v7501_v61, %v837_v7 }
 0x337   : > { %v7579_v60 = vpop.eup %6682  ;;  %6445 = vrot.lane.b32.xlu0 %v7329_v35, %s6946_s14 }
 0x338   : > { %v7583_v56 = vpop.eup %6684  ;;  %5318 = vmatprep.mubr.msk.f32.mxu1 %vm795_vm1, %v7579_v60  ;;  %v886_v21 = vmul.f32 1.442695, %v857_v12  ;;  %v1408_v44 = vpop.permute.xlu0 %1407 }
 0x339   : > { %5319 = vmatmul.mubr.msk.f32.vlgmr.msra.gmra.mrb[32].mxu1 %vm795_vm1, %v7583_v56  ;;  %1230 = vrot.lane.b32.xlu1 %v7049_v29, %s6945_s13 }
 0x33a   : > { %5895 = vmatpush3.bf16.xpose.msk.msra.mxu1 %vm7394_vm5, %v7465_v42 }
 0x33b   : > { %5898 = vmatprep.subr.msk.bf16.mxu1 %vm7394_vm5, %v5896_v24  ;;  %6455 = vrot.lane.b32.xlu0 %v7223_v26, %s6946_s14 }
 0x33d   : > { %1234 = vrot.lane.b32.xlu1 %v7067_v40, %s6945_s13 }
 0x33f   : > { %v7602_v32 = vpop.eup %6686  ;;  %2454 = vrot.lane.b32.xlu0 %v7057_v33, %s6947_s17 }
 0x340   : > { %v7606_v42 = vpop.eup %6688  ;;  %5321 = vmatprep.mubr.msk.f32.mxu1 %vm795_vm1, %v7602_v32 }
 0x341   : > { %5322 = vmatmul.mubr.msk.f32.gmra.mrb[34].mxu1 %vm795_vm1, %v7606_v42  ;;  %1236 = vrot.lane.b32.xlu1 %v7075_v47, %s6945_s13 }
 0x342   : > { %5901 = vmatpush3.bf16.xpose.msk.msra.mxu1 %vm7394_vm5, %v5896_v24 }
 0x343   : > { %5904 = vmatprep.subr.msk.bf16.mxu1 %vm7394_vm5, %v5902_v36 }
 0x345   : > { %1238 = vrot.lane.b32.xlu1 %v7086_v57, %s6945_s13 }
 0x349   : > { %1240 = vrot.lane.b32.xlu1 %v7107_v2, %s6945_s13 }
 0x34a   : > { %5907 = vmatpush3.bf16.xpose.msk.msra.mxu1 %vm7394_vm5, %v5902_v36 }
 0x34b   : > { %5910 = vmatprep.subr.msk.bf16.mxu1 %vm7394_vm5, %v5908_v6 }
 0x34d   : > { %1242 = vrot.lane.b32.xlu1 %v7137_v17, %s6945_s13 }
 0x351   : > { %1244 = vrot.lane.b32.xlu1 %v7166_v43, %s6945_s13 }
 0x352   : > { %5913 = vmatpush3.bf16.xpose.msk.msra.mxu1 %vm7394_vm5, %v5908_v6 }
 0x355   : > { %6420 = vrot.lane.b32.xlu1 %v7083_v54, %s6945_s13 }
 0x359   : > { %6430 = vrot.lane.b32.xlu1 %v7208_v10, %s6945_s13 }
 0x35c   : > { %v834_v45 = vpop.xlane.xlu1 %833 }
 0x35d   : > { %v856_v3 = vsub.f32 %v7503_v15, %v834_v45  ;;  %6440 = vrot.lane.b32.xlu1 %v7253_v55, %s6946_s14 }
 0x35f   : > { %v884_v24 = vmul.f32 1.442695, %v856_v3 }
 0x360   : > { %v843_v38 = vpop.xlane.xlu1 %842 }
 0x361   : > { %6690 = vpow2.f32 %v884_v24  ;;  %6450 = vrot.lane.b32.xlu1 %v7366_v19, %s6946_s14  ;;  %v859_v28 = vsub.f32 %v7507_v22, %v843_v38 }
 0x362   : > { %6692 = vpow2.f32 %v886_v21 }
 0x363   : > { %v890_v15 = vmul.f32 1.442695, %v859_v28 }
 0x364   : > { %v840_v36 = vpop.xlane.xlu1 %839 }
 0x365   : > { %v858_v61 = vsub.f32 %v7509_v25, %v840_v36  ;;  %2452 = vrot.lane.b32.xlu1 %v7049_v29, %s6947_s17 }
 0x367   : > { %v888_v1 = vmul.f32 1.442695, %v858_v61 }
 0x368   : > { %v1412_v21 = vpop.permute.xlu1 %1411 }
 0x369   : > { %6694 = vpow2.f32 %v888_v1  ;;  %v804_v6 = vpop.xlane.xlu0 %803  ;;  %6460 = vrot.lane.b32.xlu1 %v7348_v13, %s6946_s14 }
 0x36a   : > { %6696 = vpow2.f32 %v890_v15  ;;  %v846_v7 = vsub.f32 %v7477_v50, %v804_v6 }
 0x36b   : > { %v7651_v12 = vpop.eup %6690 }
 0x36c   : > { %v7653_v22 = vpop.eup %6692  ;;  %v864_v45 = vmul.f32 1.442695, %v846_v7  ;;  %5324 = vmatprep.mubr.msk.f32.mxu1 %vm795_vm1, %v7651_v12 }
 0x36d   : > { %5325 = vmatmul.mubr.msk.f32.gmra.mrb[36].mxu1 %vm795_vm1, %v7653_v22 }
 0x36e   : > { %6698 = vpow2.f32 %v864_v45 }
 0x373   : > { %v7659_v25 = vpop.eup %6694 }
 0x374   : > { %v7661_v3 = vpop.eup %6696  ;;  %5327 = vmatprep.mubr.msk.f32.mxu1 %vm795_vm1, %v7659_v25 }
 0x375   : > { %5328 = vmatmul.mubr.msk.f32.gmra.mrb[38].mxu1 %vm795_vm1, %v7661_v3 }
 0x376   : > { %5374 = vmatprep.mubr.msk.f32.mxu1 %vm8856_vm4, %v7535_v4  ;;  %v1414_v4 = vpop.permute.xlu0 %1413  ;;  %vm8869_vm4 = vmmov %vm8853_vm0 }
 0x378   : > { %v7669_v50 = vpop.eup %6698 }
 0x379   : > { %5293 = vmatprep.mubr.msk.f32.mxu0 %vm795_vm1, %v7669_v50  ;;  %5375 = vmatmul.mubr.msk.f32.vlgmr.msra.gmra.mrb[40].mxu1 %vm8857_vm6, %v7529_v27  ;;  %vm8870_vm6 = vmmov %vm8853_vm0 }
 0x37a   : > { %5377 = vmatprep.mubr.msk.f32.mxu1 %vm8858_vm7, %v7539_v23  ;;  %vm8889_vm7 = vmmov %vm8853_vm0 }
 0x37d   : > { %5378 = vmatmul.mubr.msk.f32.gmra.mrb[42].mxu1 %vm8859_vm9, %v7533_v49  ;;  %vm8890_vm9 = vmmov %vm8853_vm0 }
 0x37e   : > { %5380 = vmatprep.mubr.msk.f32.mxu1 %vm8860_vm8, %v1408_v44  ;;  %vm8891_vm8 = vmmov %vm8853_vm0 }
 0x381   : > { %5381 = vmatmul.mubr.msk.f32.gmra.mrb[44].mxu1 %vm8861_vm14, %v1410_v8  ;;  %vm8892_vm14 = vmmov %vm8853_vm0 }
 0x382   : > { %5383 = vmatprep.mubr.msk.f32.mxu1 %vm8862_vm11, %v1412_v21  ;;  %vm8893_vm11 = vmmov %vm8853_vm0 }
 0x385   : > { %5384 = vmatmul.mubr.msk.f32.gmra.mrb[46].mxu1 %vm8863_vm12, %v1414_v4  ;;  %vm8894_vm12 = vmmov %vm8853_vm0 }
 0x399   : > { %v807_v24 = vpop.xlane.xlu1 %806 }
 0x39a   : > { %v847_v38 = vsub.f32 %v7475_v16, %v807_v24 }
 0x39c   : > { %v866_v27 = vmul.f32 1.442695, %v847_v38 }
 0x39d   : > { %v810_v28 = vpop.xlane.xlu1 %809 }
 0x39e   : > { %6700 = vpow2.f32 %v866_v27  ;;  %v848_v23 = vsub.f32 %v7481_v0, %v810_v28  ;;  %v819_v36 = vpop.xlane.xlu0 %818 }
 0x39f   : > { %v851_v15 = vsub.f32 %v7483_v46, %v819_v36 }
 0x3a0   : > { %v868_v49 = vmul.f32 1.442695, %v848_v23 }
 0x3a1   : > { %v813_v61 = vpop.xlane.xlu1 %812  ;;  %v874_v45 = vmul.f32 1.442695, %v851_v15 }
 0x3a2   : > { %6702 = vpow2.f32 %v868_v49  ;;  %v849_v44 = vsub.f32 %v7479_v59, %v813_v61  ;;  %v1233_v8 = vpop.permute.xlu0 %1232 }
 0x3a4   : > { %v870_v1 = vmul.f32 1.442695, %v849_v44 }
 0x3a5   : > { %v816_v6 = vpop.xlane.xlu1 %815 }
 0x3a6   : > { %6704 = vpow2.f32 %v870_v1  ;;  %v850_v7 = vsub.f32 %v7485_v62, %v816_v6  ;;  %v6416_v16 = vpop.permute.xlu0 %6415 }
 0x3a7   : > { %v6418_v21 = vunpack.i.h.bf16 %v6416_v16  ;;  %v6417_v4 = vunpack.i.l.bf16 %v6416_v16 }
 0x3a8   : > { %v7688_v24 = vpop.eup %6700  ;;  %v872_v0 = vmul.f32 1.442695, %v850_v7 }
 0x3a9   : > { %v6396_v38 = vpop.permute.xlu1 %6395  ;;  %5294 = vmatmul.mubr.msk.f32.gmra.mrb[18].mxu0 %vm795_vm1, %v7688_v24  ;;  %v5930_v59 = vpack.c.bf16 %v6418_v21, %v6417_v4 }
 0x3aa   : > { %6706 = vpow2.f32 %v872_v0  ;;  %v6398_v27 = vunpack.i.h.bf16 %v6396_v38  ;;  %v6397_v46 = vunpack.i.l.bf16 %v6396_v38 }
 0x3ab   : > { %6708 = vpow2.f32 %v874_v45  ;;  %5931 = vmatprep.subr.bf16.mxu1 %v5930_v59 }
 0x3ac   : > { %v7692_v28 = vpop.eup %6702  ;;  %v5866_v62 = vpack.c.bf16 %v6398_v27, %v6397_v46  ;;  %5933 = vmatpush3.bf16.msra.mxu1 %v5930_v59 }
 0x3ad   : > { %v6401_v23 = vpop.permute.xlu1 %6400  ;;  %5296 = vmatprep.mubr.msk.f32.mxu0 %vm795_vm1, %v7692_v28 }
 0x3ae   : > { %v6403_v36 = vunpack.i.h.bf16 %v6401_v23  ;;  %v6402_v49 = vunpack.i.l.bf16 %v6401_v23  ;;  %5868 = vmatprep.subr.msk.bf16.mxu0 %vm7394_vm5, %v5866_v62 }
 0x3af   : > { %5871 = vmatpush3.bf16.xpose.msk.msra.mxu0 %vm7394_vm5, %v5866_v62 }
 0x3b0   : > { %v7700_v61 = vpop.eup %6704  ;;  %v5872_v44 = vpack.c.bf16 %v6403_v36, %v6402_v49 }
 0x3b1   : > { %v6406_v15 = vpop.permute.xlu1 %6405  ;;  %5297 = vmatmul.mubr.msk.f32.gmra.mrb[20].mxu0 %vm795_vm1, %v7700_v61 }
 0x3b2   : > { %v6408_v1 = vunpack.i.h.bf16 %v6406_v15  ;;  %v6407_v6 = vunpack.i.l.bf16 %v6406_v15  ;;  %5874 = vmatprep.subr.msk.bf16.mxu0 %vm7394_vm5, %v5872_v44 }
 0x3b4   : > { %v7706_v7 = vpop.eup %6706  ;;  %v5878_v21 = vpack.c.bf16 %v6408_v1, %v6407_v6 }
 0x3b5   : > { %v7708_v16 = vpop.eup %6708  ;;  %v6411_v45 = vpop.permute.xlu1 %6410  ;;  %5299 = vmatprep.mubr.msk.f32.mxu0 %vm795_vm1, %v7706_v7 }
 0x3b6   : > { %5300 = vmatmul.mubr.msk.f32.gmra.mrb[22].mxu0 %vm795_vm1, %v7708_v16  ;;  %v6413_v0 = vunpack.i.h.bf16 %v6411_v45  ;;  %v6412_v38 = vunpack.i.l.bf16 %v6411_v45 }
 0x3b7   : > { %5877 = vmatpush3.bf16.xpose.msk.msra.mxu0 %vm7394_vm5, %v5872_v44  ;;  %v6426_v44 = vpop.permute.xlu0 %6425 }
 0x3b8   : > { %5880 = vmatprep.subr.msk.bf16.mxu0 %vm7394_vm5, %v5878_v21  ;;  %v5884_v27 = vpack.c.bf16 %v6413_v0, %v6412_v38  ;;  %v6428_v1 = vunpack.i.h.bf16 %v6426_v44  ;;  %v6427_v6 = vunpack.i.l.bf16 %v6426_v44 }
 0x3b9   : > { %v1231_v4 = vpop.permute.xlu1 %1230 }
 0x3ba   : > { %5346 = vmatprep.mubr.msk.f32.mxu0 %vm8864_vm10, %v1231_v4  ;;  %vm8895_vm10 = vmmov %vm8853_vm0 }
 0x3bd   : > { %v1235_v59 = vpop.permute.xlu1 %1234 }
 0x3bf   : > { %5883 = vmatpush3.bf16.xpose.msk.msra.mxu0 %vm7394_vm5, %v5878_v21 }
 0x3c0   : > { %5886 = vmatprep.subr.msk.bf16.mxu0 %vm7394_vm5, %v5884_v27 }
 0x3c1   : > { %v1237_v46 = vpop.permute.xlu1 %1236 }
 0x3c5   : > { %v1239_v62 = vpop.permute.xlu1 %1238 }
 0x3c7   : > { %5889 = vmatpush3.bf16.xpose.msk.msra.mxu0 %vm7394_vm5, %v5884_v27  ;;  %v6436_v27 = vpop.permute.xlu0 %6435 }
 0x3c9   : > { %v1241_v23 = vpop.permute.xlu1 %1240 }
 0x3cd   : > { %v1243_v36 = vpop.permute.xlu1 %1242 }
 0x3ce   : > { %5347 = vmatmul.mubr.msk.f32.vlgmr.msra.gmra.mrb[24].mxu0 %vm8865_vm13, %v1233_v8  ;;  %vm8896_vm13 = vmmov %vm8853_vm0 }
 0x3cf   : > { %5349 = vmatprep.mubr.msk.f32.mxu0 %vm8866_vm3, %v1235_v59  ;;  %v5938_v59 = vpack.c.bf16 %v6428_v1, %v6427_v6  ;;  %vm8897_vm3 = vmmov %vm8853_vm0 }
 0x3d1   : > { %v1245_v49 = vpop.permute.xlu1 %1244 }
 0x3d2   : > { %5350 = vmatmul.mubr.msk.f32.gmra.mrb[26].mxu0 %vm8853_vm0, %v1237_v46  ;;  %v6438_v46 = vunpack.i.h.bf16 %v6436_v27 }
 0x3d3   : > { %5352 = vmatprep.mubr.msk.f32.mxu0 %vm8867_vm2, %v1239_v62  ;;  %v6437_v62 = vunpack.i.l.bf16 %v6436_v27  ;;  %vm8898_vm2 = vmmov %vm8853_vm0 }
 0x3d5   : > { %v6421_v15 = vpop.permute.xlu1 %6420 }
 0x3d6   : > { %v6423_v45 = vunpack.i.h.bf16 %v6421_v15  ;;  %v6422_v21 = vunpack.i.l.bf16 %v6421_v15  ;;  %5353 = vmatmul.mubr.msk.f32.gmra.mrb[28].mxu0 %vm8868_vm15, %v1241_v23  ;;  %v7732_v15 = vpack.c.bf16 %v6438_v46, %v6437_v62  ;;  %vm8899_vm15 = vmmov %vm8853_vm0 }
 0x3d7   : > { %5355 = vmatprep.mubr.msk.f32.mxu0 %vm8869_vm4, %v1243_v36  ;;  %vm8900_vm4 = vmmov %vm8853_vm0 }
 0x3d8   : > { %v5934_v4 = vpack.c.bf16 %v6423_v45, %v6422_v21 }
 0x3d9   : > { %v6431_v0 = vpop.permute.xlu1 %6430 }
 0x3da   : > { %v6433_v8 = vunpack.i.h.bf16 %v6431_v0  ;;  %v6432_v38 = vunpack.i.l.bf16 %v6431_v0  ;;  %5356 = vmatmul.mubr.msk.f32.gmra.mrb[30].mxu0 %vm8870_vm6, %v1245_v49  ;;  %5935 = vmatprep.subr.bf16.mxu1 %v5934_v4  ;;  %vm8901_vm6 = vmmov %vm8853_vm0 }
 0x3db   : > { %5937 = vmatpush3.bf16.msra.mxu1 %v5934_v4 }
 0x3dc   : > { %5939 = vmatprep.subr.bf16.mxu1 %v5938_v59  ;;  %v5942_v44 = vpack.c.bf16 %v6433_v8, %v6432_v38 }
 0x3df   : > { %5941 = vmatpush3.bf16.msra.mxu1 %v5938_v59 }
 0x3e0   : > { %5943 = vmatprep.subr.bf16.mxu1 %v5942_v44 }
 0x3e3   : > { %5945 = vmatpush3.bf16.msra.mxu1 %v5942_v44 }
 0x3e4   : > { %5956 = vmatprep.subr.msk.bf16.mxu1 %vm7394_vm5, %v7732_v15 }
 0x3ec   : > { %v7737_v23 = vpop.f32.mrb[16].mxu0 }
 0x3ed   : > { %8871 = vst [vmem:[#allocation33_spill] sm:$0xff] %v7737_v23  ;;  %v7739_v36 = vpop.f32.mrb[17].mxu0 }
 0x3ee   : > { %8872 = vst [vmem:[#allocation34_spill] sm:$0xff] %v7739_v36 }
 0x40c   : > { %v7741_v49 = vpop.f32.mrb[32].mxu1 }
 0x40d   : > { %8873 = vst [vmem:[#allocation35_spill] sm:$0xff] %v7741_v49  ;;  %v7743_v1 = vpop.f32.mrb[33].mxu1 }
 0x40e   : > { %8874 = vst [vmem:[#allocation36_spill] sm:$0xff] %v7743_v1 }
 0x414   : > { %v7745_v6 = vpop.f32.mrb[34].mxu1 }
 0x415   : > { %8875 = vst [vmem:[#allocation37_spill] sm:$0xff] %v7745_v6  ;;  %v7747_v45 = vpop.f32.mrb[35].mxu1 }
 0x416   : > { %8876 = vst [vmem:[#allocation38_spill] sm:$0xff] %v7747_v45 }
 0x440   : > { %v7749_v21 = vpop.f32.mrb[36].mxu1 }
 0x441   : > { %8877 = vst [vmem:[#allocation39_spill] sm:$0xff] %v7749_v21  ;;  %v7751_v4 = vpop.f32.mrb[37].mxu1 }
 0x442   : > { %8878 = vst [vmem:[#allocation40_spill] sm:$0xff] %v7751_v4 }
 0x448   : > { %v7753_v0 = vpop.f32.mrb[38].mxu1 }
 0x449   : > { %8879 = vst [vmem:[#allocation41_spill] sm:$0xff] %v7753_v0  ;;  %v7755_v8 = vpop.f32.mrb[39].mxu1 }
 0x44a   : > { %8880 = vst [vmem:[#allocation42_spill] sm:$0xff] %v7755_v8 }
 0x44c   : > { %v7757_v38 = vpop.f32.mrb[40].mxu1 }
 0x44d   : > { %v7759_v59 = vpop.f32.mrb[41].mxu1 }
 0x450   : > { %v7761_v27 = vpop.f32.mrb[42].mxu1 }
 0x451   : > { %v7763_v46 = vpop.f32.mrb[43].mxu1 }
 0x454   : > { %v7765_v62 = vpop.f32.mrb[44].mxu1 }
 0x455   : > { %v7767_v44 = vpop.f32.mrb[45].mxu1 }
 0x456   : > { %v1604_v26 = vsel %vm795_vm1, %v7767_v44, -inf }
 0x458   : > { %v7769_v33 = vpop.f32.mrb[46].mxu1 }
 0x459   : > { %v7771_v21 = vpop.f32.mrb[47].mxu1 }
 0x47c   : > { %v7773_v4 = vpop.f32.mrb[18].mxu0 }
 0x47d   : > { %8881 = vst [vmem:[#allocation43_spill] sm:$0xff] %v7773_v4  ;;  %v7775_v0 = vpop.f32.mrb[19].mxu0 }
 0x47e   : > { %8882 = vst [vmem:[#allocation44_spill] sm:$0xff] %v7775_v0 }
 0x484   : > { %v7777_v8 = vpop.f32.mrb[20].mxu0 }
 0x485   : > { %8883 = vst [vmem:[#allocation45_spill] sm:$0xff] %v7777_v8  ;;  %v7779_v6 = vpop.f32.mrb[21].mxu0  ;;  %v1595_v8 = vsel %vm795_vm1, %v7757_v38, -inf }
 0x486   : > { %8884 = vst [vmem:[#allocation46_spill] sm:$0xff] %v7779_v6 }
 0x489   : > { %v7781_v19 = vpop.f32.mrb[22].mxu0 }
 0x48a   : > { %8885 = vst [vmem:[#allocation47_spill] sm:$0xff] %v7781_v19  ;;  %v7783_v45 = vpop.f32.mrb[23].mxu0 }
 0x48b   : > { %8886 = vst [vmem:[#allocation48_spill] sm:$0xff] %v7783_v45 }
 0x4a1   : > { %v7785_v49 = vpop.f32.mrb[24].mxu0 }
 0x4a2   : > { %v1360_v35 = vpop.f32.mrb[25].mxu0  ;;  %v1571_v1 = vsel %vm795_vm1, %v7785_v49, -inf }
 0x4a3   : > { %1572 = vmax.xlane.f32.xlu1 %v1571_v1  ;;  %v1568_v5 = vsel %vm795_vm1, %v1360_v35, -inf  ;;  %v1601_v1 = vsel %vm795_vm1, %v7761_v27, -inf }
 0x4a4   : > { %1569 = vmax.xlane.f32.xlu0 %v1568_v5 }
 0x4a5   : > { %v7790_v29 = vpop.f32.mrb[26].mxu0 }
 0x4a6   : > { %v7792_v10 = vpop.f32.mrb[27].mxu0  ;;  %v1577_v19 = vsel %vm795_vm1, %v7790_v29, -inf }
 0x4a7   : > { %1596 = vmax.xlane.f32.xlu1 %v1595_v8  ;;  %v1574_v5 = vsel %vm795_vm1, %v7792_v10, -inf }
 0x4a8   : > { %1578 = vmax.xlane.f32.xlu0 %v1577_v19  ;;  %v1592_v19 = vsel %vm795_vm1, %v7759_v59, -inf }
 0x4a9   : > { %v7798_v45 = vpop.f32.mrb[28].mxu0 }
 0x4aa   : > { %v7800_v6 = vpop.f32.mrb[29].mxu0  ;;  %v1583_v0 = vsel %vm795_vm1, %v7798_v45, -inf }
 0x4ab   : > { %1602 = vmax.xlane.f32.xlu1 %v1601_v1  ;;  %v1580_v8 = vsel %vm795_vm1, %v7800_v6, -inf  ;;  %v1598_v1 = vsel %vm795_vm1, %v7763_v46, -inf }
 0x4ac   : > { %1575 = vmax.xlane.f32.xlu0 %v1574_v5  ;;  %v1607_v5 = vsel %vm795_vm1, %v7765_v62, -inf }
 0x4ad   : > { %v7806_v13 = vpop.f32.mrb[30].mxu0 }
 0x4ae   : > { %v7808_v4 = vpop.f32.mrb[31].mxu0 }
 0x4af   : > { %1581 = vmax.xlane.f32.xlu1 %v1580_v8  ;;  %v1610_v8 = vsel %vm795_vm1, %v7771_v21, -inf }
 0x4b0   : > { %1593 = vmax.xlane.f32.xlu0 %v1592_v19  ;;  %v7846_v19 = vpop.permute.xlu1 %6440 }
 0x4b3   : > { %1584 = vmax.xlane.f32.xlu1 %v1583_v0  ;;  %v1613_v0 = vsel %vm795_vm1, %v7769_v33, -inf }
 0x4b4   : > { %1599 = vmax.xlane.f32.xlu0 %v1598_v1  ;;  %v7852_v1 = vpop.permute.xlu1 %6450 }
 0x4b8   : > { %1608 = vmax.xlane.f32.xlu0 %v1607_v5  ;;  %v7854_v5 = vpop.permute.xlu0 %6445 }
 0x4bc   : > { %1605 = vmax.xlane.f32.xlu0 %v1604_v26  ;;  %v1586_v26 = vsel %vm795_vm1, %v7808_v4, -inf }
 0x4c4   : > { %2456 = vrot.lane.b32.xlu1 %v7067_v40, %s6947_s17 }
 0x4c8   : > { %6470 = vrot.lane.b32.xlu1 %v7062_v37, %s6945_s13 }
 0x4d2   : > { %6465 = vrot.lane.b32.xlu0 %v7323_v52, %s6946_s14 }
 0x4ec   : > { %1614 = vmax.xlane.f32.xlu1 %v1613_v0  ;;  %v1589_v0 = vsel %vm795_vm1, %v7806_v13, -inf }
 0x4f0   : > { %1611 = vmax.xlane.f32.xlu1 %v1610_v8  ;;  %v7860_v8 = vpop.permute.xlu1 %2452 }
 0x4f1   : > { %1587 = vmax.xlane.f32.xlu0 %v1586_v26  ;;  %v7862_v26 = vpop.permute.xlu0 %6455 }
 0x501   : > { %2458 = vrot.lane.b32.xlu1 %v7075_v47, %s6947_s17 }
 0x507   : > { %6475 = vrot.lane.b32.xlu0 %v7372_v20, %s6946_s14 }
 0x50b   : > { %6480 = vrot.lane.b32.xlu0 %v7080_v51, %s6945_s13 }
 0x50f   : > { %2462 = vrot.lane.b32.xlu0 %v7107_v2, %s6947_s17 }
 0x513   : > { %2464 = vrot.lane.b32.xlu0 %v7137_v17, %s6947_s17  ;;  %v7866_v17 = vpop.permute.xlu1 %6460 }
 0x517   : > { %2466 = vrot.lane.b32.xlu0 %v7166_v43, %s6947_s17 }
 0x51b   : > { %6490 = vrot.lane.b32.xlu0 %v7191_v63, %s6945_s13 }
 0x51f   : > { %2625 = vrot.lane.b32.xlu0 %v7069_v41, %s6947_s17  ;;  %v7868_v41 = vpop.permute.xlu0 %2454 }
 0x523   : > { %2629 = vrot.lane.b32.xlu0 %v7088_v58, %s6947_s17 }
 0x525   : > { %1590 = vmax.xlane.f32.xlu1 %v1589_v0 }
 0x527   : > { %2633 = vrot.lane.b32.xlu0 %v7139_v18, %s6947_s17 }
 0x530   : > { %v7870_v47 = vpop.xlane.xlu1 %1572 }
 0x531   : > { %v1570_v43 = vpop.xlane.xlu0 %1569 }
 0x532   : > { %v1616_v52 = vsub.f32 %v1360_v35, %v1570_v43 }
 0x534   : > { %v1632_v58 = vmul.f32 1.442695, %v1616_v52  ;;  %v1597_v2 = vpop.xlane.xlu1 %1596 }
 0x535   : > { %v7872_v20 = vpop.xlane.xlu0 %1578  ;;  %v1625_v18 = vsub.f32 %v7757_v38, %v1597_v2 }
 0x536   : > { %6710 = vpow2.f32 %v1632_v58  ;;  %2460 = vrot.lane.b32.xlu1 %v7086_v57, %s6947_s17 }
 0x537   : > { %v1650_v58 = vmul.f32 1.442695, %v1625_v18 }
 0x538   : > { %v1603_v0 = vpop.xlane.xlu1 %1602 }
 0x539   : > { %v7876_v40 = vpop.xlane.xlu0 %1575  ;;  %v1627_v52 = vsub.f32 %v7761_v27, %v1603_v0  ;;  %v892_v0 = vsel %vm795_vm1, %v7549_v53, 0.0 }
 0x53a   : > { %6485 = vrot.lane.b32.xlu1 %v7126_v11, %s6945_s13 }
 0x53c   : > { %v7881_v23 = vpop.xlane.xlu1 %1581 }
 0x53d   : > { %v1594_v36 = vpop.xlane.xlu0 %1593 }
 0x53e   : > { %v1624_v43 = vsub.f32 %v7759_v59, %v1594_v36  ;;  %2621 = vrot.lane.b32.xlu1 %v7051_v30, %s6947_s17  ;;  %v1654_v36 = vmul.f32 1.442695, %v1627_v52  ;;  %v898_v52 = vsel %vm795_vm1, %v7669_v50, 0.0  ;;  %v6442_v30 = vunpack.i.l.bf16 %v7846_v19 }
 0x540   : > { %v7887_v35 = vpop.eup %6710  ;;  %v1648_v57 = vmul.f32 1.442695, %v1624_v43  ;;  %v7889_v55 = vpop.xlane.xlu1 %1584 }
 0x541   : > { %5402 = vmatprep.mubr.msk.f32.mxu0 %vm795_vm1, %v7887_v35  ;;  %v1600_v2 = vpop.xlane.xlu0 %1599 }
 0x542   : > { %6712 = vpow2.f32 %v1648_v57  ;;  %v1626_v38 = vsub.f32 %v7763_v46, %v1600_v2  ;;  %2623 = vrot.lane.b32.xlu1 %v7059_v34, %s6947_s17 }
 0x543   : > { %6714 = vpow2.f32 %v1650_v58 }
 0x544   : > { %v1652_v18 = vmul.f32 1.442695, %v1626_v38  ;;  %v7896_v59 = vpop.permute.xlu1 %2456  ;;  %v6443_v38 = vunpack.i.h.bf16 %v7846_v19  ;;  %v904_v19 = vsel %vm795_vm1, %v7692_v28, 0.0  ;;  %v910_v28 = vsel %vm795_vm1, %v7706_v7, 0.0 }
 0x545   : > { %v1609_v27 = vpop.xlane.xlu0 %1608  ;;  %v6453_v7 = vunpack.i.h.bf16 %v7852_v1 }
 0x546   : > { %6716 = vpow2.f32 %v1652_v18  ;;  %2627 = vrot.lane.b32.xlu1 %v7077_v48, %s6947_s17  ;;  %893 = vadd.xlane.f32.xlu0 %v892_v0  ;;  %v1629_v57 = vsub.f32 %v7765_v62, %v1609_v27  ;;  %v8887_v18 = vld [vmem:[#allocation17_spill] sm:$0xff]  ;;  %v5960_v50 = vpack.c.bf16 %v6443_v38, %v6442_v30  ;;  %v6452_v38 = vunpack.i.l.bf16 %v7852_v1 }
 0x547   : > { %6718 = vpow2.f32 %v1654_v36  ;;  %v6458_v1 = vunpack.i.h.bf16 %v7862_v26 }
 0x548   : > { %v6471_v46 = vpop.permute.xlu1 %6470  ;;  %v1658_v36 = vmul.f32 1.442695, %v1629_v57 }
 0x549   : > { %v6473_v43 = vunpack.i.h.bf16 %v6471_v46  ;;  %v6472_v2 = vunpack.i.l.bf16 %v6471_v46  ;;  %v1606_v58 = vpop.xlane.xlu0 %1605 }
 0x54a   : > { %v1628_v53 = vsub.f32 %v7767_v44, %v1606_v58  ;;  %2631 = vrot.lane.b32.xlu1 %v8887_v18, %s6947_s17  ;;  %899 = vadd.xlane.f32.xlu0 %v898_v52  ;;  %v8888_v44 = vld [vmem:[#allocation22_spill] sm:$0xff]  ;;  %v916_v58 = vsel %vm795_vm1, %v7579_v60, 0.0  ;;  %v922_v60 = vsel %vm795_vm1, %v7602_v32, 0.0 }
 0x54b   : > { %v5914_v0 = vpack.c.bf16 %v6473_v43, %v6472_v2  ;;  %v6448_v43 = vunpack.i.h.bf16 %v7854_v5 }
 0x54c   : > { %v7910_v62 = vpop.eup %6712  ;;  %v1656_v27 = vmul.f32 1.442695, %v1628_v53  ;;  %v5972_v53 = vpack.c.bf16 %v6453_v7, %v6452_v38 }
 0x54d   : > { %v7912_v46 = vpop.eup %6714  ;;  %5430 = vmatprep.mubr.msk.f32.mxu1 %vm795_vm1, %v7910_v62  ;;  %5915 = vmatprep.subr.bf16.mxu0 %v5914_v0 }
 0x54e   : > { %6720 = vpow2.f32 %v1656_v27  ;;  %5917 = vmatpush3.bf16.msra.mxu0 %v5914_v0  ;;  %5431 = vmatmul.mubr.msk.f32.vlgmr.msra.gmra.mrb[48].mxu1 %vm795_vm1, %v7912_v46  ;;  %v6457_v0 = vunpack.i.l.bf16 %v7862_v26  ;;  %v934_v27 = vsel %vm795_vm1, %v7659_v25, 0.0  ;;  %v907_v25 = vsel %vm795_vm1, %v7700_v61, 0.0 }
 0x54f   : > { %6722 = vpow2.f32 %v1658_v36  ;;  %5959 = vmatpush3.bf16.xpose.msk.msra.mxu1 %vm7394_vm5, %v7732_v15  ;;  %2635 = vrot.lane.b32.xlu1 %v8888_v44, %s6947_s17  ;;  %v6447_v15 = vunpack.i.l.bf16 %v7854_v5  ;;  %v928_v36 = vsel %vm795_vm1, %v7651_v12, 0.0  ;;  %v895_v12 = vsel %vm795_vm1, %v7553_v9, 0.0 }
 0x550   : > { %v7925_v57 = vpop.eup %6716  ;;  %905 = vadd.xlane.f32.xlu0 %v904_v19  ;;  %5962 = vmatprep.subr.msk.bf16.mxu1 %vm7394_vm5, %v5960_v50  ;;  %v5978_v32 = vpack.c.bf16 %v6458_v1, %v6457_v0  ;;  %v6466_v19 = vpop.permute.xlu0 %6465  ;;  %v919_v61 = vsel %vm795_vm1, %v7583_v56, 0.0  ;;  %v6462_v0 = vunpack.i.l.bf16 %v7866_v17 }
 0x551   : > { %v7929_v30 = vpop.eup %6718  ;;  %5433 = vmatprep.mubr.msk.f32.mxu1 %vm795_vm1, %v7925_v57  ;;  %v5966_v2 = vpack.c.bf16 %v6448_v43, %v6447_v15 }
 0x552   : > { %5434 = vmatmul.mubr.msk.f32.gmra.mrb[50].mxu1 %vm795_vm1, %v7929_v30 }
 0x554   : > { %911 = vadd.xlane.f32.xlu0 %v910_v28 }
 0x557   : > { %5965 = vmatpush3.bf16.xpose.msk.msra.mxu1 %vm7394_vm5, %v5960_v50  ;;  %v901_v50 = vsel %vm795_vm1, %v7688_v24, 0.0  ;;  %v913_v24 = vsel %vm795_vm1, %v7708_v16, 0.0  ;;  %v931_v16 = vsel %vm795_vm1, %v7653_v22, 0.0  ;;  %v1618_v22 = vsub.f32 %v7792_v10, %v7876_v40 }
 0x558   : > { %v7943_v52 = vpop.eup %6720  ;;  %917 = vadd.xlane.f32.xlu0 %v916_v58  ;;  %5968 = vmatprep.subr.msk.bf16.mxu1 %vm7394_vm5, %v5966_v2  ;;  %v6468_v10 = vunpack.i.h.bf16 %v6466_v19 }
 0x559   : > { %v7947_v5 = vpop.eup %6722  ;;  %5436 = vmatprep.mubr.msk.f32.mxu1 %vm795_vm1, %v7943_v52 }
 0x55a   : > { %5437 = vmatmul.mubr.msk.f32.gmra.mrb[52].mxu1 %vm795_vm1, %v7947_v5 }
 0x55c   : > { %923 = vadd.xlane.f32.xlu0 %v922_v60 }
 0x55f   : > { %5971 = vmatpush3.bf16.xpose.msk.msra.mxu1 %vm7394_vm5, %v5966_v2 }
 0x560   : > { %929 = vadd.xlane.f32.xlu0 %v928_v36  ;;  %5974 = vmatprep.subr.msk.bf16.mxu1 %vm7394_vm5, %v5972_v53  ;;  %v1619_v36 = vsub.f32 %v7790_v29, %v7872_v20  ;;  %v937_v29 = vsel %vm795_vm1, %v7661_v3, 0.0  ;;  %v6467_v3 = vunpack.i.l.bf16 %v6466_v19 }
 0x562   : > { %v1638_v20 = vmul.f32 1.442695, %v1619_v36 }
 0x564   : > { %935 = vadd.xlane.f32.xlu0 %v934_v27 }
 0x567   : > { %5977 = vmatpush3.bf16.xpose.msk.msra.mxu1 %vm7394_vm5, %v5972_v53 }
 0x568   : > { %5980 = vmatprep.subr.msk.bf16.mxu1 %vm7394_vm5, %v5978_v32 }
 0x573   : > { %896 = vadd.xlane.f32.xlu1 %v895_v12  ;;  %v1620_v12 = vsub.f32 %v7800_v6, %v7881_v23  ;;  %v1664_v6 = vsel %vm795_vm1, %v7887_v35, 0.0 }
 0x577   : > { %902 = vadd.xlane.f32.xlu1 %v901_v50  ;;  %v5990_v50 = vpack.c.bf16 %v6468_v10, %v6467_v3 }
 0x579   : > { %v1615_v26 = vpop.xlane.xlu1 %1614 }
 0x57a   : > { %6500 = vrot.lane.b32.xlu0 %v7080_v51, %s6947_s17  ;;  %v1631_v43 = vsub.f32 %v7769_v33, %v1615_v26  ;;  %v925_v33 = vsel %vm795_vm1, %v7606_v42, 0.0  ;;  %v6463_v42 = vunpack.i.h.bf16 %v7866_v17  ;;  %v1636_v17 = vmul.f32 1.442695, %v1618_v22 }
 0x57b   : > { %908 = vadd.xlane.f32.xlu1 %v907_v25 }
 0x57c   : > { %v1662_v2 = vmul.f32 1.442695, %v1631_v43  ;;  %v5984_v27 = vpack.c.bf16 %v6463_v42, %v6462_v0 }
 0x57d   : > { %v1612_v15 = vpop.xlane.xlu1 %1611 }
 0x57e   : > { %6515 = vrot.lane.b32.xlu0 %v7065_v39, %s6947_s17  ;;  %v1630_v9 = vsub.f32 %v7771_v21, %v1612_v15  ;;  %v1588_v28 = vpop.xlane.xlu0 %1587 }
 0x57f   : > { %914 = vadd.xlane.f32.xlu1 %v913_v24 }
 0x580   : > { %v1660_v58 = vmul.f32 1.442695, %v1630_v9 }
 0x581   : > { %v2459_v40 = vpop.permute.xlu1 %2458 }
 0x582   : > { %6724 = vpow2.f32 %v1660_v58  ;;  %v6476_v7 = vpop.permute.xlu0 %6475  ;;  %v1688_v58 = vsel %vm795_vm1, %v7910_v62, 0.0 }
 0x583   : > { %6726 = vpow2.f32 %v1662_v2  ;;  %920 = vadd.xlane.f32.xlu1 %v919_v61  ;;  %v6477_v26 = vunpack.i.l.bf16 %v6476_v7 }
 0x584   : > { %6728 = vpow2.f32 %v1638_v20 }
 0x585   : > { %6730 = vpow2.f32 %v1636_v17 }
 0x586   : > { %v6481_v38 = vpop.permute.xlu0 %6480 }
 0x587   : > { %926 = vadd.xlane.f32.xlu1 %v925_v33  ;;  %v6483_v21 = vunpack.i.h.bf16 %v6481_v38  ;;  %v6482_v60 = vunpack.i.l.bf16 %v6481_v38  ;;  %v1617_v33 = vsub.f32 %v7785_v49, %v7870_v47  ;;  %v1694_v38 = vsel %vm795_vm1, %v7925_v57, 0.0 }
 0x588   : > { %v1621_v47 = vsub.f32 %v7798_v45, %v7889_v55 }
 0x589   : > { %v5918_v53 = vpack.c.bf16 %v6483_v21, %v6482_v60  ;;  %v1634_v60 = vmul.f32 1.442695, %v1617_v33 }
 0x58a   : > { %v2463_v15 = vpop.permute.xlu0 %2462 }
 0x58b   : > { %932 = vadd.xlane.f32.xlu1 %v931_v16  ;;  %5919 = vmatprep.subr.bf16.mxu0 %v5918_v53  ;;  %v1700_v16 = vsel %vm795_vm1, %v7943_v52, 0.0 }
 0x58c   : > { %v7993_v56 = vpop.eup %6724  ;;  %5921 = vmatpush3.bf16.msra.mxu0 %v5918_v53 }
 0x58d   : > { %v7995_v1 = vpop.eup %6726  ;;  %5439 = vmatprep.mubr.msk.f32.mxu1 %vm795_vm1, %v7993_v56  ;;  %v1706_v0 = vsel %vm795_vm1, %v7993_v56, 0.0 }
 0x58e   : > { %5440 = vmatmul.mubr.msk.f32.gmra.mrb[54].mxu1 %vm795_vm1, %v7995_v1 }
 0x58f   : > { %938 = vadd.xlane.f32.xlu1 %v937_v29  ;;  %5514 = vmatprep.mubr.msk.f32.mxu1 %vm8889_vm7, %v7860_v8  ;;  %v1622_v8 = vsub.f32 %v7808_v4, %v1588_v28  ;;  %v2465_v28 = vpop.permute.xlu0 %2464  ;;  %v1642_v29 = vmul.f32 1.442695, %v1621_v47  ;;  %vm8902_vm7 = vmmov %vm8853_vm0 }
 0x591   : > { %v1644_v23 = vmul.f32 1.442695, %v1622_v8 }
 0x592   : > { %5515 = vmatmul.mubr.msk.f32.vlgmr.msra.gmra.mrb[56].mxu1 %vm8890_vm9, %v7868_v41  ;;  %v1640_v41 = vmul.f32 1.442695, %v1620_v12  ;;  %vm8903_vm9 = vmmov %vm8853_vm0 }
 0x593   : > { %5983 = vmatpush3.bf16.xpose.msk.msra.mxu1 %vm7394_vm5, %v5978_v32  ;;  %5517 = vmatprep.mubr.msk.f32.mxu1 %vm8891_vm8, %v7896_v59  ;;  %v8027_v59 = vpop.eup %6728  ;;  %v6478_v32 = vunpack.i.h.bf16 %v6476_v7  ;;  %v2467_v61 = vpop.permute.xlu0 %2466  ;;  %vm8904_vm8 = vmmov %vm8853_vm0 }
 0x594   : > { %5986 = vmatprep.subr.msk.bf16.mxu1 %vm7394_vm5, %v5984_v27  ;;  %6732 = vpow2.f32 %v1640_v41  ;;  %v1673_v4 = vsel %vm795_vm1, %v8027_v59, 0.0  ;;  %v8033_v19 = vpop.eup %6730 }
 0x595   : > { %6734 = vpow2.f32 %v1644_v23  ;;  %v5996_v25 = vpack.c.bf16 %v6478_v32, %v6477_v26  ;;  %v1670_v35 = vsel %vm795_vm1, %v8033_v19, 0.0  ;;  %v1691_v32 = vsel %vm795_vm1, %v7912_v46, 0.0 }
 0x596   : > { %5518 = vmatmul.mubr.msk.f32.gmra.mrb[58].mxu1 %vm8892_vm14, %v2459_v40  ;;  %6736 = vpow2.f32 %v1634_v60  ;;  %v449_v60 = vld [vmem:[%s8730_s2 + $0x8] sm:$0xff]  ;;  %vm8905_vm14 = vmmov %vm8853_vm0 }
 0x597   : > { %v6491_v53 = vpop.permute.xlu0 %6490  ;;  %6738 = vpow2.f32 %v1642_v29 }
 0x598   : > { %v6493_v62 = vunpack.i.h.bf16 %v6491_v53  ;;  %v6492_v57 = vunpack.i.l.bf16 %v6491_v53 }
 0x59a   : > { %v5926_v55 = vpack.c.bf16 %v6493_v62, %v6492_v57 }
 0x59b   : > { %5989 = vmatpush3.bf16.xpose.msk.msra.mxu1 %vm7394_vm5, %v5984_v27  ;;  %v2626_v45 = vpop.permute.xlu0 %2625 }
 0x59c   : > { %5992 = vmatprep.subr.msk.bf16.mxu1 %vm7394_vm5, %v5990_v50 }
 0x59d   : > { %1665 = vadd.xlane.f32.xlu0 %v1664_v6 }
 0x59e   : > { %v8043_v43 = vpop.eup %6732 }
 0x59f   : > { %v1676_v9 = vsel %vm795_vm1, %v8043_v43, 0.0  ;;  %v8049_v24 = vpop.eup %6734  ;;  %v2630_v12 = vpop.permute.xlu0 %2629 }
 0x5a0   : > { %6495 = vrot.lane.b32.xlu1 %v7062_v37, %s6947_s17  ;;  %v1682_v2 = vsel %vm795_vm1, %v8049_v24, 0.0  ;;  %v6737_v56 = vpop.eup %6736 }
 0x5a1   : > { %1674 = vadd.xlane.f32.xlu0 %v1673_v4  ;;  %v1667_v10 = vsel %vm795_vm1, %v6737_v56, 0.0  ;;  %v6739_v3 = vpop.eup %6738  ;;  %v1697_v4 = vsel %vm795_vm1, %v7929_v30, 0.0 }
 0x5a3   : > { %5995 = vmatpush3.bf16.xpose.msk.msra.mxu1 %vm7394_vm5, %v5990_v50  ;;  %v2634_v41 = vpop.permute.xlu0 %2633  ;;  %v1679_v50 = vsel %vm795_vm1, %v6739_v3, 0.0 }
 0x5a4   : > { %6505 = vrot.lane.b32.xlu1 %v7126_v11, %s6947_s17  ;;  %5998 = vmatprep.subr.msk.bf16.mxu1 %vm7394_vm5, %v5996_v25 }
 0x5a5   : > { %1671 = vadd.xlane.f32.xlu0 %v1670_v35 }
 0x5a8   : > { %6510 = vrot.lane.b32.xlu1 %v7191_v63, %s6947_s17 }
 0x5a9   : > { %1677 = vadd.xlane.f32.xlu0 %v1676_v9 }
 0x5ab   : > { %6001 = vmatpush3.bf16.xpose.msk.msra.mxu1 %vm7394_vm5, %v5996_v25  ;;  %v1703_v25 = vsel %vm795_vm1, %v7947_v5, 0.0 }
 0x5ad   : > { %1683 = vadd.xlane.f32.xlu0 %v1682_v2 }
 0x5b1   : > { %1689 = vadd.xlane.f32.xlu0 %v1688_v58 }
 0x5b2   : > { %v1591_v7 = vpop.xlane.xlu1 %1590 }
 0x5b3   : > { %v1623_v20 = vsub.f32 %v7806_v13, %v1591_v7  ;;  %v451_v7 = vld [vmem:[%s8730_s2 + $0x18] sm:$0xff] }
 0x5b5   : > { %1695 = vadd.xlane.f32.xlu0 %v1694_v38  ;;  %v1646_v27 = vmul.f32 1.442695, %v1623_v20 }
 0x5b6   : > { %v2461_v21 = vpop.permute.xlu1 %2460 }
 0x5b7   : > { %5520 = vmatprep.mubr.msk.f32.mxu1 %vm8893_vm11, %v2461_v21  ;;  %6740 = vpow2.f32 %v1646_v27  ;;  %v448_v21 = vld [vmem:[%s8730_s2] sm:$0xff]  ;;  %vm8906_vm11 = vmmov %vm8853_vm0 }
 0x5b8   : > { %5521 = vmatmul.mubr.msk.f32.gmra.mrb[60].mxu1 %vm8894_vm12, %v2463_v15  ;;  %v8138_v53 = vpack.c.bf16 %v449_v60, %v448_v21  ;;  %vm8907_vm12 = vmmov %vm8853_vm0 }
 0x5b9   : > { %1701 = vadd.xlane.f32.xlu0 %v1700_v16  ;;  %5523 = vmatprep.mubr.msk.f32.mxu1 %vm8895_vm10, %v2465_v28  ;;  %vm8908_vm10 = vmmov %vm8853_vm0 }
 0x5ba   : > { %v6486_v49 = vpop.permute.xlu1 %6485 }
 0x5bb   : > { %v6488_v36 = vunpack.i.h.bf16 %v6486_v49  ;;  %v6487_v42 = vunpack.i.l.bf16 %v6486_v49 }
 0x5bc   : > { %5524 = vmatmul.mubr.msk.f32.gmra.mrb[62].mxu1 %vm8896_vm13, %v2467_v61  ;;  %v450_v61 = vld [vmem:[%s8730_s2 + $0x10] sm:$0xff]  ;;  %vm8909_vm13 = vmmov %vm8853_vm0 }
 0x5bd   : > { %1707 = vadd.xlane.f32.xlu0 %v1706_v0  ;;  %v5922_v52 = vpack.c.bf16 %v6488_v36, %v6487_v42  ;;  %v5946_v33 = vpack.c.bf16 %v451_v7, %v450_v61 }
 0x5be   : > { %v2622_v22 = vpop.permute.xlu1 %2621 }
 0x5bf   : > { %5923 = vmatprep.subr.bf16.mxu0 %v5922_v52  ;;  %5542 = vmatprep.mubr.msk.f32.mxu1 %vm8897_vm3, %v2622_v22  ;;  %vm8910_vm3 = vmmov %vm8853_vm0 }
 0x5c0   : > { %5925 = vmatpush3.bf16.msra.mxu0 %v5922_v52 }
 0x5c1   : > { %5927 = vmatprep.subr.bf16.mxu0 %v5926_v55  ;;  %v6741_v23 = vpop.eup %6740 }
 0x5c2   : > { %v2624_v17 = vpop.permute.xlu1 %2623  ;;  %v1685_v6 = vsel %vm795_vm1, %v6741_v23, 0.0 }
 0x5c3   : > { %5543 = vmatmul.mubr.msk.f32.vlgmr.msra.gmra.mrb[64].mxu1 %vm8853_vm0, %v2624_v17 }
 0x5c4   : > { %5929 = vmatpush3.bf16.msra.mxu0 %v5926_v55  ;;  %5545 = vmatprep.mubr.msk.f32.mxu1 %vm8898_vm2, %v2626_v45  ;;  %vm8911_vm2 = vmmov %vm8853_vm0 }
 0x5c5   : > { %5947 = vmatprep.subr.bf16.mxu0 %v5946_v33 }
 0x5c6   : > { %v2628_v13 = vpop.permute.xlu1 %2627 }
 0x5c7   : > { %5403 = vmatmul.mubr.msk.f32.vlgmr.msra.gmra.mrb[32].mxu0 %vm795_vm1, %v6737_v56  ;;  %5546 = vmatmul.mubr.msk.f32.gmra.mrb[66].mxu1 %vm8899_vm15, %v2628_v13  ;;  %vm8912_vm15 = vmmov %vm8853_vm0 }
 0x5c8   : > { %5405 = vmatprep.mubr.msk.f32.mxu0 %vm795_vm1, %v8033_v19  ;;  %5548 = vmatprep.mubr.msk.f32.mxu1 %vm8900_vm4, %v2630_v12  ;;  %vm8913_vm4 = vmmov %vm8853_vm0 }
 0x5c9   : > { %5949 = vmatpush3.bf16.msra.mxu0 %v5946_v33 }
 0x5ca   : > { %v2632_v40 = vpop.permute.xlu1 %2631  ;;  %5951 = vmatprep.subr.bf16.mxu0 %v8138_v53 }
 0x5cb   : > { %5406 = vmatmul.mubr.msk.f32.gmra.mrb[34].mxu0 %vm795_vm1, %v8027_v59  ;;  %5549 = vmatmul.mubr.msk.f32.gmra.mrb[68].mxu1 %vm8901_vm6, %v2632_v40  ;;  %vm8914_vm6 = vmmov %vm8853_vm0 }
 0x5cc   : > { %1668 = vadd.xlane.f32.xlu1 %v1667_v10  ;;  %5408 = vmatprep.mubr.msk.f32.mxu0 %vm795_vm1, %v8043_v43  ;;  %v1709_v43 = vsel %vm795_vm1, %v7995_v1, 0.0 }
 0x5cd   : > { %5551 = vmatprep.mubr.msk.f32.mxu1 %vm8902_vm7, %v2634_v41  ;;  %vm8915_vm7 = vmmov %vm8853_vm0 }
 0x5ce   : > { %v2636_v8 = vpop.permute.xlu1 %2635 }
 0x5cf   : > { %5409 = vmatmul.mubr.msk.f32.gmra.mrb[36].mxu0 %vm795_vm1, %v6739_v3  ;;  %5552 = vmatmul.mubr.msk.f32.gmra.mrb[70].mxu1 %vm8903_vm9, %v2636_v8  ;;  %vm8916_vm9 = vmmov %vm8853_vm0 }
 0x5d0   : > { %1680 = vadd.xlane.f32.xlu1 %v1679_v50  ;;  %5411 = vmatprep.mubr.msk.f32.mxu0 %vm795_vm1, %v8049_v24 }
 0x5d3   : > { %v8093_v59 = vpop.xlane.xlu0 %893  ;;  %5412 = vmatmul.mubr.msk.f32.gmra.mrb[38].mxu0 %vm795_vm1, %v6741_v23 }
 0x5d4   : > { %1686 = vadd.xlane.f32.xlu1 %v1685_v6 }
 0x5d7   : > { %v8098_v26 = vpop.xlane.xlu0 %899 }
 0x5d8   : > { %1692 = vadd.xlane.f32.xlu1 %v1691_v32 }
 0x5dc   : > { %1698 = vadd.xlane.f32.xlu1 %v1697_v4 }
 0x5dd   : > { %v8102_v19 = vpop.xlane.xlu0 %905 }
 0x5e0   : > { %1704 = vadd.xlane.f32.xlu1 %v1703_v25 }
 0x5e1   : > { %v8106_v35 = vpop.xlane.xlu0 %911 }
 0x5e4   : > { %1710 = vadd.xlane.f32.xlu1 %v1709_v43 }
 0x5e5   : > { %v8110_v46 = vpop.xlane.xlu0 %917 }
 0x5e9   : > { %v8112_v15 = vpop.xlane.xlu0 %923 }
 0x5ed   : > { %v8114_v9 = vpop.xlane.xlu0 %929 }
 0x5f1   : > { %v8116_v30 = vpop.xlane.xlu0 %935 }
 0x5f5   : > { %v8118_v24 = vpop.permute.xlu0 %6500  ;;  %6520 = vrot.lane.b32.xlu1 %v7083_v54, %s6947_s17 }
 0x5f9   : > { %v6516_v5 = vpop.permute.xlu0 %6515 }
 0x5fa   : > { %v6518_v28 = vunpack.i.h.bf16 %v6516_v5  ;;  %v6517_v2 = vunpack.i.l.bf16 %v6516_v5 }
 0x5fc   : > { %v6018_v58 = vpack.c.bf16 %v6518_v28, %v6517_v2 }
 0x5fe   : > { %6019 = vmatprep.subr.bf16.mxu1 %v6018_v58 }
 0x5ff   : > { %6021 = vmatpush3.bf16.msra.mxu1 %v6018_v58 }
 0x600   : > { %v8122_v1 = vpop.xlane.xlu1 %896 }
 0x604   : > { %v8130_v38 = vpop.xlane.xlu1 %902 }
 0x608   : > { %v8145_v49 = vpop.xlane.xlu1 %908 }
 0x60c   : > { %v8151_v36 = vpop.xlane.xlu1 %914 }
 0x610   : > { %v8157_v52 = vpop.xlane.xlu1 %920 }
 0x614   : > { %v8159_v29 = vpop.xlane.xlu1 %926 }
 0x618   : > { %v8161_v20 = vpop.xlane.xlu1 %932 }
 0x61c   : > { %v8163_v22 = vpop.xlane.xlu1 %938 }
 0x620   : > { %v8165_v55 = vpop.permute.xlu1 %6495 }
 0x621   : > { %v8140_v16 = vpop.f32.mrb[48].mxu1  ;;  %v6497_v51 = vunpack.i.l.bf16 %v8165_v55 }
 0x622   : > { %v8142_v47 = vpop.f32.mrb[49].mxu1 }
 0x624   : > { %v8167_v45 = vpop.permute.xlu1 %6505 }
 0x625   : > { %v8147_v62 = vpop.f32.mrb[50].mxu1 }
 0x626   : > { %v8149_v57 = vpop.f32.mrb[51].mxu1 }
 0x628   : > { %v8169_v27 = vpop.permute.xlu1 %6510 }
 0x62a   : > { %v1666_v28 = vpop.xlane.xlu0 %1665 }
 0x62b   : > { %6742 = vrcp.f32 %v1666_v28 }
 0x62d   : > { %v8153_v42 = vpop.f32.mrb[52].mxu1 }
 0x62e   : > { %v8155_v0 = vpop.f32.mrb[53].mxu1  ;;  %v1675_v33 = vpop.xlane.xlu0 %1674 }
 0x632   : > { %v1672_v21 = vpop.xlane.xlu0 %1671 }
 0x636   : > { %v1678_v60 = vpop.xlane.xlu0 %1677 }
 0x659   : > { %v1669_v17 = vpop.xlane.xlu1 %1668 }
 0x65a   : > { %6744 = vrcp.f32 %v1669_v17 }
 0x65b   : > { %6746 = vrcp.f32 %v1672_v21 }
 0x65c   : > { %6748 = vrcp.f32 %v1675_v33  ;;  %v6743_v33 = vpop.eup %6742 }
 0x65d   : > { %v1681_v56 = vpop.xlane.xlu1 %1680  ;;  %6750 = vrcp.f32 %v1678_v60 }
 0x65e   : > { %6752 = vrcp.f32 %v1681_v56 }
 0x661   : > { %v8171_v12 = vpop.xlane.xlu1 %1686  ;;  %v8173_v13 = vpop.f32.mrb[54].mxu1 }
 0x662   : > { %v8175_v40 = vpop.f32.mrb[55].mxu1 }
 0x664   : > { %v6745_v44 = vpop.eup %6744 }
 0x665   : > { %v8177_v10 = vpop.xlane.xlu1 %1692  ;;  %v8179_v3 = vpop.f32.mrb[56].mxu1 }
 0x666   : > { %v8181_v41 = vpop.f32.mrb[57].mxu1  ;;  %v2793_v8 = vsel %vm795_vm1, %v8179_v3, -inf }
 0x667   : > { %2794 = vmax.xlane.f32.xlu1 %v2793_v8  ;;  %v2790_v50 = vsel %vm795_vm1, %v8181_v41, -inf }
 0x668   : > { %2791 = vmax.xlane.f32.xlu0 %v2790_v50 }
 0x669   : > { %v8187_v23 = vpop.xlane.xlu1 %1698  ;;  %v8189_v6 = vpop.f32.mrb[58].mxu1 }
 0x66a   : > { %v8191_v32 = vpop.f32.mrb[59].mxu1  ;;  %v2799_v4 = vsel %vm795_vm1, %v8189_v6, -inf }
 0x66b   : > { %2800 = vmax.xlane.f32.xlu1 %v2799_v4  ;;  %v2796_v25 = vsel %vm795_vm1, %v8191_v32, -inf }
 0x66c   : > { %2797 = vmax.xlane.f32.xlu0 %v2796_v25  ;;  %v1684_v25 = vpop.xlane.xlu0 %1683 }
 0x66d   : > { %v8197_v43 = vpop.xlane.xlu1 %1704  ;;  %6754 = vrcp.f32 %v1684_v25 }
 0x671   : > { %v8199_v5 = vpop.xlane.xlu1 %1710 }
 0x675   : > { %v6521_v2 = vpop.permute.xlu1 %6520 }
 0x676   : > { %v6523_v58 = vunpack.i.h.bf16 %v6521_v2  ;;  %v6522_v61 = vunpack.i.l.bf16 %v6521_v2 }
 0x678   : > { %v6022_v7 = vpack.c.bf16 %v6523_v58, %v6522_v61 }
 0x67a   : > { %6023 = vmatprep.subr.bf16.mxu1 %v6022_v7 }
 0x67b   : > { %6025 = vmatpush3.bf16.msra.mxu1 %v6022_v7  ;;  %v1690_v7 = vpop.xlane.xlu0 %1689 }
 0x67c   : > { %6756 = vrcp.f32 %v1690_v7 }
 0x67d   : > { %6758 = vrcp.f32 %v8171_v12 }
 0x67e   : > { %6760 = vrcp.f32 %v8177_v10 }
 0x67f   : > { %v1696_v17 = vpop.xlane.xlu0 %1695 }
 0x680   : > { %6762 = vrcp.f32 %v1696_v17 }
 0x681   : > { %6764 = vrcp.f32 %v8187_v23 }
 0x683   : > { %v1702_v12 = vpop.xlane.xlu0 %1701 }
 0x684   : > { %6766 = vrcp.f32 %v1702_v12 }
 0x685   : > { %6768 = vrcp.f32 %v8197_v43 }
 0x68b   : > { %v8201_v8 = vpop.f32.mrb[60].mxu1 }
 0x68c   : > { %v8203_v50 = vpop.f32.mrb[61].mxu1  ;;  %v2805_v4 = vsel %vm795_vm1, %v8201_v8, -inf }
 0x68d   : > { %2806 = vmax.xlane.f32.xlu1 %v2805_v4  ;;  %v2802_v54 = vsel %vm795_vm1, %v8203_v50, -inf }
 0x68e   : > { %2803 = vmax.xlane.f32.xlu0 %v2802_v54 }
 0x68f   : > { %v8209_v2 = vpop.f32.mrb[62].mxu1 }
 0x690   : > { %v8211_v58 = vpop.f32.mrb[63].mxu1  ;;  %v2811_v61 = vsel %vm795_vm1, %v8209_v2, -inf }
 0x691   : > { %v2808_v39 = vsel %vm795_vm1, %v8211_v58, -inf }
 0x692   : > { %2812 = vmax.xlane.f32.xlu0 %v2811_v61 }
 0x696   : > { %2809 = vmax.xlane.f32.xlu0 %v2808_v39  ;;  %v8217_v4 = vpop.f32.mrb[64].mxu1  ;;  %v6498_v39 = vunpack.i.h.bf16 %v8165_v55  ;;  %v6747_v55 = vpop.eup %6746 }
 0x697   : > { %v8219_v54 = vpop.f32.mrb[65].mxu1  ;;  %v2817_v63 = vsel %vm795_vm1, %v8217_v4, -inf }
 0x698   : > { %2818 = vmax.xlane.f32.xlu1 %v2817_v63  ;;  %v2814_v28 = vsel %vm795_vm1, %v8219_v54, -inf }
 0x69a   : > { %v5404_v21 = vpop.f32.mrb[32].mxu0  ;;  %2815 = vmax.xlane.f32.xlu0 %v2814_v28  ;;  %v8225_v61 = vpop.f32.mrb[66].mxu1 }
 0x69b   : > { %v1834_v11 = vpop.f32.mrb[33].mxu0  ;;  %v8229_v37 = vpop.f32.mrb[67].mxu1  ;;  %v2051_v18 = vmul.f32 %v6745_v44, %v5404_v21  ;;  %v2823_v56 = vsel %vm795_vm1, %v8225_v61, -inf }
 0x69c   : > { %v2050_v63 = vmul.f32 %v6743_v33, %v1834_v11  ;;  %v8240_v11 = vpack.c.bf16 %v6498_v39, %v6497_v51  ;;  %v6749_v44 = vpop.eup %6748  ;;  %v2820_v21 = vsel %vm795_vm1, %v8229_v37, -inf }
 0x69e   : > { %v5407_v60 = vpop.f32.mrb[34].mxu0  ;;  %5446 = vmatprep.mubr.msk.f32.mxu0 %vm8904_vm8, %v2050_v63  ;;  %2824 = vmax.xlane.f32.xlu0 %v2823_v56  ;;  %v8235_v28 = vpop.f32.mrb[68].mxu1  ;;  %vm8917_vm8 = vmmov %vm8853_vm0 }
 0x69f   : > { %v1844_v48 = vpop.f32.mrb[35].mxu0  ;;  %5447 = vmatmul.mubr.msk.f32.vlgmr.msra.gmra.mrb[40].mxu0 %vm8905_vm14, %v2051_v18  ;;  %v8238_v34 = vpop.f32.mrb[69].mxu1  ;;  %v2053_v7 = vmul.f32 %v6749_v44, %v5407_v60  ;;  %v2829_v56 = vsel %vm795_vm1, %v8235_v28, -inf  ;;  %vm8920_vm14 = vmmov %vm8853_vm0 }
 0x6a0   : > { %v2052_v25 = vmul.f32 %v6747_v55, %v1844_v48  ;;  %5953 = vmatpush3.bf16.msra.mxu0 %v8138_v53  ;;  %v6751_v18 = vpop.eup %6750 }
 0x6a1   : > { %6003 = vmatprep.subr.bf16.mxu0 %v8240_v11  ;;  %v6753_v53 = vpop.eup %6752 }
 0x6a2   : > { %v5410_v33 = vpop.f32.mrb[36].mxu0  ;;  %5449 = vmatprep.mubr.msk.f32.mxu0 %vm8906_vm11, %v2052_v25  ;;  %2821 = vmax.xlane.f32.xlu0 %v2820_v21  ;;  %v8248_v51 = vpop.f32.mrb[70].mxu1  ;;  %vm8921_vm11 = vmmov %vm8853_vm0 }
 0x6a3   : > { %v1854_v39 = vpop.f32.mrb[37].mxu0  ;;  %5450 = vmatmul.mubr.msk.f32.gmra.mrb[42].mxu0 %vm8907_vm12, %v2053_v7  ;;  %v8251_v48 = vpop.f32.mrb[71].mxu1  ;;  %v2055_v63 = vmul.f32 %v6753_v53, %v5410_v33  ;;  %v2826_v33 = vsel %vm795_vm1, %v8238_v34, -inf  ;;  %v2835_v43 = vsel %vm795_vm1, %v8248_v51, -inf  ;;  %vm8925_vm12 = vmmov %vm8853_vm0 }
 0x6a4   : > { %v2054_v10 = vmul.f32 %v6751_v18, %v1854_v39  ;;  %v2832_v17 = vsel %vm795_vm1, %v8251_v48, -inf  ;;  %v6755_v60 = vpop.eup %6754  ;;  %v1708_v7 = vpop.xlane.xlu0 %1707 }
 0x6a5   : > { %2833 = vmax.xlane.f32.xlu1 %v2832_v17  ;;  %v6757_v44 = vpop.eup %6756  ;;  %6770 = vrcp.f32 %v1708_v7 }
 0x6a6   : > { %v5413_v55 = vpop.f32.mrb[38].mxu0  ;;  %5452 = vmatprep.mubr.msk.f32.mxu0 %vm8908_vm10, %v2054_v10  ;;  %2830 = vmax.xlane.f32.xlu0 %v2829_v56  ;;  %v6759_v23 = vpop.eup %6758  ;;  %v2058_v39 = vmul.f32 %v6757_v44, %v8142_v47  ;;  %6772 = vrcp.f32 %v8199_v5  ;;  %v6502_v44 = vunpack.i.l.bf16 %v8118_v24  ;;  %vm8926_vm10 = vmmov %vm8853_vm0 }
 0x6a7   : > { %v1864_v25 = vpop.f32.mrb[39].mxu0  ;;  %5453 = vmatmul.mubr.msk.f32.gmra.mrb[44].mxu0 %vm8909_vm13, %v2055_v63  ;;  %v2057_v12 = vmul.f32 %v6759_v23, %v5413_v55  ;;  %v6761_v18 = vpop.eup %6760  ;;  %6774 = vrcp.f32 %v8093_v59  ;;  %v6503_v55 = vunpack.i.h.bf16 %v8118_v24  ;;  %v8924_v23 = vld [vmem:[#allocation44_spill] sm:$0xff]  ;;  %v6507_v24 = vunpack.i.l.bf16 %v8167_v45  ;;  %vm8930_vm13 = vmmov %vm8853_vm0 }
 0x6a8   : > { %v2056_v21 = vmul.f32 %v6755_v60, %v1864_v25  ;;  %v6763_v53 = vpop.eup %6762  ;;  %v2059_v10 = vmul.f32 %v6761_v18, %v8140_v16  ;;  %6776 = vrcp.f32 %v8122_v1  ;;  %v8923_v25 = vld [vmem:[#allocation26_spill] sm:$0xff] }
 0x6a9   : > { %v6765_v17 = vpop.eup %6764  ;;  %v2060_v63 = vmul.f32 %v6763_v53, %v8149_v57  ;;  %6778 = vrcp.f32 %v8098_v26  ;;  %v8929_v53 = vld [vmem:[#allocation46_spill] sm:$0xff] }
 0x6aa   : > { %5455 = vmatprep.mubr.msk.f32.mxu0 %vm8910_vm3, %v2056_v21  ;;  %2827 = vmax.xlane.f32.xlu0 %v2826_v33  ;;  %v6767_v47 = vpop.eup %6766  ;;  %v2061_v59 = vmul.f32 %v6765_v17, %v8147_v62  ;;  %6780 = vrcp.f32 %v8130_v38  ;;  %v8918_v62 = vld [vmem:[#allocation27_spill] sm:$0xff]  ;;  %vm8931_vm3 = vmmov %vm8853_vm0  ;;  %v8933_v17 = vld [vmem:[#allocation45_spill] sm:$0xff] }
 0x6ab   : > { %5456 = vmatmul.mubr.msk.f32.gmra.mrb[46].mxu0 %vm8853_vm0, %v2057_v12  ;;  %v6769_v5 = vpop.eup %6768  ;;  %v2062_v56 = vmul.f32 %v6767_v47, %v8155_v0  ;;  %6782 = vrcp.f32 %v8102_v19  ;;  %v6508_v12 = vunpack.i.h.bf16 %v8167_v45 }
 0x6ac   : > { %5458 = vmatprep.mubr.msk.f32.mxu0 %vm8911_vm2, %v2058_v39  ;;  %v2063_v1 = vmul.f32 %v6769_v5, %v8153_v42  ;;  %6784 = vrcp.f32 %v8145_v49  ;;  %v8919_v42 = vld [vmem:[#allocation34_spill] sm:$0xff]  ;;  %vm8936_vm2 = vmmov %vm8853_vm0 }
 0x6ad   : > { %6786 = vrcp.f32 %v8106_v35  ;;  %v8922_v35 = vld [vmem:[#allocation33_spill] sm:$0xff]  ;;  %v8928_v39 = vld [vmem:[#allocation30_spill] sm:$0xff] }
 0x6ae   : > { %2836 = vmax.xlane.f32.xlu0 %v2835_v43  ;;  %6788 = vrcp.f32 %v8151_v36  ;;  %v6006_v36 = vpack.c.bf16 %v6503_v55, %v6502_v44  ;;  %v8945_v44 = vld [vmem:[#allocation32_spill] sm:$0xff] }
 0x6af   : > { %5459 = vmatmul.mubr.msk.f32.gmra.mrb[48].mxu0 %vm8912_vm15, %v2059_v10  ;;  %v6771_v16 = vpop.eup %6770  ;;  %6790 = vrcp.f32 %v8110_v46  ;;  %v8927_v46 = vld [vmem:[#allocation43_spill] sm:$0xff]  ;;  %v6513_v10 = vunpack.i.h.bf16 %v8169_v27  ;;  %vm8941_vm15 = vmmov %vm8853_vm0 }
 0x6b0   : > { %5461 = vmatprep.mubr.msk.f32.mxu0 %vm8913_vm4, %v2060_v63  ;;  %v6773_v57 = vpop.eup %6772  ;;  %v2064_v60 = vmul.f32 %v6771_v16, %v8175_v40  ;;  %6792 = vrcp.f32 %v8157_v52  ;;  %v6512_v52 = vunpack.i.l.bf16 %v8169_v27  ;;  %v8934_v27 = vld [vmem:[#allocation2_spill] sm:$0xff]  ;;  %vm8942_vm4 = vmmov %vm8853_vm0 }
 0x6b1   : > { %v6775_v26 = vpop.eup %6774  ;;  %v2065_v38 = vmul.f32 %v6773_v57, %v8173_v13  ;;  %6794 = vrcp.f32 %v8112_v15  ;;  %v8932_v15 = vld [vmem:[#allocation25_spill] sm:$0xff]  ;;  %v8938_v57 = vld [vmem:[#allocation47_spill] sm:$0xff] }
 0x6b2   : > { %v6777_v19 = vpop.eup %6776  ;;  %v1214_v0 = vmul.f32 %v6775_v26, %v8919_v42  ;;  %6796 = vrcp.f32 %v8159_v29  ;;  %v452_v29 = vld [vmem:[%s8730_s2 + $0x20] sm:$0xff]  ;;  %v6014_v16 = vpack.c.bf16 %v6513_v10, %v6512_v52  ;;  %v8961_v10 = vld [vmem:[#allocation4_spill] sm:$0xff]  ;;  %v8962_v52 = vld [vmem:[#allocation41_spill] sm:$0xff] }
 0x6b3   : > { %5462 = vmatmul.mubr.msk.f32.gmra.mrb[50].mxu0 %vm8914_vm6, %v2061_v59  ;;  %v6779_v40 = vpop.eup %6778  ;;  %v1215_v49 = vmul.f32 %v6777_v19, %v8922_v35  ;;  %6798 = vrcp.f32 %v8114_v9  ;;  %v8935_v59 = vld [vmem:[#allocation48_spill] sm:$0xff]  ;;  %v453_v9 = vld [vmem:[%s8730_s2 + $0x28] sm:$0xff]  ;;  %v8946_v35 = vld [vmem:[#allocation38_spill] sm:$0xff] }
 0x6b4   : > { %5464 = vmatprep.mubr.msk.f32.mxu0 %vm8915_vm7, %v2062_v56  ;;  %v6781_v13 = vpop.eup %6780  ;;  %v1216_v7 = vmul.f32 %v6779_v40, %v8924_v23  ;;  %6800 = vrcp.f32 %v8161_v20  ;;  %v6034_v26 = vpack.c.bf16 %v453_v9, %v452_v29  ;;  %v8939_v19 = vld [vmem:[#allocation8_spill] sm:$0xff]  ;;  %v8944_v20 = vld [vmem:[#allocation35_spill] sm:$0xff]  ;;  %vm8947_vm6 = vmmov %vm8853_vm0 }
 0x6b5   : > { %v6783_v21 = vpop.eup %6782  ;;  %v1217_v33 = vmul.f32 %v6781_v13, %v8927_v46  ;;  %6802 = vrcp.f32 %v8116_v30  ;;  %v8943_v30 = vld [vmem:[#allocation29_spill] sm:$0xff]  ;;  %vm8948_vm7 = vmmov %vm8853_vm0  ;;  %v8955_v46 = vld [vmem:[#allocation28_spill] sm:$0xff] }
 0x6b6   : > { %6525 = vrot.lane.b32.xlu1 %v7130_v14, %s6947_s17  ;;  %v6785_v18 = vpop.eup %6784  ;;  %v1218_v45 = vmul.f32 %v6783_v21, %v8929_v53  ;;  %6804 = vrcp.f32 %v8163_v22  ;;  %v8949_v22 = vld [vmem:[#allocation31_spill] sm:$0xff]  ;;  %v8951_v21 = vld [vmem:[#allocation16_spill] sm:$0xff]  ;;  %v8957_v53 = vld [vmem:[#allocation21_spill] sm:$0xff] }
 0x6b7   : > { %5465 = vmatmul.mubr.msk.f32.gmra.mrb[52].mxu0 %vm8916_vm9, %v2063_v1  ;;  %v6787_v43 = vpop.eup %6786  ;;  %v1219_v63 = vmul.f32 %v6785_v18, %v8933_v17  ;;  %v8937_v1 = vld [vmem:[#allocation24_spill] sm:$0xff]  ;;  %vm8953_vm9 = vmmov %vm8853_vm0  ;;  %v8964_v17 = vld [vmem:[#allocation10_spill] sm:$0xff] }
 0x6b8   : > { %5467 = vmatprep.mubr.msk.f32.mxu0 %vm8917_vm8, %v2064_v60  ;;  %v6789_v47 = vpop.eup %6788  ;;  %v1220_v5 = vmul.f32 %v6787_v43, %v8935_v59  ;;  %vm8954_vm8 = vmmov %vm8853_vm0 }
 0x6b9   : > { %v6791_v56 = vpop.eup %6790  ;;  %v1221_v60 = vmul.f32 %v6789_v47, %v8938_v57 }
 0x6ba   : > { %6540 = vrot.lane.b32.xlu1 %v8918_v62, %s6948_s26  ;;  %v8940_v62 = vld [vmem:[#allocation36_spill] sm:$0xff] }
 0x6bb   : > { %5468 = vmatmul.mubr.msk.f32.gmra.mrb[54].mxu0 %vm8920_vm14, %v2065_v38  ;;  %v6793_v38 = vpop.eup %6792  ;;  %v1222_v42 = vmul.f32 %v6791_v56, %v8940_v62  ;;  %vm8959_vm14 = vmmov %vm8853_vm0 }
 0x6bc   : > { %5474 = vmatprep.mubr.msk.f32.mxu0 %vm8921_vm11, %v1214_v0  ;;  %v6795_v0 = vpop.eup %6794  ;;  %v1223_v40 = vmul.f32 %v6793_v38, %v8944_v20  ;;  %vm8960_vm11 = vmmov %vm8853_vm0 }
 0x6bd   : > { %v6797_v55 = vpop.eup %6796 }
 0x6be   : > { %6550 = vrot.lane.b32.xlu1 %v8923_v25, %s6948_s26  ;;  %v6799_v13 = vpop.eup %6798  ;;  %v8950_v25 = vld [vmem:[#allocation37_spill] sm:$0xff] }
 0x6bf   : > { %5475 = vmatmul.mubr.msk.f32.vlgmr.msra.gmra.mrb[40].mxu0 %vm8925_vm12, %v1215_v49  ;;  %v1224_v49 = vmul.f32 %v6795_v0, %v8946_v35  ;;  %v1225_v23 = vmul.f32 %v6797_v55, %v8950_v25  ;;  %vm8963_vm12 = vmmov %vm8853_vm0  ;;  %v8966_v55 = vld [vmem:[#allocation19_spill] sm:$0xff] }
 0x6c0   : > { %6005 = vmatpush3.bf16.msra.mxu0 %v8240_v11  ;;  %5477 = vmatprep.mubr.msk.f32.mxu0 %vm8926_vm10, %v1216_v7  ;;  %v6010_v11 = vpack.c.bf16 %v6508_v12, %v6507_v24  ;;  %v6801_v7 = vpop.eup %6800  ;;  %v8952_v12 = vld [vmem:[#allocation40_spill] sm:$0xff]  ;;  %vm8967_vm10 = vmmov %vm8853_vm0 }
 0x6c1   : > { %6007 = vmatprep.subr.bf16.mxu0 %v6006_v36  ;;  %v1226_v24 = vmul.f32 %v6799_v13, %v8952_v12 }
 0x6c2   : > { %6560 = vrot.lane.b32.xlu1 %v8928_v39, %s6948_s26 }
 0x6c3   : > { %5478 = vmatmul.mubr.msk.f32.gmra.mrb[42].mxu0 %vm8930_vm13, %v1217_v33  ;;  %v8956_v33 = vld [vmem:[#allocation39_spill] sm:$0xff]  ;;  %vm8976_vm13 = vmmov %vm8853_vm0 }
 0x6c4   : > { %6009 = vmatpush3.bf16.msra.mxu0 %v6006_v36  ;;  %5480 = vmatprep.mubr.msk.f32.mxu0 %vm8931_vm3, %v1218_v45  ;;  %v6803_v36 = vpop.eup %6802  ;;  %v1227_v18 = vmul.f32 %v6801_v7, %v8956_v33  ;;  %v8958_v45 = vld [vmem:[#allocation42_spill] sm:$0xff]  ;;  %vm8978_vm3 = vmmov %vm8853_vm0 }
 0x6c5   : > { %6011 = vmatprep.subr.bf16.mxu0 %v6010_v11  ;;  %6530 = vrot.lane.b32.xlu0 %v8932_v15, %s6947_s17  ;;  %v6805_v39 = vpop.eup %6804  ;;  %v1228_v43 = vmul.f32 %v6803_v36, %v8958_v45  ;;  %s8691_s17 = scalar_lea.vmem %s8732_s4, %s4888_s7 }
 0x6c6   : > { %3481 = vrot.lane.b32.xlu1 %v8934_v27, %s6949_s27 }
 0x6c7   : > { %5481 = vmatmul.mubr.msk.f32.gmra.mrb[44].mxu0 %vm8853_vm0, %v1219_v63  ;;  %v8965_v63 = vld [vmem:[#allocation14_spill] sm:$0xff] }
 0x6c8   : > { %6013 = vmatpush3.bf16.msra.mxu0 %v6010_v11  ;;  %5483 = vmatprep.mubr.msk.f32.mxu0 %vm8936_vm2, %v1220_v5  ;;  %v1229_v11 = vmul.f32 %v6805_v39, %v8962_v52  ;;  %vm8981_vm2 = vmmov %vm8853_vm0 }
 0x6c9   : > { %6015 = vmatprep.subr.bf16.mxu0 %v6014_v16  ;;  %6535 = vrot.lane.b32.xlu0 %v8937_v1, %s6948_s26 }
 0x6ca   : > { %3485 = vrot.lane.b32.xlu1 %v8939_v19, %s6949_s27 }
 0x6cb   : > { %5484 = vmatmul.mubr.msk.f32.gmra.mrb[46].mxu0 %vm8941_vm15, %v1221_v60  ;;  %vm8983_vm15 = vmmov %vm8853_vm0 }
 0x6cc   : > { %6017 = vmatpush3.bf16.msra.mxu0 %v6014_v16  ;;  %5486 = vmatprep.mubr.msk.f32.mxu0 %vm8942_vm4, %v1222_v42  ;;  %vm8986_vm4 = vmmov %vm8853_vm0 }
 0x6cd   : > { %6545 = vrot.lane.b32.xlu0 %v8943_v30, %s6948_s26  ;;  %6035 = vmatprep.subr.bf16.mxu0 %v6034_v26 }
 0x6ce   : > { %6570 = vrot.lane.b32.xlu1 %v8945_v44, %s6948_s26 }
 0x6cf   : > { %5487 = vmatmul.mubr.msk.f32.gmra.mrb[48].mxu0 %vm8947_vm6, %v1223_v40  ;;  %vm8987_vm6 = vmmov %vm8853_vm0 }
 0x6d0   : > { %5489 = vmatprep.mubr.msk.f32.mxu0 %vm8948_vm7, %v1224_v49  ;;  %vm8988_vm7 = vmmov %vm8853_vm0 }
 0x6d1   : > { %6555 = vrot.lane.b32.xlu0 %v8949_v22, %s6948_s26 }
 0x6d2   : > { %3491 = vrot.lane.b32.xlu1 %v8951_v21, %s6949_s27 }
 0x6d3   : > { %5490 = vmatmul.mubr.msk.f32.gmra.mrb[50].mxu0 %vm8953_vm9, %v1225_v23  ;;  %vm8989_vm9 = vmmov %vm8853_vm0 }
 0x6d4   : > { %5492 = vmatprep.mubr.msk.f32.mxu0 %vm8954_vm8, %v1226_v24  ;;  %vm8990_vm8 = vmmov %vm8853_vm0 }
 0x6d5   : > { %6565 = vrot.lane.b32.xlu0 %v8955_v46, %s6948_s26 }
 0x6d6   : > { %3495 = vrot.lane.b32.xlu1 %v8957_v53, %s6949_s27 }
 0x6d7   : > { %5493 = vmatmul.mubr.msk.f32.gmra.mrb[52].mxu0 %vm8959_vm14, %v1227_v18  ;;  %vm8991_vm14 = vmmov %vm8853_vm0 }
 0x6d8   : > { %5495 = vmatprep.mubr.msk.f32.mxu0 %vm8960_vm11, %v1228_v43  ;;  %vm8992_vm11 = vmmov %vm8853_vm0 }
 0x6d9   : > { %3483 = vrot.lane.b32.xlu0 %v8961_v10, %s6949_s27 }
 0x6db   : > { %5496 = vmatmul.mubr.msk.f32.gmra.mrb[54].mxu0 %vm8963_vm12, %v1229_v11  ;;  %vm8994_vm12 = vmmov %vm8853_vm0 }
 0x6dd   : > { %3487 = vrot.lane.b32.xlu0 %v8964_v17, %s6949_s27 }
 0x6e1   : > { %3489 = vrot.lane.b32.xlu0 %v8965_v63, %s6949_s27 }
 0x6f4   : > { %v2795_v47 = vpop.xlane.xlu1 %2794 }
 0x6f5   : > { %v2839_v27 = vsub.f32 %v8179_v3, %v2795_v47  ;;  %v2792_v59 = vpop.xlane.xlu0 %2791 }
 0x6f6   : > { %v2838_v5 = vsub.f32 %v8181_v41, %v2792_v59 }
 0x6f7   : > { %v2856_v29 = vmul.f32 1.442695, %v2839_v27 }
 0x6f8   : > { %v2854_v9 = vmul.f32 1.442695, %v2838_v5  ;;  %v2801_v56 = vpop.xlane.xlu1 %2800 }
 0x6f9   : > { %6806 = vpow2.f32 %v2856_v29  ;;  %v2841_v16 = vsub.f32 %v8189_v6, %v2801_v56  ;;  %v2798_v1 = vpop.xlane.xlu0 %2797 }
 0x6fa   : > { %6808 = vpow2.f32 %v2854_v9  ;;  %v2840_v57 = vsub.f32 %v8191_v32, %v2798_v1 }
 0x6fb   : > { %v2860_v60 = vmul.f32 1.442695, %v2841_v16 }
 0x6fc   : > { %v2858_v38 = vmul.f32 1.442695, %v2840_v57 }
 0x6fd   : > { %6810 = vpow2.f32 %v2860_v60 }
 0x6fe   : > { %6812 = vpow2.f32 %v2858_v38 }
 0x703   : > { %v6807_v19 = vpop.eup %6806 }
 0x704   : > { %v6809_v62 = vpop.eup %6808  ;;  %v2889_v3 = vsel %vm795_vm1, %v6807_v19, 0.0 }
 0x705   : > { %5570 = vmatprep.mubr.msk.f32.mxu0 %vm795_vm1, %v6809_v62  ;;  %2890 = vadd.xlane.f32.xlu0 %v2889_v3  ;;  %v2886_v41 = vsel %vm795_vm1, %v6809_v62, 0.0 }
 0x706   : > { %5571 = vmatmul.mubr.msk.f32.vlgmr.msra.gmra.mrb[56].mxu0 %vm795_vm1, %v6807_v19  ;;  %2887 = vadd.xlane.f32.xlu1 %v2886_v41 }
 0x707   : > { %v6811_v6 = vpop.eup %6810  ;;  %6037 = vmatpush3.bf16.msra.mxu0 %v6034_v26 }
 0x708   : > { %v6813_v42 = vpop.eup %6812  ;;  %v2895_v32 = vsel %vm795_vm1, %v6811_v6, 0.0 }
 0x709   : > { %5573 = vmatprep.mubr.msk.f32.mxu0 %vm795_vm1, %v6813_v42  ;;  %v2892_v0 = vsel %vm795_vm1, %v6813_v42, 0.0 }
 0x70a   : > { %5574 = vmatmul.mubr.msk.f32.gmra.mrb[58].mxu0 %vm795_vm1, %v6811_v6  ;;  %2896 = vadd.xlane.f32.xlu1 %v2895_v32 }
 0x70e   : > { %2893 = vadd.xlane.f32.xlu1 %v2892_v0 }
 0x71a   : > { %v2807_v30 = vpop.xlane.xlu1 %2806 }
 0x71b   : > { %v2843_v20 = vsub.f32 %v8201_v8, %v2807_v30  ;;  %v2804_v40 = vpop.xlane.xlu0 %2803  ;;  %3493 = vrot.lane.b32.xlu0 %v8966_v55, %s6949_s27 }
 0x71c   : > { %v2842_v26 = vsub.f32 %v8203_v50, %v2804_v40 }
 0x71d   : > { %v2864_v44 = vmul.f32 1.442695, %v2843_v20 }
 0x71e   : > { %v2862_v35 = vmul.f32 1.442695, %v2842_v26 }
 0x71f   : > { %6814 = vpow2.f32 %v2864_v44  ;;  %v2813_v49 = vpop.xlane.xlu0 %2812 }
 0x720   : > { %6816 = vpow2.f32 %v2862_v35  ;;  %v2845_v13 = vsub.f32 %v8209_v2, %v2813_v49 }
 0x722   : > { %v2868_v22 = vmul.f32 1.442695, %v2845_v13 }
 0x723   : > { %v2810_v25 = vpop.xlane.xlu0 %2809 }
 0x724   : > { %v2844_v23 = vsub.f32 %v8211_v58, %v2810_v25  ;;  %6818 = vpow2.f32 %v2868_v22 }
 0x725   : > { %v2819_v7 = vpop.xlane.xlu1 %2818 }
 0x726   : > { %v2866_v8 = vmul.f32 1.442695, %v2844_v23  ;;  %v2847_v21 = vsub.f32 %v8217_v4, %v2819_v7 }
 0x727   : > { %v2816_v12 = vpop.xlane.xlu0 %2815 }
 0x728   : > { %6820 = vpow2.f32 %v2866_v8  ;;  %v2846_v50 = vsub.f32 %v8219_v54, %v2816_v12  ;;  %v2872_v36 = vmul.f32 1.442695, %v2847_v21 }
 0x729   : > { %v6815_v24 = vpop.eup %6814 }
 0x72a   : > { %v6817_v46 = vpop.eup %6816  ;;  %v2870_v33 = vmul.f32 1.442695, %v2846_v50  ;;  %v2901_v18 = vsel %vm795_vm1, %v6815_v24, 0.0 }
 0x72b   : > { %5576 = vmatprep.mubr.msk.f32.mxu0 %vm795_vm1, %v6817_v46  ;;  %v2825_v2 = vpop.xlane.xlu0 %2824  ;;  %2902 = vadd.xlane.f32.xlu1 %v2901_v18  ;;  %v2898_v4 = vsel %vm795_vm1, %v6817_v46, 0.0 }
 0x72c   : > { %6822 = vpow2.f32 %v2870_v33  ;;  %5577 = vmatmul.mubr.msk.f32.gmra.mrb[60].mxu0 %vm795_vm1, %v6815_v24  ;;  %v2849_v58 = vsub.f32 %v8225_v61, %v2825_v2 }
 0x72d   : > { %6824 = vpow2.f32 %v2872_v36 }
 0x72e   : > { %v6819_v39 = vpop.eup %6818  ;;  %v2876_v45 = vmul.f32 1.442695, %v2849_v58 }
 0x72f   : > { %v2822_v54 = vpop.xlane.xlu0 %2821  ;;  %2899 = vadd.xlane.f32.xlu1 %v2898_v4  ;;  %v2907_v11 = vsel %vm795_vm1, %v6819_v39, 0.0 }
 0x730   : > { %v2848_v53 = vsub.f32 %v8229_v37, %v2822_v54 }
 0x732   : > { %v6821_v43 = vpop.eup %6820  ;;  %v2874_v10 = vmul.f32 1.442695, %v2848_v53  ;;  %v2834_v52 = vpop.xlane.xlu1 %2833 }
 0x733   : > { %5579 = vmatprep.mubr.msk.f32.mxu0 %vm795_vm1, %v6821_v43  ;;  %v2831_v17 = vpop.xlane.xlu0 %2830  ;;  %2908 = vadd.xlane.f32.xlu1 %v2907_v11  ;;  %v2852_v47 = vsub.f32 %v8251_v48, %v2834_v52  ;;  %v2904_v59 = vsel %vm795_vm1, %v6821_v43, 0.0  ;;  %v8969_v11 = vld [vmem:[#allocation11_spill] sm:$0xff] }
 0x734   : > { %6826 = vpow2.f32 %v2874_v10  ;;  %v2851_v61 = vsub.f32 %v8235_v28, %v2831_v17  ;;  %5580 = vmatmul.mubr.msk.f32.gmra.mrb[62].mxu0 %vm795_vm1, %v6819_v39  ;;  %v8968_v10 = vld [vmem:[#allocation5_spill] sm:$0xff]  ;;  %v8970_v17 = vld [vmem:[#allocation3_spill] sm:$0xff] }
 0x735   : > { %6828 = vpow2.f32 %v2876_v45  ;;  %v2882_v1 = vmul.f32 1.442695, %v2852_v47  ;;  %v8972_v47 = vld [vmem:[#allocation9_spill] sm:$0xff] }
 0x736   : > { %v6823_v63 = vpop.eup %6822  ;;  %v2880_v37 = vmul.f32 1.442695, %v2851_v61  ;;  %v6526_v27 = vpop.permute.xlu1 %6525 }
 0x737   : > { %v6825_v5 = vpop.eup %6824  ;;  %v6528_v29 = vunpack.i.h.bf16 %v6526_v27  ;;  %v6527_v9 = vunpack.i.l.bf16 %v6526_v27  ;;  %5598 = vmatprep.mubr.msk.f32.mxu1 %vm795_vm1, %v6823_v63  ;;  %v2828_v56 = vpop.xlane.xlu0 %2827  ;;  %2905 = vadd.xlane.f32.xlu1 %v2904_v59  ;;  %v2910_v6 = vsel %vm795_vm1, %v6823_v63, 0.0  ;;  %v8971_v63 = vld [vmem:[#allocation17_spill] sm:$0xff]  ;;  %v8973_v27 = vld [vmem:[#allocation22_spill] sm:$0xff]  ;;  %v8974_v59 = vld [vmem:[#allocation15_spill] sm:$0xff] }
 0x738   : > { %6830 = vpow2.f32 %v2880_v37  ;;  %v2850_v28 = vsub.f32 %v8238_v34, %v2828_v56  ;;  %v2913_v48 = vsel %vm795_vm1, %v6825_v5, 0.0  ;;  %v8977_v56 = vld [vmem:[#allocation20_spill] sm:$0xff] }
 0x739   : > { %v6026_v16 = vpack.c.bf16 %v6528_v29, %v6527_v9  ;;  %v8975_v29 = vld [vmem:[#allocation6_spill] sm:$0xff] }
 0x73a   : > { %v2878_v57 = vmul.f32 1.442695, %v2850_v28  ;;  %v6541_v60 = vpop.permute.xlu1 %6540 }
 0x73b   : > { %v2837_v38 = vpop.xlane.xlu0 %2836  ;;  %2914 = vadd.xlane.f32.xlu1 %v2913_v48  ;;  %6027 = vmatprep.subr.bf16.mxu1 %v6026_v16  ;;  %v6543_v21 = vunpack.i.h.bf16 %v6541_v60  ;;  %v6542_v12 = vunpack.i.l.bf16 %v6541_v60  ;;  %v8982_v60 = vld [vmem:[#allocation23_spill] sm:$0xff] }
 0x73c   : > { %6832 = vpow2.f32 %v2878_v57  ;;  %v2853_v19 = vsub.f32 %v8248_v51, %v2837_v38  ;;  %6029 = vmatpush3.bf16.msra.mxu1 %v6026_v16  ;;  %v8979_v16 = vld [vmem:[#allocation18_spill] sm:$0xff]  ;;  %v8984_v48 = vld [vmem:[#allocation7_spill] sm:$0xff]  ;;  %v8985_v38 = vld [vmem:[#allocation13_spill] sm:$0xff] }
 0x73d   : > { %6834 = vpow2.f32 %v2882_v1  ;;  %v6044_v46 = vpack.c.bf16 %v6543_v21, %v6542_v12  ;;  %v8980_v1 = vld [vmem:[#allocation12_spill] sm:$0xff] }
 0x73e   : > { %v6827_v62 = vpop.eup %6826  ;;  %v2884_v3 = vmul.f32 1.442695, %v2853_v19  ;;  %v6551_v41 = vpop.permute.xlu1 %6550 }
 0x73f   : > { %v6829_v34 = vpop.eup %6828  ;;  %v6553_v42 = vunpack.i.h.bf16 %v6551_v41  ;;  %v6552_v32 = vunpack.i.l.bf16 %v6551_v41  ;;  %v6531_v0 = vpop.permute.xlu0 %6530  ;;  %2911 = vadd.xlane.f32.xlu1 %v2910_v6  ;;  %v2916_v30 = vsel %vm795_vm1, %v6827_v62, 0.0 }
 0x740   : > { %6836 = vpow2.f32 %v2884_v3  ;;  %v6533_v20 = vunpack.i.h.bf16 %v6531_v0  ;;  %v6532_v40 = vunpack.i.l.bf16 %v6531_v0  ;;  %2917 = vadd.xlane.f32.xlu0 %v2916_v30  ;;  %v2919_v44 = vsel %vm795_vm1, %v6829_v34, 0.0 }
 0x741   : > { %v8417_v55 = vpack.c.bf16 %v6553_v42, %v6552_v32 }
 0x742   : > { %v6831_v51 = vpop.eup %6830  ;;  %v6030_v26 = vpack.c.bf16 %v6533_v20, %v6532_v40  ;;  %v8435_v18 = vpop.permute.xlu1 %6560 }
 0x743   : > { %v6536_v35 = vpop.permute.xlu0 %6535  ;;  %2920 = vadd.xlane.f32.xlu1 %v2919_v44  ;;  %6064 = vmatprep.subr.msk.bf16.mxu0 %vm7394_vm5, %v8417_v55  ;;  %v2925_v49 = vsel %vm795_vm1, %v6831_v51, 0.0 }
 0x744   : > { %v6538_v13 = vunpack.i.h.bf16 %v6536_v35  ;;  %v6537_v22 = vunpack.i.l.bf16 %v6536_v35  ;;  %2926 = vadd.xlane.f32.xlu0 %v2925_v49  ;;  %6031 = vmatprep.subr.bf16.mxu1 %v6030_v26 }
 0x745   : > { %6033 = vmatpush3.bf16.msra.mxu1 %v6030_v26 }
 0x746   : > { %v6833_v25 = vpop.eup %6832  ;;  %v6038_v23 = vpack.c.bf16 %v6538_v13, %v6537_v22  ;;  %v3482_v4 = vpop.permute.xlu1 %3481 }
 0x747   : > { %v2922_v7 = vsel %vm795_vm1, %v6833_v25, 0.0  ;;  %v6835_v8 = vpop.eup %6834  ;;  %v6546_v33 = vpop.permute.xlu0 %6545 }
 0x748   : > { %2923 = vadd.xlane.f32.xlu0 %v2922_v7  ;;  %5599 = vmatmul.mubr.msk.f32.vlgmr.msra.gmra.mrb[72].mxu1 %vm795_vm1, %v6825_v5  ;;  %v2928_v36 = vsel %vm795_vm1, %v6835_v8, 0.0  ;;  %v6548_v2 = vunpack.i.h.bf16 %v6546_v33  ;;  %v6547_v58 = vunpack.i.l.bf16 %v6546_v33 }
 0x749   : > { %6040 = vmatprep.subr.msk.bf16.mxu1 %vm7394_vm5, %v6038_v23  ;;  %5601 = vmatprep.mubr.msk.f32.mxu1 %vm795_vm1, %v6827_v62 }
 0x74a   : > { %v6837_v50 = vpop.eup %6836  ;;  %v6050_v39 = vpack.c.bf16 %v6548_v2, %v6547_v58  ;;  %v3486_v37 = vpop.permute.xlu1 %3485 }
 0x74b   : > { %v2931_v24 = vsel %vm795_vm1, %v6837_v50, 0.0  ;;  %v6556_v54 = vpop.permute.xlu0 %6555 }
 0x74c   : > { %2932 = vadd.xlane.f32.xlu1 %v2931_v24  ;;  %2929 = vadd.xlane.f32.xlu0 %v2928_v36  ;;  %v6558_v53 = vunpack.i.h.bf16 %v6556_v54  ;;  %v6557_v45 = vunpack.i.l.bf16 %v6556_v54 }
 0x74d   : > { %5602 = vmatmul.mubr.msk.f32.gmra.mrb[74].mxu1 %vm795_vm1, %v6829_v34 }
 0x74e   : > { %5604 = vmatprep.mubr.msk.f32.mxu1 %vm795_vm1, %v6833_v25  ;;  %6043 = vmatpush3.bf16.xpose.msk.msra.mxu1 %vm7394_vm5, %v6038_v23  ;;  %v6056_v43 = vpack.c.bf16 %v6558_v53, %v6557_v45  ;;  %v8472_v9 = vpop.permute.xlu1 %6570  ;;  %v6563_v25 = vunpack.i.h.bf16 %v8435_v18  ;;  %v6562_v23 = vunpack.i.l.bf16 %v8435_v18 }
 0x74f   : > { %6046 = vmatprep.subr.msk.bf16.mxu1 %vm7394_vm5, %v6044_v46  ;;  %v8451_v52 = vpop.permute.xlu0 %6565 }
 0x750   : > { %v6068_v33 = vpack.c.bf16 %v6563_v25, %v6562_v23  ;;  %v6568_v53 = vunpack.i.h.bf16 %v8451_v52  ;;  %v6567_v45 = vunpack.i.l.bf16 %v8451_v52  ;;  %v6572_v52 = vunpack.i.l.bf16 %v8472_v9 }
 0x751   : > { %5605 = vmatmul.mubr.msk.f32.gmra.mrb[76].mxu1 %vm795_vm1, %v6831_v51 }
 0x752   : > { %5607 = vmatprep.mubr.msk.f32.mxu1 %vm795_vm1, %v6835_v8  ;;  %v3492_v57 = vpop.permute.xlu1 %3491 }
 0x753   : > { %v3484_v61 = vpop.permute.xlu0 %3483 }
 0x755   : > { %5608 = vmatmul.mubr.msk.f32.gmra.mrb[78].mxu1 %vm795_vm1, %v6837_v50 }
 0x756   : > { %5654 = vmatprep.mubr.msk.f32.mxu1 %vm8967_vm10, %v3482_v4  ;;  %6049 = vmatpush3.bf16.xpose.msk.msra.mxu1 %vm7394_vm5, %v6044_v46  ;;  %v3496_v3 = vpop.permute.xlu1 %3495  ;;  %vm8995_vm10 = vmmov %vm8853_vm0 }
 0x757   : > { %6052 = vmatprep.subr.msk.bf16.mxu1 %vm7394_vm5, %v6050_v39  ;;  %v3488_v5 = vpop.permute.xlu0 %3487 }
 0x75b   : > { %v3490_v28 = vpop.permute.xlu0 %3489 }
 0x75d   : > { %3652 = vrot.lane.b32.xlu1 %v8968_v10, %s6949_s27 }
 0x75e   : > { %6055 = vmatpush3.bf16.xpose.msk.msra.mxu1 %vm7394_vm5, %v6050_v39 }
 0x75f   : > { %6058 = vmatprep.subr.msk.bf16.mxu1 %vm7394_vm5, %v6056_v43 }
 0x761   : > { %3656 = vrot.lane.b32.xlu1 %v8969_v11, %s6949_s27  ;;  %v6074_v11 = vpack.c.bf16 %v6568_v53, %v6567_v45 }
 0x762   : > { %3650 = vrot.lane.b32.xlu0 %v8970_v17, %s6949_s27 }
 0x765   : > { %3660 = vrot.lane.b32.xlu1 %v8971_v63, %s6949_s27 }
 0x766   : > { %3654 = vrot.lane.b32.xlu0 %v8972_v47, %s6949_s27  ;;  %6061 = vmatpush3.bf16.xpose.msk.msra.mxu1 %vm7394_vm5, %v6056_v43 }
 0x769   : > { %3664 = vrot.lane.b32.xlu1 %v8973_v27, %s6949_s27 }
 0x76a   : > { %3658 = vrot.lane.b32.xlu0 %v8974_v59, %s6949_s27 }
 0x76d   : > { %6575 = vrot.lane.b32.xlu1 %v8975_v29, %s6949_s27  ;;  %5655 = vmatmul.mubr.msk.f32.vlgmr.msra.gmra.mrb[80].mxu1 %vm8976_vm13, %v3484_v61  ;;  %v6573_v61 = vunpack.i.h.bf16 %v8472_v9  ;;  %vm8996_vm13 = vmmov %vm8853_vm0 }
 0x76e   : > { %3662 = vrot.lane.b32.xlu0 %v8977_v56, %s6949_s27  ;;  %5657 = vmatprep.mubr.msk.f32.mxu1 %vm8978_vm3, %v3486_v37  ;;  %vm8997_vm3 = vmmov %vm8853_vm0 }
 0x76f   : > { %v6080_v37 = vpack.c.bf16 %v6573_v61, %v6572_v52 }
 0x771   : > { %6585 = vrot.lane.b32.xlu1 %v8979_v16, %s6949_s27  ;;  %5658 = vmatmul.mubr.msk.f32.gmra.mrb[82].mxu1 %vm8853_vm0, %v3488_v5 }
 0x772   : > { %6580 = vrot.lane.b32.xlu0 %v8980_v1, %s6949_s27  ;;  %5660 = vmatprep.mubr.msk.f32.mxu1 %vm8981_vm2, %v3490_v28  ;;  %vm8998_vm2 = vmmov %vm8853_vm0 }
 0x775   : > { %6590 = vrot.lane.b32.xlu1 %v8982_v60, %s6949_s27  ;;  %5661 = vmatmul.mubr.msk.f32.gmra.mrb[84].mxu1 %vm8983_vm15, %v3492_v57  ;;  %vm8999_vm15 = vmmov %vm8853_vm0 }
 0x776   : > { %6595 = vrot.lane.b32.xlu0 %v8984_v48, %s6949_s27 }
 0x779   : > { %6600 = vrot.lane.b32.xlu1 %v8985_v38, %s6949_s27 }
 0x792   : > { %v2891_v19 = vpop.xlane.xlu0 %2890 }
 0x793   : > { %v2888_v41 = vpop.xlane.xlu1 %2887 }
 0x794   : > { %6838 = vrcp.f32 %v2888_v41 }
 0x795   : > { %6840 = vrcp.f32 %v2891_v19 }
 0x796   : > { %v3494_v62 = vpop.permute.xlu0 %3493 }
 0x797   : > { %5663 = vmatprep.mubr.msk.f32.mxu1 %vm8986_vm4, %v3494_v62  ;;  %v2897_v6 = vpop.xlane.xlu1 %2896  ;;  %vm9000_vm4 = vmmov %vm8853_vm0 }
 0x798   : > { %5664 = vmatmul.mubr.msk.f32.gmra.mrb[86].mxu1 %vm8987_vm6, %v3496_v3  ;;  %vm9001_vm6 = vmmov %vm8853_vm0 }
 0x79b   : > { %v2894_v34 = vpop.xlane.xlu1 %2893 }
 0x79c   : > { %6842 = vrcp.f32 %v2894_v34 }
 0x79d   : > { %6844 = vrcp.f32 %v2897_v6 }
 0x79e   : > { %v6839_v22 = vpop.eup %6838 }
 0x79f   : > { %v6841_v21 = vpop.eup %6840 }
 0x7a6   : > { %v6843_v46 = vpop.eup %6842 }
 0x7a7   : > { %v6845_v4 = vpop.eup %6844 }
 0x7b8   : > { %v8492_v42 = vpop.xlane.xlu1 %2902 }
 0x7bc   : > { %v8494_v32 = vpop.xlane.xlu1 %2899 }
 0x7bd   : > { %6846 = vrcp.f32 %v8494_v32 }
 0x7be   : > { %6848 = vrcp.f32 %v8492_v42 }
 0x7c0   : > { %v8496_v0 = vpop.xlane.xlu1 %2908 }
 0x7c4   : > { %v8498_v30 = vpop.xlane.xlu1 %2905 }
 0x7c5   : > { %6850 = vrcp.f32 %v8498_v30 }
 0x7c6   : > { %6852 = vrcp.f32 %v8496_v0 }
 0x7c8   : > { %v8500_v20 = vpop.xlane.xlu1 %2914 }
 0x7c9   : > { %6854 = vrcp.f32 %v8500_v20 }
 0x7cc   : > { %v8504_v51 = vpop.xlane.xlu1 %2911 }
 0x7cd   : > { %v8502_v40 = vpop.xlane.xlu0 %2917  ;;  %6856 = vrcp.f32 %v8504_v51 }
 0x7d0   : > { %v8510_v35 = vpop.xlane.xlu1 %2920 }
 0x7d1   : > { %v8506_v26 = vpop.xlane.xlu0 %2926  ;;  %6858 = vrcp.f32 %v8510_v35 }
 0x7d2   : > { %6860 = vrcp.f32 %v8502_v40 }
 0x7d3   : > { %6862 = vrcp.f32 %v8506_v26 }
 0x7d5   : > { %v8508_v44 = vpop.xlane.xlu0 %2923 }
 0x7d6   : > { %6864 = vrcp.f32 %v8508_v44 }
 0x7d9   : > { %v5572_v49 = vpop.f32.mrb[56].mxu0  ;;  %v8512_v13 = vpop.xlane.xlu0 %2929 }
 0x7da   : > { %v8516_v7 = vpop.xlane.xlu1 %2932  ;;  %v3048_v8 = vpop.f32.mrb[57].mxu0  ;;  %v3257_v50 = vmul.f32 %v6841_v21, %v5572_v49 }
 0x7db   : > { %v3256_v12 = vmul.f32 %v6839_v22, %v3048_v8  ;;  %v6847_v49 = vpop.eup %6846  ;;  %6866 = vrcp.f32 %v8516_v7 }
 0x7dc   : > { %v6849_v22 = vpop.eup %6848  ;;  %6868 = vrcp.f32 %v8512_v13 }
 0x7dd   : > { %v5575_v24 = vpop.f32.mrb[58].mxu0  ;;  %v8518_v36 = vpop.permute.xlu0 %3650  ;;  %5614 = vmatprep.mubr.msk.f32.mxu0 %vm8988_vm7, %v3256_v12  ;;  %vm9002_vm7 = vmmov %vm8853_vm0 }
 0x7de   : > { %v8521_v2 = vpop.permute.xlu1 %3652  ;;  %v3058_v58 = vpop.f32.mrb[59].mxu0  ;;  %5615 = vmatmul.mubr.msk.f32.vlgmr.msra.gmra.mrb[40].mxu0 %vm8989_vm9, %v3257_v50  ;;  %v3259_v39 = vmul.f32 %v6845_v4, %v5575_v24  ;;  %vm9003_vm9 = vmmov %vm8853_vm0 }
 0x7df   : > { %v3258_v18 = vmul.f32 %v6843_v46, %v3058_v58  ;;  %6067 = vmatpush3.bf16.xpose.msk.msra.mxu0 %vm7394_vm5, %v8417_v55  ;;  %v6851_v8 = vpop.eup %6850 }
 0x7e0   : > { %6070 = vmatprep.subr.msk.bf16.mxu0 %vm7394_vm5, %v6068_v33  ;;  %v6853_v12 = vpop.eup %6852 }
 0x7e1   : > { %v8529_v54 = vpop.permute.xlu0 %3654  ;;  %5617 = vmatprep.mubr.msk.f32.mxu0 %vm8990_vm8, %v3258_v18  ;;  %v6855_v0 = vpop.eup %6854  ;;  %vm9004_vm8 = vmmov %vm8853_vm0 }
 0x7e2   : > { %v8534_v43 = vpop.permute.xlu1 %3656  ;;  %5618 = vmatmul.mubr.msk.f32.gmra.mrb[42].mxu0 %vm8991_vm14, %v3259_v39  ;;  %v6857_v46 = vpop.eup %6856  ;;  %vm9005_vm14 = vmmov %vm8853_vm0 }
 0x7e3   : > { %v6859_v20 = vpop.eup %6858 }
 0x7e4   : > { %v6861_v40 = vpop.eup %6860 }
 0x7e5   : > { %v8537_v10 = vpop.permute.xlu0 %3658  ;;  %v6863_v44 = vpop.eup %6862 }
 0x7e6   : > { %v8539_v55 = vpop.permute.xlu1 %3660  ;;  %v6865_v53 = vpop.eup %6864 }
 0x7e7   : > { %6073 = vmatpush3.bf16.xpose.msk.msra.mxu0 %vm7394_vm5, %v6068_v33  ;;  %v6867_v7 = vpop.eup %6866 }
 0x7e8   : > { %6076 = vmatprep.subr.msk.bf16.mxu0 %vm7394_vm5, %v6074_v11  ;;  %v6869_v52 = vpop.eup %6868 }
 0x7e9   : > { %v8545_v17 = vpop.permute.xlu0 %3662 }
 0x7ea   : > { %v8549_v63 = vpop.permute.xlu1 %3664 }
 0x7ed   : > { %v6581_v47 = vpop.permute.xlu0 %6580 }
 0x7ee   : > { %v6576_v27 = vpop.permute.xlu1 %6575  ;;  %v6583_v59 = vunpack.i.h.bf16 %v6581_v47  ;;  %v6582_v5 = vunpack.i.l.bf16 %v6581_v47 }
 0x7ef   : > { %v6578_v29 = vunpack.i.h.bf16 %v6576_v27  ;;  %v6577_v56 = vunpack.i.l.bf16 %v6576_v27  ;;  %6079 = vmatpush3.bf16.xpose.msk.msra.mxu0 %vm7394_vm5, %v6074_v11 }
 0x7f0   : > { %6082 = vmatprep.subr.msk.bf16.mxu0 %vm7394_vm5, %v6080_v37  ;;  %v6090_v60 = vpack.c.bf16 %v6583_v59, %v6582_v5 }
 0x7f1   : > { %v6086_v28 = vpack.c.bf16 %v6578_v29, %v6577_v56  ;;  %v6596_v16 = vpop.permute.xlu0 %6595 }
 0x7f2   : > { %v6598_v1 = vunpack.i.h.bf16 %v6596_v16  ;;  %v6597_v57 = vunpack.i.l.bf16 %v6596_v16  ;;  %v6586_v9 = vpop.permute.xlu1 %6585 }
 0x7f3   : > { %v6588_v48 = vunpack.i.h.bf16 %v6586_v9  ;;  %v6587_v38 = vunpack.i.l.bf16 %v6586_v9  ;;  %6087 = vmatprep.subr.bf16.mxu1 %v6086_v28 }
 0x7f4   : > { %v8555_v19 = vpack.c.bf16 %v6598_v1, %v6597_v57  ;;  %6089 = vmatpush3.bf16.msra.mxu1 %v6086_v28 }
 0x7f5   : > { %6091 = vmatprep.subr.bf16.mxu1 %v6090_v60  ;;  %v6094_v3 = vpack.c.bf16 %v6588_v48, %v6587_v38 }
 0x7f6   : > { %v6591_v62 = vpop.permute.xlu1 %6590 }
 0x7f7   : > { %v6593_v41 = vunpack.i.h.bf16 %v6591_v62  ;;  %v6592_v6 = vunpack.i.l.bf16 %v6591_v62  ;;  %6085 = vmatpush3.bf16.xpose.msk.msra.mxu0 %vm7394_vm5, %v6080_v37  ;;  %vm8993_vm5 = vmmov %vm8853_vm0 }
 0x7f8   : > { %6093 = vmatpush3.bf16.msra.mxu1 %v6090_v60  ;;  %6103 = vmatprep.subr.bf16.mxu0 %v8555_v19 }
 0x7f9   : > { %6095 = vmatprep.subr.bf16.mxu1 %v6094_v3  ;;  %v6098_v34 = vpack.c.bf16 %v6593_v41, %v6592_v6 }
 0x7fa   : > { %v6601_v27 = vpop.permute.xlu1 %6600 }
 0x7fb   : > { %v6603_v5 = vunpack.i.h.bf16 %v6601_v27  ;;  %v6602_v29 = vunpack.i.l.bf16 %v6601_v27 }
 0x7fc   : > { %6097 = vmatpush3.bf16.msra.mxu1 %v6094_v3 }
 0x7fd   : > { %6099 = vmatprep.subr.bf16.mxu1 %v6098_v34  ;;  %v6106_v56 = vpack.c.bf16 %v6603_v5, %v6602_v29 }
 0x7ff   : > { %v5578_v32 = vpop.f32.mrb[60].mxu0 }
 0x800   : > { %6101 = vmatpush3.bf16.msra.mxu1 %v6098_v34  ;;  %v3068_v42 = vpop.f32.mrb[61].mxu0  ;;  %v3261_v23 = vmul.f32 %v6849_v22, %v5578_v32 }
 0x801   : > { %v3260_v25 = vmul.f32 %v6847_v49, %v3068_v42 }
 0x803   : > { %5620 = vmatprep.mubr.msk.f32.mxu0 %vm8992_vm11, %v3260_v25  ;;  %vm9006_vm11 = vmmov %vm8853_vm0 }
 0x804   : > { %5621 = vmatmul.mubr.msk.f32.gmra.mrb[44].mxu0 %vm8993_vm5, %v3261_v23  ;;  %vm9007_vm5 = vmmov %vm8853_vm0 }
 0x807   : > { %v5581_v31 = vpop.f32.mrb[62].mxu0 }
 0x808   : > { %v3078_v21 = vpop.f32.mrb[63].mxu0  ;;  %v3263_v24 = vmul.f32 %v6853_v12, %v5581_v31 }
 0x809   : > { %v3262_v50 = vmul.f32 %v6851_v8, %v3078_v21 }
 0x80b   : > { %5623 = vmatprep.mubr.msk.f32.mxu0 %vm8994_vm12, %v3262_v50  ;;  %vm9008_vm12 = vmmov %vm8853_vm0 }
 0x80c   : > { %5624 = vmatmul.mubr.msk.f32.gmra.mrb[46].mxu0 %vm8995_vm10, %v3263_v24  ;;  %vm9009_vm10 = vmmov %vm8853_vm0 }
 0x81b   : > { %v5600_v30 = vpop.f32.mrb[72].mxu1 }
 0x81c   : > { %v3265_v33 = vmul.f32 %v6855_v0, %v5600_v30  ;;  %v3201_v58 = vpop.f32.mrb[73].mxu1 }
 0x81d   : > { %v3264_v4 = vmul.f32 %v6857_v46, %v3201_v58 }
 0x81f   : > { %5626 = vmatprep.mubr.msk.f32.mxu0 %vm8996_vm13, %v3264_v4  ;;  %vm9010_vm13 = vmmov %vm8853_vm0 }
 0x820   : > { %v5603_v51 = vpop.f32.mrb[74].mxu1  ;;  %5627 = vmatmul.mubr.msk.f32.gmra.mrb[48].mxu0 %vm8997_vm3, %v3265_v33  ;;  %vm9011_vm3 = vmmov %vm8853_vm0 }
 0x821   : > { %v3267_v26 = vmul.f32 %v6859_v20, %v5603_v51  ;;  %v3211_v35 = vpop.f32.mrb[75].mxu1 }
 0x822   : > { %v3266_v18 = vmul.f32 %v6861_v40, %v3211_v35 }
 0x824   : > { %v5606_v39 = vpop.f32.mrb[76].mxu1  ;;  %5629 = vmatprep.mubr.msk.f32.mxu0 %vm8853_vm0, %v3266_v18 }
 0x825   : > { %v3269_v45 = vmul.f32 %v6863_v44, %v5606_v39  ;;  %v3221_v11 = vpop.f32.mrb[77].mxu1  ;;  %5630 = vmatmul.mubr.msk.f32.gmra.mrb[50].mxu0 %vm8998_vm2, %v3267_v26  ;;  %vm9013_vm2 = vmmov %vm8853_vm0 }
 0x826   : > { %v3268_v13 = vmul.f32 %v6865_v53, %v3221_v11 }
 0x828   : > { %v5609_v61 = vpop.f32.mrb[78].mxu1  ;;  %5632 = vmatprep.mubr.msk.f32.mxu0 %vm8999_vm15, %v3268_v13  ;;  %vm9014_vm15 = vmmov %vm8853_vm0 }
 0x829   : > { %v3271_v47 = vmul.f32 %v6867_v7, %v5609_v61  ;;  %v3231_v37 = vpop.f32.mrb[79].mxu1  ;;  %5633 = vmatmul.mubr.msk.f32.gmra.mrb[52].mxu0 %vm9000_vm4, %v3269_v45  ;;  %vm9015_vm4 = vmmov %vm8853_vm0 }
 0x82a   : > { %v3270_v59 = vmul.f32 %v6869_v52, %v3231_v37 }
 0x82c   : > { %5635 = vmatprep.mubr.msk.f32.mxu0 %vm9001_vm6, %v3270_v59  ;;  %vm9016_vm6 = vmmov %vm8853_vm0 }
 0x82d   : > { %5636 = vmatmul.mubr.msk.f32.gmra.mrb[54].mxu0 %vm9002_vm7, %v3271_v47  ;;  %vm9017_vm7 = vmmov %vm8853_vm0 }
 0x82e   : > { %5682 = vmatprep.mubr.msk.f32.mxu0 %vm9003_vm9, %v8518_v36  ;;  %vm9018_vm9 = vmmov %vm8853_vm0 }
 0x831   : > { %5683 = vmatmul.mubr.msk.f32.vlgmr.msra.gmra.mrb[64].mxu0 %vm9004_vm8, %v8521_v2  ;;  %vm9019_vm8 = vmmov %vm8853_vm0 }
 0x832   : > { %6105 = vmatpush3.bf16.msra.mxu0 %v8555_v19  ;;  %5685 = vmatprep.mubr.msk.f32.mxu0 %vm9005_vm14, %v8529_v54  ;;  %vm9020_vm14 = vmmov %vm8853_vm0 }
 0x833   : > { %6107 = vmatprep.subr.bf16.mxu0 %v6106_v56 }
 0x835   : > { %5686 = vmatmul.mubr.msk.f32.gmra.mrb[66].mxu0 %vm9006_vm11, %v8534_v43  ;;  %vm9021_vm11 = vmmov %vm8853_vm0 }
 0x836   : > { %6109 = vmatpush3.bf16.msra.mxu0 %v6106_v56  ;;  %5688 = vmatprep.mubr.msk.f32.mxu0 %vm9007_vm5, %v8537_v10  ;;  %vm9022_vm5 = vmmov %vm8853_vm0 }
 0x839   : > { %5689 = vmatmul.mubr.msk.f32.gmra.mrb[68].mxu0 %vm9008_vm12, %v8539_v55  ;;  %vm9023_vm12 = vmmov %vm8853_vm0 }
 0x83a   : > { %5691 = vmatprep.mubr.msk.f32.mxu0 %vm9009_vm10, %v8545_v17  ;;  %vm9024_vm10 = vmmov %vm8853_vm0 }
 0x83d   : > { %5692 = vmatmul.mubr.msk.f32.gmra.mrb[70].mxu0 %vm9010_vm13, %v8549_v63  ;;  %vm9025_vm13 = vmmov %vm8853_vm0 }
 0x840   : > { %v5656_v36 = vpop.f32.mrb[80].mxu1 }
 0x841   : > { %v3611_v2 = vpop.f32.mrb[81].mxu1  ;;  %v3822_v54 = vsel %vm795_vm1, %v5656_v36, -inf }
 0x842   : > { %3823 = vmax.xlane.f32.xlu1 %v3822_v54  ;;  %v3819_v43 = vsel %vm795_vm1, %v3611_v2, -inf }
 0x843   : > { %3820 = vmax.xlane.f32.xlu0 %v3819_v43 }
 0x844   : > { %v5659_v28 = vpop.f32.mrb[82].mxu1 }
 0x845   : > { %v3621_v16 = vpop.f32.mrb[83].mxu1  ;;  %v3828_v10 = vsel %vm795_vm1, %v5659_v28, -inf }
 0x846   : > { %v3825_v63 = vsel %vm795_vm1, %v3621_v16, -inf }
 0x847   : > { %3829 = vmax.xlane.f32.xlu0 %v3828_v10 }
 0x848   : > { %v5662_v55 = vpop.f32.mrb[84].mxu1 }
 0x849   : > { %v3631_v1 = vpop.f32.mrb[85].mxu1  ;;  %v3834_v17 = vsel %vm795_vm1, %v5662_v55, -inf }
 0x84a   : > { %3835 = vmax.xlane.f32.xlu1 %v3834_v17  ;;  %v3831_v57 = vsel %vm795_vm1, %v3631_v1, -inf }
 0x84b   : > { %3826 = vmax.xlane.f32.xlu0 %v3825_v63 }
 0x84f   : > { %3832 = vmax.xlane.f32.xlu0 %v3831_v57 }
 0x86b   : > { %v5665_v9 = vpop.f32.mrb[86].mxu1 }
 0x86c   : > { %v3641_v60 = vpop.f32.mrb[87].mxu1  ;;  %v3840_v48 = vsel %vm795_vm1, %v5665_v9, -inf }
 0x86d   : > { %3841 = vmax.xlane.f32.xlu0 %v3840_v48  ;;  %v3837_v38 = vsel %vm795_vm1, %v3641_v60, -inf }
 0x871   : > { %3838 = vmax.xlane.f32.xlu0 %v3837_v38 }
 0x8cf   : > { %v3824_v19 = vpop.xlane.xlu1 %3823 }
 0x8d0   : > { %v3868_v62 = vsub.f32 %v5656_v36, %v3824_v19  ;;  %v3821_v3 = vpop.xlane.xlu0 %3820 }
 0x8d1   : > { %v3867_v41 = vsub.f32 %v3611_v2, %v3821_v3 }
 0x8d2   : > { %v3885_v6 = vmul.f32 1.442695, %v3868_v62 }
 0x8d3   : > { %v3883_v34 = vmul.f32 1.442695, %v3867_v41 }
 0x8d4   : > { %v3830_v32 = vpop.xlane.xlu0 %3829 }
 0x8d5   : > { %6870 = vpow2.f32 %v3883_v34  ;;  %v3870_v49 = vsub.f32 %v5659_v28, %v3830_v32 }
 0x8d6   : > { %6872 = vpow2.f32 %v3885_v6 }
 0x8d7   : > { %v3836_v42 = vpop.xlane.xlu1 %3835  ;;  %v3889_v23 = vmul.f32 1.442695, %v3870_v49 }
 0x8d8   : > { %v3827_v22 = vpop.xlane.xlu0 %3826  ;;  %v3872_v31 = vsub.f32 %v5662_v55, %v3836_v42 }
 0x8d9   : > { %v3869_v25 = vsub.f32 %v3621_v16, %v3827_v22 }
 0x8da   : > { %v3893_v50 = vmul.f32 1.442695, %v3872_v31 }
 0x8db   : > { %v3887_v8 = vmul.f32 1.442695, %v3869_v25 }
 0x8dc   : > { %v3833_v21 = vpop.xlane.xlu0 %3832 }
 0x8dd   : > { %6874 = vpow2.f32 %v3887_v8  ;;  %v3871_v12 = vsub.f32 %v3631_v1, %v3833_v21 }
 0x8de   : > { %6876 = vpow2.f32 %v3889_v23 }
 0x8df   : > { %v6871_v24 = vpop.eup %6870  ;;  %v3891_v0 = vmul.f32 1.442695, %v3871_v12 }
 0x8e0   : > { %v6873_v30 = vpop.eup %6872  ;;  %5710 = vmatprep.mubr.msk.f32.mxu1 %vm795_vm1, %v6871_v24  ;;  %v3915_v54 = vsel %vm795_vm1, %v6871_v24, 0.0 }
 0x8e1   : > { %6878 = vpow2.f32 %v3891_v0  ;;  %5711 = vmatmul.mubr.msk.f32.vlgmr.msra.gmra.mrb[88].mxu1 %vm795_vm1, %v6873_v30  ;;  %v3918_v28 = vsel %vm795_vm1, %v6873_v30, 0.0 }
 0x8e2   : > { %6880 = vpow2.f32 %v3893_v50 }
 0x8e7   : > { %v6875_v46 = vpop.eup %6874 }
 0x8e8   : > { %v6877_v33 = vpop.eup %6876  ;;  %5713 = vmatprep.mubr.msk.f32.mxu1 %vm795_vm1, %v6875_v46  ;;  %v3921_v43 = vsel %vm795_vm1, %v6875_v46, 0.0 }
 0x8e9   : > { %5714 = vmatmul.mubr.msk.f32.gmra.mrb[90].mxu1 %vm795_vm1, %v6877_v33  ;;  %v3924_v16 = vsel %vm795_vm1, %v6877_v33, 0.0 }
 0x8eb   : > { %v6879_v58 = vpop.eup %6878 }
 0x8ec   : > { %v6881_v4 = vpop.eup %6880  ;;  %5716 = vmatprep.mubr.msk.f32.mxu1 %vm795_vm1, %v6879_v58  ;;  %v3927_v55 = vsel %vm795_vm1, %v6879_v58, 0.0 }
 0x8ed   : > { %5717 = vmatmul.mubr.msk.f32.gmra.mrb[92].mxu1 %vm795_vm1, %v6881_v4 }
 0x8fa   : > { %v3842_v20 = vpop.xlane.xlu0 %3841 }
 0x8fb   : > { %v3874_v51 = vsub.f32 %v5665_v9, %v3842_v20 }
 0x8fd   : > { %v3897_v35 = vmul.f32 1.442695, %v3874_v51 }
 0x8fe   : > { %v3839_v40 = vpop.xlane.xlu0 %3838 }
 0x8ff   : > { %v3873_v26 = vsub.f32 %v3641_v60, %v3839_v40 }
 0x901   : > { %v3895_v18 = vmul.f32 1.442695, %v3873_v26 }
 0x903   : > { %6882 = vpow2.f32 %v3895_v18  ;;  %v454_v18 = vld [vmem:[%s8730_s2 + $0x30] sm:$0xff] }
 0x904   : > { %6884 = vpow2.f32 %v3897_v35  ;;  %v5684_v44 = vpop.f32.mrb[64].mxu0 }
 0x905   : > { %v3780_v39 = vpop.f32.mrb[65].mxu0  ;;  %v3846_v53 = vsel %vm795_vm1, %v5684_v44, -inf }
 0x906   : > { %3847 = vmax.xlane.f32.xlu1 %v3846_v53  ;;  %v3843_v45 = vsel %vm795_vm1, %v3780_v39, -inf }
 0x907   : > { %3844 = vmax.xlane.f32.xlu0 %v3843_v45 }
 0x908   : > { %v5687_v11 = vpop.f32.mrb[66].mxu0 }
 0x909   : > { %v3790_v13 = vpop.f32.mrb[67].mxu0  ;;  %v3852_v7 = vsel %vm795_vm1, %v5687_v11, -inf }
 0x90a   : > { %v3849_v27 = vsel %vm795_vm1, %v3790_v13, -inf }
 0x90b   : > { %3853 = vmax.xlane.f32.xlu0 %v3852_v7 }
 0x90c   : > { %v5690_v61 = vpop.f32.mrb[68].mxu0 }
 0x90d   : > { %v6883_v52 = vpop.eup %6882  ;;  %v8618_v47 = vpop.f32.mrb[69].mxu0  ;;  %v3858_v29 = vsel %vm795_vm1, %v5690_v61, -inf }
 0x90e   : > { %v6885_v37 = vpop.eup %6884  ;;  %5719 = vmatprep.mubr.msk.f32.mxu1 %vm795_vm1, %v6883_v52  ;;  %v3855_v36 = vsel %vm795_vm1, %v8618_v47, -inf  ;;  %v3933_v10 = vsel %vm795_vm1, %v6883_v52, 0.0 }
 0x90f   : > { %3850 = vmax.xlane.f32.xlu0 %v3849_v27  ;;  %5720 = vmatmul.mubr.msk.f32.gmra.mrb[94].mxu1 %vm795_vm1, %v6885_v37 }
 0x910   : > { %v8623_v59 = vpop.f32.mrb[70].mxu0 }
 0x911   : > { %v3810_v5 = vpop.f32.mrb[71].mxu0  ;;  %v3864_v2 = vsel %vm795_vm1, %v8623_v59, -inf }
 0x912   : > { %v3861_v56 = vsel %vm795_vm1, %v3810_v5, -inf }
 0x913   : > { %3859 = vmax.xlane.f32.xlu0 %v3858_v29  ;;  %3862 = vmax.xlane.f32.xlu1 %v3861_v56 }
 0x917   : > { %3856 = vmax.xlane.f32.xlu0 %v3855_v36 }
 0x91b   : > { %3865 = vmax.xlane.f32.xlu0 %v3864_v2 }
 0x924   : > { %6605 = vrot.lane.b32.xlu1 %v7130_v14, %s6949_s27  ;;  %v3930_v14 = vsel %vm795_vm1, %v6881_v4, 0.0 }
 0x931   : > { %6610 = vrot.lane.b32.xlu0 %v8932_v15, %s6949_s27  ;;  %v3936_v15 = vsel %vm795_vm1, %v6885_v37, 0.0 }
 0x948   : > { %3916 = vadd.xlane.f32.xlu1 %v3915_v54 }
 0x94c   : > { %3922 = vadd.xlane.f32.xlu1 %v3921_v43 }
 0x950   : > { %3919 = vadd.xlane.f32.xlu0 %v3918_v28  ;;  %3925 = vadd.xlane.f32.xlu1 %v3924_v16 }
 0x954   : > { %3934 = vadd.xlane.f32.xlu0 %v3933_v10  ;;  %3928 = vadd.xlane.f32.xlu1 %v3927_v55 }
 0x958   : > { %3931 = vadd.xlane.f32.xlu1 %v3930_v14 }
 0x95c   : > { %3937 = vadd.xlane.f32.xlu1 %v3936_v15 }
 0x993   : > { %v3848_v1 = vpop.xlane.xlu1 %3847 }
 0x994   : > { %v3876_v17 = vsub.f32 %v5684_v44, %v3848_v1  ;;  %v3845_v63 = vpop.xlane.xlu0 %3844  ;;  %v455_v44 = vld [vmem:[%s8730_s2 + $0x38] sm:$0xff] }
 0x995   : > { %v3875_v57 = vsub.f32 %v3780_v39, %v3845_v63 }
 0x996   : > { %v3901_v9 = vmul.f32 1.442695, %v3876_v17 }
 0x997   : > { %v3899_v60 = vmul.f32 1.442695, %v3875_v57 }
 0x998   : > { %6886 = vpow2.f32 %v3901_v9  ;;  %v3854_v48 = vpop.xlane.xlu0 %3853 }
 0x999   : > { %6888 = vpow2.f32 %v3899_v60  ;;  %v3878_v38 = vsub.f32 %v5687_v11, %v3854_v48 }
 0x99b   : > { %v3905_v19 = vmul.f32 1.442695, %v3878_v38 }
 0x99c   : > { %v3851_v62 = vpop.xlane.xlu0 %3850 }
 0x99d   : > { %6890 = vpow2.f32 %v3905_v19  ;;  %v3877_v3 = vsub.f32 %v3790_v13, %v3851_v62  ;;  %v6118_v13 = vpack.c.bf16 %v455_v44, %v454_v18 }
 0x99f   : > { %v3903_v41 = vmul.f32 1.442695, %v3877_v3 }
 0x9a0   : > { %v3860_v6 = vpop.xlane.xlu0 %3859  ;;  %v3863_v34 = vpop.xlane.xlu1 %3862 }
 0x9a1   : > { %6892 = vpow2.f32 %v3903_v41  ;;  %v3880_v32 = vsub.f32 %v5690_v61, %v3860_v6  ;;  %v3881_v25 = vsub.f32 %v3810_v5, %v3863_v34 }
 0x9a2   : > { %v6887_v49 = vpop.eup %6886 }
 0x9a3   : > { %v6889_v42 = vpop.eup %6888  ;;  %v3909_v22 = vmul.f32 1.442695, %v3880_v32  ;;  %v3942_v23 = vsel %vm795_vm1, %v6887_v49, 0.0  ;;  %v3911_v30 = vmul.f32 1.442695, %v3881_v25 }
 0x9a4   : > { %5738 = vmatprep.mubr.msk.f32.mxu0 %vm795_vm1, %v6889_v42  ;;  %v3857_v31 = vpop.xlane.xlu0 %3856  ;;  %3943 = vadd.xlane.f32.xlu1 %v3942_v23  ;;  %v6606_v8 = vpop.permute.xlu1 %6605  ;;  %v3939_v21 = vsel %vm795_vm1, %v6889_v42, 0.0 }
 0x9a5   : > { %6894 = vpow2.f32 %v3909_v22  ;;  %v3879_v12 = vsub.f32 %v8618_v47, %v3857_v31  ;;  %v6608_v50 = vunpack.i.h.bf16 %v6606_v8  ;;  %v6607_v24 = vunpack.i.l.bf16 %v6606_v8  ;;  %3940 = vadd.xlane.f32.xlu0 %v3939_v21 }
 0x9a7   : > { %v6891_v0 = vpop.eup %6890  ;;  %v3907_v46 = vmul.f32 1.442695, %v3879_v12  ;;  %v6110_v33 = vpack.c.bf16 %v6608_v50, %v6607_v24 }
 0x9a8   : > { %v3866_v58 = vpop.xlane.xlu0 %3865  ;;  %v3948_v4 = vsel %vm795_vm1, %v6891_v0, 0.0 }
 0x9a9   : > { %6896 = vpow2.f32 %v3907_v46  ;;  %v3882_v20 = vsub.f32 %v8623_v59, %v3866_v58  ;;  %3949 = vadd.xlane.f32.xlu1 %v3948_v4  ;;  %6111 = vmatprep.subr.bf16.mxu0 %v6110_v33 }
 0x9aa   : > { %6113 = vmatpush3.bf16.msra.mxu0 %v6110_v33  ;;  %6898 = vpow2.f32 %v3911_v30 }
 0x9ab   : > { %v6893_v51 = vpop.eup %6892  ;;  %v3913_v40 = vmul.f32 1.442695, %v3882_v20 }
 0x9ac   : > { %v6611_v26 = vpop.permute.xlu0 %6610  ;;  %v3945_v35 = vsel %vm795_vm1, %v6893_v51, 0.0 }
 0x9ad   : > { %6900 = vpow2.f32 %v3913_v40  ;;  %v6613_v39 = vunpack.i.h.bf16 %v6611_v26  ;;  %v6612_v53 = vunpack.i.l.bf16 %v6611_v26  ;;  %3946 = vadd.xlane.f32.xlu0 %v3945_v35 }
 0x9af   : > { %v6895_v45 = vpop.eup %6894  ;;  %v6114_v11 = vpack.c.bf16 %v6613_v39, %v6612_v53 }
 0x9b0   : > { %v3954_v7 = vsel %vm795_vm1, %v6895_v45, 0.0 }
 0x9b1   : > { %3955 = vadd.xlane.f32.xlu1 %v3954_v7  ;;  %6115 = vmatprep.subr.bf16.mxu0 %v6114_v11 }
 0x9b2   : > { %6117 = vmatpush3.bf16.msra.mxu0 %v6114_v11 }
 0x9b3   : > { %v6897_v61 = vpop.eup %6896  ;;  %6119 = vmatprep.subr.bf16.mxu0 %v6118_v13 }
 0x9b4   : > { %v5712_v52 = vpop.f32.mrb[88].mxu1  ;;  %v3951_v47 = vsel %vm795_vm1, %v6897_v61, 0.0  ;;  %v6899_v37 = vpop.eup %6898 }
 0x9b5   : > { %3952 = vadd.xlane.f32.xlu0 %v3951_v47  ;;  %5739 = vmatmul.mubr.msk.f32.vlgmr.msra.gmra.mrb[72].mxu0 %vm795_vm1, %v6887_v49  ;;  %v4077_v27 = vpop.f32.mrb[89].mxu1  ;;  %v3957_v29 = vsel %vm795_vm1, %v6899_v37, 0.0 }
 0x9b6   : > { %5741 = vmatprep.mubr.msk.f32.mxu0 %vm795_vm1, %v6893_v51  ;;  %6121 = vmatpush3.bf16.msra.mxu0 %v6118_v13 }
 0x9b7   : > { %v6901_v59 = vpop.eup %6900 }
 0x9b8   : > { %v3960_v5 = vsel %vm795_vm1, %v6901_v59, 0.0 }
 0x9b9   : > { %3961 = vadd.xlane.f32.xlu1 %v3960_v5  ;;  %3958 = vadd.xlane.f32.xlu0 %v3957_v29  ;;  %v4885_v5 = vld [vmem:[%s8731_s3] ss:$0 sm:$0xff] }
 0x9ba   : > { %5742 = vmatmul.mubr.msk.f32.gmra.mrb[74].mxu0 %vm795_vm1, %v6891_v0 }
 0x9bb   : > { %5744 = vmatprep.mubr.msk.f32.mxu0 %vm795_vm1, %v6897_v61 }
 0x9bc   : > { %v5715_v56 = vpop.f32.mrb[90].mxu1 }
 0x9bd   : > { %v4087_v36 = vpop.f32.mrb[91].mxu1 }
 0x9be   : > { %5745 = vmatmul.mubr.msk.f32.gmra.mrb[76].mxu0 %vm795_vm1, %v6895_v45 }
 0x9bf   : > { %5747 = vmatprep.mubr.msk.f32.mxu0 %vm795_vm1, %v6899_v37 }
 0x9c0   : > { %v5718_v2 = vpop.f32.mrb[92].mxu1 }
 0x9c1   : > { %v4097_v54 = vpop.f32.mrb[93].mxu1 }
 0x9c2   : > { %5748 = vmatmul.mubr.msk.f32.gmra.mrb[78].mxu0 %vm795_vm1, %v6901_v59  ;;  %vm9012_vm1 = vmmov %vm8853_vm0 }
 0x9d5   : > { %v3917_v43 = vpop.xlane.xlu1 %3916 }
 0x9d6   : > { %6902 = vrcp.f32 %v3917_v43 }
 0x9d9   : > { %v3923_v28 = vpop.xlane.xlu1 %3922 }
 0x9da   : > { %6904 = vrcp.f32 %v3923_v28 }
 0x9dd   : > { %v3920_v16 = vpop.xlane.xlu0 %3919  ;;  %v3926_v10 = vpop.xlane.xlu1 %3925 }
 0x9de   : > { %6906 = vrcp.f32 %v3920_v16 }
 0x9df   : > { %6908 = vrcp.f32 %v3926_v10 }
 0x9e0   : > { %v6903_v55 = vpop.eup %6902 }
 0x9e1   : > { %v3929_v14 = vpop.xlane.xlu1 %3928  ;;  %v4285_v15 = vmul.f32 %v6903_v55, %v4077_v27  ;;  %v3935_v1 = vpop.xlane.xlu0 %3934 }
 0x9e2   : > { %v5721_v17 = vpop.f32.mrb[94].mxu1  ;;  %6910 = vrcp.f32 %v3929_v14 }
 0x9e3   : > { %5754 = vmatprep.mubr.msk.f32.mxu0 %vm9011_vm3, %v4285_v15  ;;  %v4107_v63 = vpop.f32.mrb[95].mxu1  ;;  %6912 = vrcp.f32 %v3935_v1  ;;  %vm9026_vm3 = vcmask 261120  }
 0x9e4   : > { %v6905_v9 = vpop.eup %6904 }
 0x9e5   : > { %v3932_v57 = vpop.xlane.xlu1 %3931  ;;  %v4287_v62 = vmul.f32 %v6905_v9, %v4087_v36 }
 0x9e6   : > { %6914 = vrcp.f32 %v3932_v57 }
 0x9e8   : > { %v6907_v60 = vpop.eup %6906 }
 0x9e9   : > { %v4286_v48 = vmul.f32 %v6907_v60, %v5712_v52  ;;  %v3938_v38 = vpop.xlane.xlu1 %3937  ;;  %v6909_v19 = vpop.eup %6908 }
 0x9ea   : > { %6916 = vrcp.f32 %v3938_v38  ;;  %v4288_v41 = vmul.f32 %v6909_v19, %v5715_v56 }
 0x9eb   : > { %5755 = vmatmul.mubr.msk.f32.vlgmr.msra.gmra.mrb[40].mxu0 %vm9012_vm1, %v4286_v48  ;;  %vm9027_vm1 = vmmov %vm9026_vm3 }
 0x9ec   : > { %5757 = vmatprep.mubr.msk.f32.mxu0 %vm8853_vm0, %v4287_v62  ;;  %v6911_v3 = vpop.eup %6910  ;;  %vm9028_vm0 = vmmov %vm9027_vm1 }
 0x9ed   : > { %v4289_v6 = vmul.f32 %v6911_v3, %v4097_v54  ;;  %v6913_v34 = vpop.eup %6912 }
 0x9ee   : > { %v4291_v42 = vmul.f32 %v6913_v34, %v4107_v63 }
 0x9ef   : > { %5758 = vmatmul.mubr.msk.f32.gmra.mrb[42].mxu0 %vm9013_vm2, %v4288_v41  ;;  %vm9029_vm2 = vmmov %vm9028_vm0 }
 0x9f0   : > { %v6915_v32 = vpop.eup %6914  ;;  %5760 = vmatprep.mubr.msk.f32.mxu0 %vm9014_vm15, %v4289_v6  ;;  %vm9030_vm15 = vmmov %vm9028_vm0 }
 0x9f1   : > { %v4290_v49 = vmul.f32 %v6915_v32, %v5718_v2 }
 0x9f3   : > { %5761 = vmatmul.mubr.msk.f32.gmra.mrb[44].mxu0 %vm9015_vm4, %v4290_v49  ;;  %vm9031_vm4 = vmmov %vm9028_vm0 }
 0x9f4   : > { %v6917_v22 = vpop.eup %6916  ;;  %5763 = vmatprep.mubr.msk.f32.mxu0 %vm9016_vm6, %v4291_v42  ;;  %vm9032_vm6 = vmmov %vm9028_vm0 }
 0x9f5   : > { %v4292_v25 = vmul.f32 %v6917_v22, %v5721_v17 }
 0x9f7   : > { %5764 = vmatmul.mubr.msk.f32.gmra.mrb[46].mxu0 %vm9017_vm7, %v4292_v25  ;;  %vm9033_vm7 = vmmov %vm9028_vm0 }
 0xa31   : > { %v3944_v31 = vpop.xlane.xlu1 %3943 }
 0xa32   : > { %v3941_v23 = vpop.xlane.xlu0 %3940 }
 0xa33   : > { %6918 = vrcp.f32 %v3941_v23 }
 0xa34   : > { %6920 = vrcp.f32 %v3944_v31 }
 0xa36   : > { %v3950_v21 = vpop.xlane.xlu1 %3949 }
 0xa3a   : > { %v3947_v8 = vpop.xlane.xlu0 %3946 }
 0xa3b   : > { %6922 = vrcp.f32 %v3947_v8 }
 0xa3c   : > { %6924 = vrcp.f32 %v3950_v21 }
 0xa3d   : > { %v6919_v0 = vpop.eup %6918 }
 0xa3e   : > { %v3956_v50 = vpop.xlane.xlu1 %3955  ;;  %v6921_v33 = vpop.eup %6920 }
 0xa42   : > { %v3953_v12 = vpop.xlane.xlu0 %3952 }
 0xa43   : > { %6926 = vrcp.f32 %v3953_v12 }
 0xa44   : > { %6928 = vrcp.f32 %v3956_v50 }
 0xa45   : > { %v6923_v40 = vpop.eup %6922 }
 0xa46   : > { %v3959_v30 = vpop.xlane.xlu0 %3958  ;;  %v3962_v58 = vpop.xlane.xlu1 %3961 }
 0xa47   : > { %6930 = vrcp.f32 %v3959_v30  ;;  %v6925_v35 = vpop.eup %6924 }
 0xa48   : > { %6932 = vrcp.f32 %v3962_v58 }
 0xa4d   : > { %v6927_v53 = vpop.eup %6926 }
 0xa4e   : > { %v6929_v11 = vpop.eup %6928 }
 0xa51   : > { %v6931_v52 = vpop.eup %6930 }
 0xa52   : > { %v6933_v37 = vpop.eup %6932 }
 0xa88   : > { %v5740_v24 = vpop.f32.mrb[72].mxu0 }
 0xa89   : > { %v4230_v46 = vpop.f32.mrb[73].mxu0  ;;  %v4294_v20 = vmul.f32 %v6921_v33, %v5740_v24 }
 0xa8a   : > { %v4293_v4 = vmul.f32 %v6919_v0, %v4230_v46 }
 0xa8c   : > { %5766 = vmatprep.mubr.msk.f32.mxu0 %vm9018_vm9, %v4293_v4  ;;  %vm9034_vm9 = vmmov %vm9028_vm0 }
 0xa8d   : > { %v5743_v51 = vpop.f32.mrb[74].mxu0  ;;  %5767 = vmatmul.mubr.msk.f32.gmra.mrb[48].mxu0 %vm9019_vm8, %v4294_v20  ;;  %vm9035_vm8 = vmmov %vm9028_vm0 }
 0xa8e   : > { %v4240_v26 = vpop.f32.mrb[75].mxu0  ;;  %v4296_v44 = vmul.f32 %v6925_v35, %v5743_v51 }
 0xa8f   : > { %v4295_v18 = vmul.f32 %v6923_v40, %v4240_v26 }
 0xa91   : > { %v5746_v39 = vpop.f32.mrb[76].mxu0  ;;  %5769 = vmatprep.mubr.msk.f32.mxu0 %vm9020_vm14, %v4295_v18  ;;  %vm9036_vm14 = vmmov %vm9028_vm0 }
 0xa92   : > { %v4250_v45 = vpop.f32.mrb[77].mxu0  ;;  %5770 = vmatmul.mubr.msk.f32.gmra.mrb[50].mxu0 %vm9021_vm11, %v4296_v44  ;;  %v4298_v7 = vmul.f32 %v6929_v11, %v5746_v39  ;;  %vm9037_vm11 = vmmov %vm9028_vm0 }
 0xa93   : > { %v4297_v13 = vmul.f32 %v6927_v53, %v4250_v45 }
 0xa95   : > { %v5749_v61 = vpop.f32.mrb[78].mxu0  ;;  %5772 = vmatprep.mubr.msk.f32.mxu0 %vm9022_vm5, %v4297_v13  ;;  %vm9038_vm5 = vmmov %vm9028_vm0 }
 0xa96   : > { %v4260_v47 = vpop.f32.mrb[79].mxu0  ;;  %5773 = vmatmul.mubr.msk.f32.gmra.mrb[52].mxu0 %vm9023_vm12, %v4298_v7  ;;  %v4300_v59 = vmul.f32 %v6933_v37, %v5749_v61  ;;  %vm9039_vm12 = vmmov %vm9028_vm0 }
 0xa97   : > { %v4299_v27 = vmul.f32 %v6931_v52, %v4260_v47 }
 0xa99   : > { %5775 = vmatprep.mubr.msk.f32.mxu0 %vm9024_vm10, %v4299_v27  ;;  %vm9040_vm10 = vmmov %vm9028_vm0 }
 0xa9a   : > { %5776 = vmatmul.mubr.msk.f32.gmra.mrb[54].mxu0 %vm9025_vm13, %v4300_v59  ;;  %vm9041_vm13 = vmmov %vm9028_vm0 }
 0xabe   : > { %v5756_v29 = vpop.f32.mrb[40].mxu0 }
 0xabf   : > { %v4518_v56 = vadd.f32 %v5756_v29, %v4885_v5  ;;  %v4415_v36 = vpop.f32.mrb[41].mxu0 }
 0xac0   : > { %v4517_v2 = vadd.f32 %v4885_v5, %v4415_v36 }
 0xac1   : > { %4534 = vst.msk [vmem:[%s8691_s17 + $0x8] sm:$0xff] %vm9026_vm3, %v4518_v56 }
 0xac2   : > { %4533 = vst.msk [vmem:[%s8691_s17] sm:$0xff] %vm9027_vm1, %v4517_v2  ;;  %v5759_v54 = vpop.f32.mrb[42].mxu0 }
 0xac3   : > { %v4520_v43 = vadd.f32 %v5759_v54, %v4885_v5  ;;  %v4425_v28 = vpop.f32.mrb[43].mxu0 }
 0xac4   : > { %v4519_v16 = vadd.f32 %v4885_v5, %v4425_v28 }
 0xac5   : > { %4536 = vst.msk [vmem:[%s8691_s17 + $0x18] sm:$0xff] %vm9028_vm0, %v4520_v43 }
 0xac6   : > { %4535 = vst.msk [vmem:[%s8691_s17 + $0x10] sm:$0xff] %vm9029_vm2, %v4519_v16  ;;  %v5762_v10 = vpop.f32.mrb[44].mxu0 }
 0xac7   : > { %v4522_v55 = vadd.f32 %v5762_v10, %v4885_v5  ;;  %v4435_v14 = vpop.f32.mrb[45].mxu0 }
 0xac8   : > { %v4521_v15 = vadd.f32 %v4885_v5, %v4435_v14 }
 0xac9   : > { %4538 = vst.msk [vmem:[%s8691_s17 + $0x28] sm:$0xff] %vm9030_vm15, %v4522_v55 }
 0xaca   : > { %4537 = vst.msk [vmem:[%s8691_s17 + $0x20] sm:$0xff] %vm9031_vm4, %v4521_v15  ;;  %v5765_v1 = vpop.f32.mrb[46].mxu0 }
 0xacb   : > { %v4524_v17 = vadd.f32 %v5765_v1, %v4885_v5  ;;  %v4445_v63 = vpop.f32.mrb[47].mxu0 }
 0xacc   : > { %v4523_v57 = vadd.f32 %v4885_v5, %v4445_v63 }
 0xacd   : > { %4540 = vst.msk [vmem:[%s8691_s17 + $0x38] sm:$0xff] %vm9032_vm6, %v4524_v17 }
 0xace   : > { %4539 = vst.msk [vmem:[%s8691_s17 + $0x30] sm:$0xff] %vm9033_vm7, %v4523_v57 }
 0xb60   : > { %v5768_v9 = vpop.f32.mrb[48].mxu0 }
 0xb61   : > { %v4526_v60 = vadd.f32 %v5768_v9, %v4885_v5  ;;  %v4455_v48 = vpop.f32.mrb[49].mxu0 }
 0xb62   : > { %v4525_v38 = vadd.f32 %v4885_v5, %v4455_v48 }
 0xb63   : > { %4542 = vst.msk [vmem:[%s8691_s17 + $0x48] sm:$0xff] %vm9034_vm9, %v4526_v60 }
 0xb64   : > { %4541 = vst.msk [vmem:[%s8691_s17 + $0x40] sm:$0xff] %vm9035_vm8, %v4525_v38 }
 0xb65   : > { %v5771_v19 = vpop.f32.mrb[50].mxu0 }
 0xb66   : > { %v4528_v62 = vadd.f32 %v5771_v19, %v4885_v5  ;;  %v4465_v3 = vpop.f32.mrb[51].mxu0 }
 0xb67   : > { %v4527_v41 = vadd.f32 %v4885_v5, %v4465_v3 }
 0xb68   : > { %4544 = vst.msk [vmem:[%s8691_s17 + $0x58] sm:$0xff] %vm9036_vm14, %v4528_v62 }
 0xb69   : > { %4543 = vst.msk [vmem:[%s8691_s17 + $0x50] sm:$0xff] %vm9037_vm11, %v4527_v41  ;;  %v5774_v6 = vpop.f32.mrb[52].mxu0 }
 0xb6a   : > { %v4530_v34 = vadd.f32 %v5774_v6, %v4885_v5  ;;  %v4475_v32 = vpop.f32.mrb[53].mxu0 }
 0xb6b   : > { %v4529_v49 = vadd.f32 %v4885_v5, %v4475_v32 }
 0xb6c   : > { %4546 = vst.msk [vmem:[%s8691_s17 + $0x68] sm:$0xff] %vm9038_vm5, %v4530_v34 }
 0xb6d   : > { %4545 = vst.msk [vmem:[%s8691_s17 + $0x60] sm:$0xff] %vm9039_vm12, %v4529_v49  ;;  %v5777_v42 = vpop.f32.mrb[54].mxu0 }
 0xb6e   : > { %v4532_v22 = vadd.f32 %v5777_v42, %v4885_v5  ;;  %v4485_v25 = vpop.f32.mrb[55].mxu0 }
 0xb6f   : > { %v4531_v23 = vadd.f32 %v4885_v5, %v4485_v25 }
 0xb70   : > { %4548 = vst.msk [vmem:[%s8691_s17 + $0x78] sm:$0xff] %vm9040_vm10, %v4532_v22 }
 0xb71   : > { %4547 = vst.msk [vmem:[%s8691_s17 + $0x70] sm:$0xff] %vm9041_vm13, %v4531_v23 }
 0xb72 PF: > { %s14_s15 = sadd.s32 1, %s6940_s15  }
 0xb73   : > { %p11_p4 = scmp.ge.s32.totalorder %s14_s15, 4  }
 0xb75   :  { %13 = sbr.rel (!%p11_p4) target bundleno = 1 (0x1), region = 66 }

</bundles_post_ra>
